<compile_context>
chip_gen: v7x
topology: tpu7x:2x2x1
jax: 0.10.0
libtpu: 0.0.40
codegen_flags: <defaults>
</compile_context>

<pallas_src>
import functools

import jax
import jax.numpy as jnp
from jax import lax
from jax.experimental import pallas as pl
from jax.experimental.pallas import tpu as pltpu


def _round_up(x, m):
    return ((x + m - 1) // m) * m


def _dot_bf16(a, b):
    # bf16 x bf16 -> f32 accumulate: single-pass MXU on all TPU generations.
    return jnp.dot(a.astype(jnp.bfloat16), b.astype(jnp.bfloat16),
                   preferred_element_type=jnp.float32)


# ---------------------------------------------------------------------------
# the Pallas kernel (TILE_B batch rows per grid step)
# ---------------------------------------------------------------------------
def state_aware_kernel(state_ref, mem_ref, w1_ref, whh_ref, g3_ref,
                       sel_ref, selT_ref, vec_ref, gb3_ref, bias_ref,
                       out_ref, *, h_real):
    TB, Dp = state_ref.shape            # batch rows in this block, padded dim
    Mp = mem_ref.shape[1]               # padded memory-slot count (multiple of 8)
    Hp = w1_ref.shape[1]                # padded hidden dim (multiple of 128)

    # ---- unpack packed parameter slabs (static slices / leading index) ----
    vecs = vec_ref[...]                                    # (16, Hp) f32

    def vrow(i):
        return vecs[i:i + 1, :]                            # (1, Hp)

    b1, ln1g, ln1b, b2 = vrow(0), vrow(1), vrow(2), vrow(3)
    bq, bk, bv, bo = vrow(4), vrow(5), vrow(6), vrow(7)
    gb1, gln1g, gln1b = vrow(8), vrow(9), vrow(10)
    gb2, gln2g, gln2b = vrow(11), vrow(12), vrow(13)

    w2, wq, wk, wv = whh_ref[0], whh_ref[1], whh_ref[2], whh_ref[3]
    wo, g1a, g1b, g2 = whh_ref[4], whh_ref[5], whh_ref[6], whh_ref[7]

    inv_h = 1.0 / float(h_real)
    n_pad = float(Hp - h_real)

    def layernorm(x, gamma, beta, eps=1e-5):
        # LayerNorm over the h_real true lanes only.  Padded lanes of x are
        # exactly zero and gamma/beta are zero-padded, so padded output lanes
        # stay zero.  Keep eps: zero-padded batch rows hit var == 0.
        s = jnp.sum(x, axis=-1, keepdims=True)
        mean = s * inv_h
        d = x - mean
        var = (jnp.sum(d * d, axis=-1, keepdims=True)
               - n_pad * mean * mean) * inv_h
        return d * lax.rsqrt(var + eps) * gamma + beta

    def encode(x):
        h = _dot_bf16(x, w1_ref[...]) + b1
        h = jnp.maximum(layernorm(h, ln1g, ln1b), 0.0)
        return _dot_bf16(h, w2) + b2

    # ---- state encoder: two matmul slabs, no concatenate ------------------
    xs = state_ref[...]                                    # (TB, Dp) bf16
    xm = mem_ref[...].reshape(TB * Mp, Dp)                 # (TB*Mp, Dp) bf16
    se = encode(xs)                                        # (TB, Hp)    f32
    me = encode(xm)                                        # (TB*Mp, Hp) f32

    # ---- multi-head attention (query = state, keys/values = memory) -------
    q = _dot_bf16(se, wq) + bq                             # (TB, Hp)
    k = _dot_bf16(me, wk) + bk                             # (TB*Mp, Hp)
    v = _dot_bf16(me, wv) + bv                             # (TB*Mp, Hp)

    # per-(slot, head) scores, kept in f32 (tiny reductions); the
    # 1/sqrt(head_dim) scale is folded into sel_ref in the wrapper.
    qk = (q.reshape(TB, 1, Hp) * k.reshape(TB, Mp, Hp)).reshape(TB * Mp, Hp)
    s = jnp.dot(qk, sel_ref[...], preferred_element_type=jnp.float32)
    s3 = s.reshape(TB, Mp, -1) + bias_ref[...]             # (TB, Mp, SELW)

    # softmax over memory slots = sublane-axis reductions; EUP reciprocal.
    mx = jnp.max(s3, axis=1, keepdims=True)
    e = jnp.exp(s3 - mx)
    den = jnp.sum(e, axis=1, keepdims=True)
    p = e * pl.reciprocal(den, approx=True)                # (TB, Mp, SELW)

    # expand per-head probs back to Hp lanes, weight values, sum over slots.
    pf = jnp.dot(p.reshape(TB * Mp, -1), selT_ref[...],
                 preferred_element_type=jnp.float32)       # (TB*Mp, Hp)
    ctx = jnp.sum((pf * v).reshape(TB, Mp, Hp), axis=1)    # (TB, Hp)
    attn = _dot_bf16(ctx, wo) + bo                         # (TB, Hp)

    # ---- generator on concat([state_encoded, memory_attended]) ------------
    g = _dot_bf16(se, g1a) + _dot_bf16(attn, g1b) + gb1
    g = jnp.maximum(layernorm(g, gln1g, gln1b), 0.0)
    g = _dot_bf16(g, g2) + gb2
    g = jnp.maximum(layernorm(g, gln2g, gln2b), 0.0)
    out = _dot_bf16(g, g3_ref[...]) + gb3_ref[...]         # (TB, Dp)

    # L2 normalize (rsqrt on the EUP; eps keeps zero / padded rows finite).
    inv_norm = lax.rsqrt(jnp.sum(out * out, axis=-1, keepdims=True) + 1e-12)
    out_ref[...] = out * inv_norm


# ---------------------------------------------------------------------------
# wrapper: dim handling, lane-dense padding, packing, pallas_call plumbing
# ---------------------------------------------------------------------------
def state_aware_generator(state, memory_vectors, params, *, num_heads=8,
                          block_b=256):
    # PyTorch-style dim handling (the query sequence length is always 1)
    if state.ndim == 1:
        state = state[None, :]
    elif state.ndim == 3:
        state = state[:, 0, :]
    if memory_vectors.ndim == 2:
        memory_vectors = memory_vectors[:, None, :]

    B, D = state.shape
    Bm, M, Dm = memory_vectors.shape
    assert B == Bm and D == Dm, "state / memory batch and feature dims must match"
    H = params["w1"].shape[1]
    assert H % num_heads == 0
    hd = H // num_heads

    Dp = _round_up(D, 128)             # lane-dense feature dim
    Hp = _round_up(H, 128)             # lane-dense hidden dim
    Mp = _round_up(M, 8)               # sublane-aligned slot count
    SELW = _round_up(num_heads, 128)   # lane-dense head axis

    # ---- batch tiling; >= 2 grid steps when possible (v7x: 2 TensorCores) -
    b8 = _round_up(B, 8)
    tile_b = _round_up(min(block_b, b8), 8)
    if b8 >= 16:
        tile_b = min(tile_b, _round_up(b8 // 2, 8))
    b_pad = _round_up(B, tile_b)
    grid = (b_pad // tile_b,)

    # ---- inputs: bf16 (half the streamed DMA bytes), zero-padded, natural layout
    state_p = jnp.pad(state.astype(jnp.bfloat16),
                      ((0, b_pad - B), (0, Dp - D)))
    mem_p = jnp.pad(memory_vectors.astype(jnp.bfloat16),
                    ((0, b_pad - B), (0, Mp - M), (0, Dp - D)))

    # ---- parameters: zero-padded to lane-dense shapes and packed ----------
    def pad2(w, r, c):
        w = jnp.asarray(w, jnp.float32)
        return jnp.pad(w, ((0, r - w.shape[0]), (0, c - w.shape[1])))

    def padv(v, n):
        v = jnp.asarray(v, jnp.float32).reshape(-1)
        return jnp.pad(v, (0, n - v.shape[0]))

    w1_p = pad2(params["w1"], Dp, Hp).astype(jnp.bfloat16)          # (Dp, Hp)
    w_hh = jnp.stack([pad2(params[k], Hp, Hp) for k in
                      ("w2", "wq", "wk", "wv", "wo", "g1a", "g1b", "g2")]
                     ).astype(jnp.bfloat16)                          # (8, Hp, Hp)
    g3_p = pad2(params["g3"], Hp, Dp).astype(jnp.bfloat16)           # (Hp, Dp)

    vec_names = ("b1", "ln1_g", "ln1_b", "b2", "bq", "bk", "bv", "bo",
                 "gb1", "gln1_g", "gln1_b", "gb2", "gln2_g", "gln2_b")
    vec = jnp.stack([padv(params[k], Hp) for k in vec_names])
    vec = jnp.pad(vec, ((0, 16 - vec.shape[0]), (0, 0)))             # (16, Hp)
    gb3_p = padv(params["gb3"], Dp)[None, :]                         # (1, Dp)

    # head-selection matrices (f32: keeps score / prob reductions in f32);
    # the 1/sqrt(head_dim) scale is folded into sel.
    head_of = jnp.arange(Hp) // hd
    valid = jnp.arange(Hp) < H
    sel = ((head_of[:, None] == jnp.arange(SELW)[None, :]) & valid[:, None]
           ).astype(jnp.float32)                                     # (Hp, SELW)
    selT = sel.T                                                     # (SELW, Hp)
    sel = sel * (1.0 / float(hd) ** 0.5)

    # additive score bias: 0 for real slots, -1e30 for padded slots
    slot_bias = jnp.where(jnp.arange(Mp) < M, 0.0, -1e30).astype(jnp.float32)
    slot_bias = jnp.broadcast_to(slot_bias[None, :, None], (1, Mp, SELW))

    weights = (w1_p, w_hh, g3_p, sel, selT, vec, gb3_p, slot_bias)
    kernel = functools.partial(state_aware_kernel, h_real=H)

    # VMEM budget: double-buffered bf16 inputs + single-buffered weights +
    # generous f32 intermediates.  Floor 32 MiB (> v5e's 16 MiB scoped
    # default), cap 64 MiB (v7x physical VMEM per TensorCore).
    in_bytes = 2 * tile_b * Dp * 2 + 2 * tile_b * Mp * Dp * 2
    out_bytes = 2 * tile_b * Dp * 4
    w_bytes = sum(int(w.size) * w.dtype.itemsize for w in weights)
    tmp_bytes = 10 * tile_b * (Mp + 1) * max(Hp, SELW) * 4
    vmem_limit = int(min(max(1.5 * (in_bytes + out_bytes + w_bytes + tmp_bytes),
                             32 * 1024 * 1024), 64 * 1024 * 1024))

    def build(single_buffer_weights):
        def const_spec(a):
            nd = a.ndim
            if single_buffer_weights:
                # constant index_map -> a second buffer is pure VMEM waste
                return pl.BlockSpec(a.shape, lambda i, _n=nd: (0,) * _n,
                                    pipeline_mode=pl.Buffered(1))
            return pl.BlockSpec(a.shape, lambda i, _n=nd: (0,) * _n)

        return pl.pallas_call(
            kernel,
            out_shape=jax.ShapeDtypeStruct((b_pad, Dp), jnp.float32),
            grid=grid,
            in_specs=[
                pl.BlockSpec((tile_b, Dp), lambda i: (i, 0)),        # state
                pl.BlockSpec((tile_b, Mp, Dp), lambda i: (i, 0, 0)),  # memory
            ] + [const_spec(w) for w in weights],
            out_specs=pl.BlockSpec((tile_b, Dp), lambda i: (i, 0)),  # lane-dense
            compiler_params=pltpu.CompilerParams(
                dimension_semantics=("parallel",),
                vmem_limit_bytes=vmem_limit),
        )

    args = (state_p, mem_p) + weights
    try:
        out = build(True)(*args)
    except Exception:
        # fallback for jax versions without BlockSpec pipeline_mode support
        out = build(False)(*args)

    return out[:B, :D]


# ---------------------------------------------------------------------------
# pure-JAX reference (same bf16-matmul / f32-accumulate policy) for validation
# ---------------------------------------------------------------------------
def reference_forward(state, memory_vectors, params, *, num_heads=8):
    if state.ndim == 1:
        state = state[None, :]
    elif state.ndim == 3:
        state = state[:, 0, :]
    if memory_vectors.ndim == 2:
        memory_vectors = memory_vectors[:, None, :]
    B, D = state.shape
    _, M, _ = memory_vectors.shape
    H = params["w1"].shape[1]
    hd = H // num_heads

    def dot(a, b):
        return jnp.dot(a.astype(jnp.bfloat16), b.astype(jnp.bfloat16),
                       preferred_element_type=jnp.float32)

    def ln(x, g, b, eps=1e-5):
        m = jnp.mean(x, axis=-1, keepdims=True)
        v = jnp.mean(jnp.square(x - m), axis=-1, keepdims=True)
        return (x - m) * lax.rsqrt(v + eps) * g + b

    def encode(x):
        h = dot(x, params["w1"]) + params["b1"]
        h = jnp.maximum(ln(h, params["ln1_g"], params["ln1_b"]), 0.0)
        return dot(h, params["w2"]) + params["b2"]

    se = encode(state)                                            # (B, H)
    me = encode(memory_vectors.reshape(B * M, D)).reshape(B, M, H)

    q = dot(se, params["wq"]) + params["bq"]
    k = (dot(me.reshape(B * M, H), params["wk"]) + params["bk"]).reshape(B, M, H)
    v = (dot(me.reshape(B * M, H), params["wv"]) + params["bv"]).reshape(B, M, H)

    qh = q.reshape(B, num_heads, hd)
    kh = k.reshape(B, M, num_heads, hd)
    vh = v.reshape(B, M, num_heads, hd)
    scores = jnp.einsum("bhd,bmhd->bhm", qh, kh) / jnp.sqrt(jnp.float32(hd))
    probs = jax.nn.softmax(scores, axis=-1)
    ctx = jnp.einsum("bhm,bmhd->bhd", probs, vh).reshape(B, H)
    attn = dot(ctx, params["wo"]) + params["bo"]

    g = dot(se, params["g1a"]) + dot(attn, params["g1b"]) + params["gb1"]
    g = jnp.maximum(ln(g, params["gln1_g"], params["gln1_b"]), 0.0)
    g = dot(g, params["g2"]) + params["gb2"]
    g = jnp.maximum(ln(g, params["gln2_g"], params["gln2_b"]), 0.0)
    out = dot(g, params["g3"]) + params["gb3"]
    return out / jnp.linalg.norm(out, axis=-1, keepdims=True)


# ---------------------------------------------------------------------------
# deterministic parameter init (synthetic — mirrors the nn.Module shapes)
# ---------------------------------------------------------------------------
def init_params(key, dim, hidden):
    ks = list(jax.random.split(key, 16))
    ki = iter(ks)

    def lin(k, fan_in, fan_out):
        kw, kb = jax.random.split(k)
        bound = 1.0 / jnp.sqrt(jnp.float32(fan_in))
        w = jax.random.uniform(kw, (fan_in, fan_out), jnp.float32, -bound, bound)
        b = jax.random.uniform(kb, (1, fan_out), jnp.float32, -bound, bound)
        return w, b

    p = {}
    # state_encoder: Linear(dim, H) -> LayerNorm(H) -> ReLU -> Linear(H, H)
    p["w1"], p["b1"] = lin(next(ki), dim, hidden)
    p["ln1_g"] = jnp.ones((1, hidden), jnp.float32)
    p["ln1_b"] = jnp.zeros((1, hidden), jnp.float32)
    p["w2"], p["b2"] = lin(next(ki), hidden, hidden)
    # memory_attention: in-proj (q/k/v) + out-proj, all (H, H)
    p["wq"], p["bq"] = lin(next(ki), hidden, hidden)
    p["wk"], p["bk"] = lin(next(ki), hidden, hidden)
    p["wv"], p["bv"] = lin(next(ki), hidden, hidden)
    p["wo"], p["bo"] = lin(next(ki), hidden, hidden)
    # generator: Linear(2H, H) -> LN -> ReLU -> Linear(H, H) -> LN -> ReLU -> Linear(H, dim)
    g1, p["gb1"] = lin(next(ki), 2 * hidden, hidden)
    p["g1a"], p["g1b"] = g1[:hidden], g1[hidden:]
    p["gln1_g"] = jnp.ones((1, hidden), jnp.float32)
    p["gln1_b"] = jnp.zeros((1, hidden), jnp.float32)
    p["g2"], p["gb2"] = lin(next(ki), hidden, hidden)
    p["gln2_g"] = jnp.ones((1, hidden), jnp.float32)
    p["gln2_b"] = jnp.zeros((1, hidden), jnp.float32)
    p["g3"], p["gb3"] = lin(next(ki), hidden, dim)
    return p


if __name__ == "__main__":
    dim, hidden, batch, n_mem, n_heads = 16, 32, 2, 8, 8

    k_state, k_mem, k_par = jax.random.split(jax.random.PRNGKey(0), 3)
    params = init_params(k_par, dim, hidden)
    state = jax.random.normal(k_state, (batch, dim), jnp.float32)          # (B, dim)
    memory = jax.random.normal(k_mem, (batch, n_mem, dim), jnp.float32)    # (B, M, dim)

    out = state_aware_generator(state, memory, params, num_heads=n_heads)
    out = jax.block_until_ready(out)

    assert out.shape == (batch, dim)
    assert bool(jnp.all(jnp.isfinite(out)))
    norms = jnp.linalg.norm(out, axis=-1)
    assert bool(jnp.all(jnp.abs(norms - 1.0) < 1e-3))   # output is L2-normalized

    # validate against a pure-JAX reference (same bf16 matmul policy)
    ref = reference_forward(state, memory, params, num_heads=n_heads)
    max_err = float(jnp.max(jnp.abs(out - ref)))
    assert max_err < 8e-2, f"kernel vs reference mismatch: {max_err}"
    print("KERNEL_OK")
</pallas_src>

<mosaic_0001>
module attributes {stable_mosaic.version = 11 : i64} {
  func.func @state_aware_kernel(%arg0: i32, %arg1: memref<8x128xbf16, #tpu.memory_space<vmem>>, %arg2: memref<8x8x128xbf16, #tpu.memory_space<vmem>>, %arg3: memref<128x128xbf16, #tpu.memory_space<vmem>>, %arg4: memref<8x128x128xbf16, #tpu.memory_space<vmem>>, %arg5: memref<128x128xbf16, #tpu.memory_space<vmem>>, %arg6: memref<128x128xf32, #tpu.memory_space<vmem>>, %arg7: memref<128x128xf32, #tpu.memory_space<vmem>>, %arg8: memref<16x128xf32, #tpu.memory_space<vmem>>, %arg9: memref<1x128xf32, #tpu.memory_space<vmem>>, %arg10: memref<1x8x128xf32, #tpu.memory_space<vmem>>, %arg11: memref<8x128xf32, #tpu.memory_space<vmem>>) attributes {dimension_semantics = [#tpu.dimension_semantics<parallel>], iteration_bounds = array<i64: 1>, scalar_prefetch = 0 : i64, scratch_operands = 0 : i64, tpu.core_type = #tpu.core_type<tc>, window_params = [{transform_indices = @transform_0, window_bounds = array<i64: 8, 128>}, {transform_indices = @transform_1, window_bounds = array<i64: 8, 8, 128>}, {pipeline_mode = #tpu.pipeline_mode<synchronous>, transform_indices = @transform_2, window_bounds = array<i64: 128, 128>}, {pipeline_mode = #tpu.pipeline_mode<synchronous>, transform_indices = @transform_3, window_bounds = array<i64: 8, 128, 128>}, {pipeline_mode = #tpu.pipeline_mode<synchronous>, transform_indices = @transform_4, window_bounds = array<i64: 128, 128>}, {pipeline_mode = #tpu.pipeline_mode<synchronous>, transform_indices = @transform_5, window_bounds = array<i64: 128, 128>}, {pipeline_mode = #tpu.pipeline_mode<synchronous>, transform_indices = @transform_6, window_bounds = array<i64: 128, 128>}, {pipeline_mode = #tpu.pipeline_mode<synchronous>, transform_indices = @transform_7, window_bounds = array<i64: 16, 128>}, {pipeline_mode = #tpu.pipeline_mode<synchronous>, transform_indices = @transform_8, window_bounds = array<i64: 1, 128>}, {pipeline_mode = #tpu.pipeline_mode<synchronous>, transform_indices = @transform_9, window_bounds = array<i64: 1, 8, 128>}, {transform_indices = @transform_10, window_bounds = array<i64: 8, 128>}]} {
    %c0 = arith.constant 0 : index
    %c0_0 = arith.constant 0 : index
    %0 = vector.load %arg8[%c0, %c0_0] : memref<16x128xf32, #tpu.memory_space<vmem>>, vector<16x128xf32>
    %1 = vector.extract_strided_slice %0 {offsets = [0, 0], sizes = [1, 128], strides = [1, 1]} : vector<16x128xf32> to vector<1x128xf32>
    %2 = vector.extract_strided_slice %0 {offsets = [1, 0], sizes = [1, 128], strides = [1, 1]} : vector<16x128xf32> to vector<1x128xf32>
    %3 = vector.extract_strided_slice %0 {offsets = [2, 0], sizes = [1, 128], strides = [1, 1]} : vector<16x128xf32> to vector<1x128xf32>
    %4 = vector.extract_strided_slice %0 {offsets = [3, 0], sizes = [1, 128], strides = [1, 1]} : vector<16x128xf32> to vector<1x128xf32>
    %5 = vector.extract_strided_slice %0 {offsets = [4, 0], sizes = [1, 128], strides = [1, 1]} : vector<16x128xf32> to vector<1x128xf32>
    %6 = vector.extract_strided_slice %0 {offsets = [5, 0], sizes = [1, 128], strides = [1, 1]} : vector<16x128xf32> to vector<1x128xf32>
    %7 = vector.extract_strided_slice %0 {offsets = [6, 0], sizes = [1, 128], strides = [1, 1]} : vector<16x128xf32> to vector<1x128xf32>
    %8 = vector.extract_strided_slice %0 {offsets = [7, 0], sizes = [1, 128], strides = [1, 1]} : vector<16x128xf32> to vector<1x128xf32>
    %9 = vector.extract_strided_slice %0 {offsets = [8, 0], sizes = [1, 128], strides = [1, 1]} : vector<16x128xf32> to vector<1x128xf32>
    %10 = vector.extract_strided_slice %0 {offsets = [9, 0], sizes = [1, 128], strides = [1, 1]} : vector<16x128xf32> to vector<1x128xf32>
    %11 = vector.extract_strided_slice %0 {offsets = [10, 0], sizes = [1, 128], strides = [1, 1]} : vector<16x128xf32> to vector<1x128xf32>
    %12 = vector.extract_strided_slice %0 {offsets = [11, 0], sizes = [1, 128], strides = [1, 1]} : vector<16x128xf32> to vector<1x128xf32>
    %13 = vector.extract_strided_slice %0 {offsets = [12, 0], sizes = [1, 128], strides = [1, 1]} : vector<16x128xf32> to vector<1x128xf32>
    %14 = vector.extract_strided_slice %0 {offsets = [13, 0], sizes = [1, 128], strides = [1, 1]} : vector<16x128xf32> to vector<1x128xf32>
    %c0_1 = arith.constant 0 : index
    %c0_2 = arith.constant 0 : index
    %c0_3 = arith.constant 0 : index
    %15 = vector.load %arg4[%c0_1, %c0_2, %c0_3] : memref<8x128x128xbf16, #tpu.memory_space<vmem>>, vector<1x128x128xbf16>
    %16 = vector.shape_cast %15 : vector<1x128x128xbf16> to vector<128x128xbf16>
    %c1 = arith.constant 1 : index
    %c0_4 = arith.constant 0 : index
    %c0_5 = arith.constant 0 : index
    %17 = vector.load %arg4[%c1, %c0_4, %c0_5] : memref<8x128x128xbf16, #tpu.memory_space<vmem>>, vector<1x128x128xbf16>
    %18 = vector.shape_cast %17 : vector<1x128x128xbf16> to vector<128x128xbf16>
    %c2 = arith.constant 2 : index
    %c0_6 = arith.constant 0 : index
    %c0_7 = arith.constant 0 : index
    %19 = vector.load %arg4[%c2, %c0_6, %c0_7] : memref<8x128x128xbf16, #tpu.memory_space<vmem>>, vector<1x128x128xbf16>
    %20 = vector.shape_cast %19 : vector<1x128x128xbf16> to vector<128x128xbf16>
    %c3 = arith.constant 3 : index
    %c0_8 = arith.constant 0 : index
    %c0_9 = arith.constant 0 : index
    %21 = vector.load %arg4[%c3, %c0_8, %c0_9] : memref<8x128x128xbf16, #tpu.memory_space<vmem>>, vector<1x128x128xbf16>
    %22 = vector.shape_cast %21 : vector<1x128x128xbf16> to vector<128x128xbf16>
    %c4 = arith.constant 4 : index
    %c0_10 = arith.constant 0 : index
    %c0_11 = arith.constant 0 : index
    %23 = vector.load %arg4[%c4, %c0_10, %c0_11] : memref<8x128x128xbf16, #tpu.memory_space<vmem>>, vector<1x128x128xbf16>
    %24 = vector.shape_cast %23 : vector<1x128x128xbf16> to vector<128x128xbf16>
    %c5 = arith.constant 5 : index
    %c0_12 = arith.constant 0 : index
    %c0_13 = arith.constant 0 : index
    %25 = vector.load %arg4[%c5, %c0_12, %c0_13] : memref<8x128x128xbf16, #tpu.memory_space<vmem>>, vector<1x128x128xbf16>
    %26 = vector.shape_cast %25 : vector<1x128x128xbf16> to vector<128x128xbf16>
    %c6 = arith.constant 6 : index
    %c0_14 = arith.constant 0 : index
    %c0_15 = arith.constant 0 : index
    %27 = vector.load %arg4[%c6, %c0_14, %c0_15] : memref<8x128x128xbf16, #tpu.memory_space<vmem>>, vector<1x128x128xbf16>
    %28 = vector.shape_cast %27 : vector<1x128x128xbf16> to vector<128x128xbf16>
    %c7 = arith.constant 7 : index
    %c0_16 = arith.constant 0 : index
    %c0_17 = arith.constant 0 : index
    %29 = vector.load %arg4[%c7, %c0_16, %c0_17] : memref<8x128x128xbf16, #tpu.memory_space<vmem>>, vector<1x128x128xbf16>
    %30 = vector.shape_cast %29 : vector<1x128x128xbf16> to vector<128x128xbf16>
    %c0_18 = arith.constant 0 : index
    %c0_19 = arith.constant 0 : index
    %31 = vector.load %arg1[%c0_18, %c0_19] : memref<8x128xbf16, #tpu.memory_space<vmem>>, vector<8x128xbf16>
    %c0_20 = arith.constant 0 : index
    %c0_21 = arith.constant 0 : index
    %c0_22 = arith.constant 0 : index
    %32 = vector.load %arg2[%c0_20, %c0_21, %c0_22] : memref<8x8x128xbf16, #tpu.memory_space<vmem>>, vector<8x8x128xbf16>
    %33 = vector.shape_cast %32 : vector<8x8x128xbf16> to vector<64x128xbf16>
    %c0_23 = arith.constant 0 : index
    %c0_24 = arith.constant 0 : index
    %34 = vector.load %arg3[%c0_23, %c0_24] : memref<128x128xbf16, #tpu.memory_space<vmem>>, vector<128x128xbf16>
    %cst = arith.constant dense<0.000000e+00> : vector<8x128xf32>
    %35 = tpu.matmul %31, %34, %cst {dimension_numbers = #tpu.dot_dimension_numbers<[1], [0], [0], [1], [0, 0, 1, 1], [], []>} : vector<8x128xbf16>, vector<128x128xbf16>, vector<8x128xf32> -> vector<8x128xf32>
    %36 = vector.broadcast %1 : vector<1x128xf32> to vector<8x128xf32>
    %37 = arith.addf %35, %36 : vector<8x128xf32>
    %cst_25 = arith.constant dense<0.000000e+00> : vector<8xf32>
    %38 = vector.multi_reduction <add>, %37, %cst_25 [1] : vector<8x128xf32> to vector<8xf32>
    %39 = vector.shape_cast %38 : vector<8xf32> to vector<8x1xf32>
    %cst_26 = arith.constant 3.125000e-02 : f32
    %40 = vector.broadcast %cst_26 : f32 to vector<8x1xf32>
    %41 = arith.mulf %39, %40 : vector<8x1xf32>
    %42 = vector.broadcast %41 : vector<8x1xf32> to vector<8x128xf32>
    %43 = arith.subf %37, %42 : vector<8x128xf32>
    %44 = arith.mulf %43, %43 : vector<8x128xf32>
    %cst_27 = arith.constant dense<0.000000e+00> : vector<8xf32>
    %45 = vector.multi_reduction <add>, %44, %cst_27 [1] : vector<8x128xf32> to vector<8xf32>
    %46 = vector.shape_cast %45 : vector<8xf32> to vector<8x1xf32>
    %cst_28 = arith.constant 9.600000e+01 : f32
    %47 = vector.broadcast %cst_28 : f32 to vector<8x1xf32>
    %48 = arith.mulf %47, %41 : vector<8x1xf32>
    %49 = arith.mulf %48, %41 : vector<8x1xf32>
    %50 = arith.subf %46, %49 : vector<8x1xf32>
    %cst_29 = arith.constant 3.125000e-02 : f32
    %51 = vector.broadcast %cst_29 : f32 to vector<8x1xf32>
    %52 = arith.mulf %50, %51 : vector<8x1xf32>
    %cst_30 = arith.constant 9.99999974E-6 : f32
    %53 = vector.broadcast %cst_30 : f32 to vector<8x1xf32>
    %54 = arith.addf %52, %53 : vector<8x1xf32>
    %55 = math.rsqrt %54 : vector<8x1xf32>
    %56 = vector.broadcast %55 : vector<8x1xf32> to vector<8x128xf32>
    %57 = arith.mulf %43, %56 : vector<8x128xf32>
    %58 = vector.broadcast %2 : vector<1x128xf32> to vector<8x128xf32>
    %59 = arith.mulf %57, %58 : vector<8x128xf32>
    %60 = vector.broadcast %3 : vector<1x128xf32> to vector<8x128xf32>
    %61 = arith.addf %59, %60 : vector<8x128xf32>
    %cst_31 = arith.constant 0.000000e+00 : f32
    %62 = vector.broadcast %cst_31 : f32 to vector<8x128xf32>
    %63 = arith.maximumf %61, %62 : vector<8x128xf32>
    %64 = arith.truncf %63 : vector<8x128xf32> to vector<8x128xbf16>
    %cst_32 = arith.constant dense<0.000000e+00> : vector<8x128xf32>
    %65 = tpu.matmul %64, %16, %cst_32 {dimension_numbers = #tpu.dot_dimension_numbers<[1], [0], [0], [1], [0, 0, 1, 1], [], []>} : vector<8x128xbf16>, vector<128x128xbf16>, vector<8x128xf32> -> vector<8x128xf32>
    %66 = vector.broadcast %4 : vector<1x128xf32> to vector<8x128xf32>
    %67 = arith.addf %65, %66 : vector<8x128xf32>
    %c0_33 = arith.constant 0 : index
    %c0_34 = arith.constant 0 : index
    %68 = vector.load %arg3[%c0_33, %c0_34] : memref<128x128xbf16, #tpu.memory_space<vmem>>, vector<128x128xbf16>
    %cst_35 = arith.constant dense<0.000000e+00> : vector<64x128xf32>
    %69 = tpu.matmul %33, %68, %cst_35 {dimension_numbers = #tpu.dot_dimension_numbers<[1], [0], [0], [1], [0, 0, 1, 1], [], []>} : vector<64x128xbf16>, vector<128x128xbf16>, vector<64x128xf32> -> vector<64x128xf32>
    %70 = vector.broadcast %1 : vector<1x128xf32> to vector<64x128xf32>
    %71 = arith.addf %69, %70 : vector<64x128xf32>
    %cst_36 = arith.constant dense<0.000000e+00> : vector<64xf32>
    %72 = vector.multi_reduction <add>, %71, %cst_36 [1] : vector<64x128xf32> to vector<64xf32>
    %73 = vector.shape_cast %72 : vector<64xf32> to vector<64x1xf32>
    %cst_37 = arith.constant 3.125000e-02 : f32
    %74 = vector.broadcast %cst_37 : f32 to vector<64x1xf32>
    %75 = arith.mulf %73, %74 : vector<64x1xf32>
    %76 = vector.broadcast %75 : vector<64x1xf32> to vector<64x128xf32>
    %77 = arith.subf %71, %76 : vector<64x128xf32>
    %78 = arith.mulf %77, %77 : vector<64x128xf32>
    %cst_38 = arith.constant dense<0.000000e+00> : vector<64xf32>
    %79 = vector.multi_reduction <add>, %78, %cst_38 [1] : vector<64x128xf32> to vector<64xf32>
    %80 = vector.shape_cast %79 : vector<64xf32> to vector<64x1xf32>
    %cst_39 = arith.constant 9.600000e+01 : f32
    %81 = vector.broadcast %cst_39 : f32 to vector<64x1xf32>
    %82 = arith.mulf %81, %75 : vector<64x1xf32>
    %83 = arith.mulf %82, %75 : vector<64x1xf32>
    %84 = arith.subf %80, %83 : vector<64x1xf32>
    %cst_40 = arith.constant 3.125000e-02 : f32
    %85 = vector.broadcast %cst_40 : f32 to vector<64x1xf32>
    %86 = arith.mulf %84, %85 : vector<64x1xf32>
    %cst_41 = arith.constant 9.99999974E-6 : f32
    %87 = vector.broadcast %cst_41 : f32 to vector<64x1xf32>
    %88 = arith.addf %86, %87 : vector<64x1xf32>
    %89 = math.rsqrt %88 : vector<64x1xf32>
    %90 = vector.broadcast %89 : vector<64x1xf32> to vector<64x128xf32>
    %91 = arith.mulf %77, %90 : vector<64x128xf32>
    %92 = vector.broadcast %2 : vector<1x128xf32> to vector<64x128xf32>
    %93 = arith.mulf %91, %92 : vector<64x128xf32>
    %94 = vector.broadcast %3 : vector<1x128xf32> to vector<64x128xf32>
    %95 = arith.addf %93, %94 : vector<64x128xf32>
    %cst_42 = arith.constant 0.000000e+00 : f32
    %96 = vector.broadcast %cst_42 : f32 to vector<64x128xf32>
    %97 = arith.maximumf %95, %96 : vector<64x128xf32>
    %98 = arith.truncf %97 : vector<64x128xf32> to vector<64x128xbf16>
    %cst_43 = arith.constant dense<0.000000e+00> : vector<64x128xf32>
    %99 = tpu.matmul %98, %16, %cst_43 {dimension_numbers = #tpu.dot_dimension_numbers<[1], [0], [0], [1], [0, 0, 1, 1], [], []>} : vector<64x128xbf16>, vector<128x128xbf16>, vector<64x128xf32> -> vector<64x128xf32>
    %100 = vector.broadcast %4 : vector<1x128xf32> to vector<64x128xf32>
    %101 = arith.addf %99, %100 : vector<64x128xf32>
    %102 = arith.truncf %67 : vector<8x128xf32> to vector<8x128xbf16>
    %cst_44 = arith.constant dense<0.000000e+00> : vector<8x128xf32>
    %103 = tpu.matmul %102, %18, %cst_44 {dimension_numbers = #tpu.dot_dimension_numbers<[1], [0], [0], [1], [0, 0, 1, 1], [], []>} : vector<8x128xbf16>, vector<128x128xbf16>, vector<8x128xf32> -> vector<8x128xf32>
    %104 = vector.broadcast %5 : vector<1x128xf32> to vector<8x128xf32>
    %105 = arith.addf %103, %104 : vector<8x128xf32>
    %106 = arith.truncf %101 : vector<64x128xf32> to vector<64x128xbf16>
    %cst_45 = arith.constant dense<0.000000e+00> : vector<64x128xf32>
    %107 = tpu.matmul %106, %20, %cst_45 {dimension_numbers = #tpu.dot_dimension_numbers<[1], [0], [0], [1], [0, 0, 1, 1], [], []>} : vector<64x128xbf16>, vector<128x128xbf16>, vector<64x128xf32> -> vector<64x128xf32>
    %108 = vector.broadcast %6 : vector<1x128xf32> to vector<64x128xf32>
    %109 = arith.addf %107, %108 : vector<64x128xf32>
    %110 = arith.truncf %101 : vector<64x128xf32> to vector<64x128xbf16>
    %cst_46 = arith.constant dense<0.000000e+00> : vector<64x128xf32>
    %111 = tpu.matmul %110, %22, %cst_46 {dimension_numbers = #tpu.dot_dimension_numbers<[1], [0], [0], [1], [0, 0, 1, 1], [], []>} : vector<64x128xbf16>, vector<128x128xbf16>, vector<64x128xf32> -> vector<64x128xf32>
    %112 = vector.broadcast %7 : vector<1x128xf32> to vector<64x128xf32>
    %113 = arith.addf %111, %112 : vector<64x128xf32>
    %114 = vector.shape_cast %105 : vector<8x128xf32> to vector<8x1x128xf32>
    %115 = vector.shape_cast %109 : vector<64x128xf32> to vector<8x8x128xf32>
    %116 = vector.broadcast %114 : vector<8x1x128xf32> to vector<8x8x128xf32>
    %117 = arith.mulf %116, %115 : vector<8x8x128xf32>
    %118 = vector.shape_cast %117 : vector<8x8x128xf32> to vector<64x128xf32>
    %c0_47 = arith.constant 0 : index
    %c0_48 = arith.constant 0 : index
    %119 = vector.load %arg6[%c0_47, %c0_48] : memref<128x128xf32, #tpu.memory_space<vmem>>, vector<128x128xf32>
    %cst_49 = arith.constant dense<0.000000e+00> : vector<64x128xf32>
    %120 = tpu.matmul %118, %119, %cst_49 {dimension_numbers = #tpu.dot_dimension_numbers<[1], [0], [0], [1], [0, 0, 1, 1], [], []>} : vector<64x128xf32>, vector<128x128xf32>, vector<64x128xf32> -> vector<64x128xf32>
    %121 = vector.shape_cast %120 : vector<64x128xf32> to vector<8x8x128xf32>
    %c0_50 = arith.constant 0 : index
    %c0_51 = arith.constant 0 : index
    %c0_52 = arith.constant 0 : index
    %122 = vector.load %arg10[%c0_50, %c0_51, %c0_52] : memref<1x8x128xf32, #tpu.memory_space<vmem>>, vector<1x8x128xf32>
    %123 = vector.broadcast %122 : vector<1x8x128xf32> to vector<8x8x128xf32>
    %124 = arith.addf %121, %123 : vector<8x8x128xf32>
    %cst_53 = arith.constant dense<0xFF800000> : vector<8x128xf32>
    %125 = vector.multi_reduction <maximumf>, %124, %cst_53 [1] : vector<8x8x128xf32> to vector<8x128xf32>
    %126 = vector.shape_cast %125 : vector<8x128xf32> to vector<8x1x128xf32>
    %127 = vector.broadcast %126 : vector<8x1x128xf32> to vector<8x8x128xf32>
    %128 = arith.subf %124, %127 : vector<8x8x128xf32>
    %129 = math.exp %128 : vector<8x8x128xf32>
    %cst_54 = arith.constant dense<0.000000e+00> : vector<8x128xf32>
    %130 = vector.multi_reduction <add>, %129, %cst_54 [1] : vector<8x8x128xf32> to vector<8x128xf32>
    %131 = vector.shape_cast %130 : vector<8x128xf32> to vector<8x1x128xf32>
    %132 = tpu.reciprocal %131 {approx = true} : vector<8x1x128xf32> -> vector<8x1x128xf32>
    %133 = vector.broadcast %132 : vector<8x1x128xf32> to vector<8x8x128xf32>
    %134 = arith.mulf %129, %133 : vector<8x8x128xf32>
    %135 = vector.shape_cast %134 : vector<8x8x128xf32> to vector<64x128xf32>
    %c0_55 = arith.constant 0 : index
    %c0_56 = arith.constant 0 : index
    %136 = vector.load %arg7[%c0_55, %c0_56] : memref<128x128xf32, #tpu.memory_space<vmem>>, vector<128x128xf32>
    %cst_57 = arith.constant dense<0.000000e+00> : vector<64x128xf32>
    %137 = tpu.matmul %135, %136, %cst_57 {dimension_numbers = #tpu.dot_dimension_numbers<[1], [0], [0], [1], [0, 0, 1, 1], [], []>} : vector<64x128xf32>, vector<128x128xf32>, vector<64x128xf32> -> vector<64x128xf32>
    %138 = arith.mulf %137, %113 : vector<64x128xf32>
    %139 = vector.shape_cast %138 : vector<64x128xf32> to vector<8x8x128xf32>
    %cst_58 = arith.constant dense<0.000000e+00> : vector<8x128xf32>
    %140 = vector.multi_reduction <add>, %139, %cst_58 [1] : vector<8x8x128xf32> to vector<8x128xf32>
    %141 = arith.truncf %140 : vector<8x128xf32> to vector<8x128xbf16>
    %cst_59 = arith.constant dense<0.000000e+00> : vector<8x128xf32>
    %142 = tpu.matmul %141, %24, %cst_59 {dimension_numbers = #tpu.dot_dimension_numbers<[1], [0], [0], [1], [0, 0, 1, 1], [], []>} : vector<8x128xbf16>, vector<128x128xbf16>, vector<8x128xf32> -> vector<8x128xf32>
    %143 = vector.broadcast %8 : vector<1x128xf32> to vector<8x128xf32>
    %144 = arith.addf %142, %143 : vector<8x128xf32>
    %145 = arith.truncf %67 : vector<8x128xf32> to vector<8x128xbf16>
    %cst_60 = arith.constant dense<0.000000e+00> : vector<8x128xf32>
    %146 = tpu.matmul %145, %26, %cst_60 {dimension_numbers = #tpu.dot_dimension_numbers<[1], [0], [0], [1], [0, 0, 1, 1], [], []>} : vector<8x128xbf16>, vector<128x128xbf16>, vector<8x128xf32> -> vector<8x128xf32>
    %147 = arith.truncf %144 : vector<8x128xf32> to vector<8x128xbf16>
    %cst_61 = arith.constant dense<0.000000e+00> : vector<8x128xf32>
    %148 = tpu.matmul %147, %28, %cst_61 {dimension_numbers = #tpu.dot_dimension_numbers<[1], [0], [0], [1], [0, 0, 1, 1], [], []>} : vector<8x128xbf16>, vector<128x128xbf16>, vector<8x128xf32> -> vector<8x128xf32>
    %149 = arith.addf %146, %148 : vector<8x128xf32>
    %150 = vector.broadcast %9 : vector<1x128xf32> to vector<8x128xf32>
    %151 = arith.addf %149, %150 : vector<8x128xf32>
    %cst_62 = arith.constant dense<0.000000e+00> : vector<8xf32>
    %152 = vector.multi_reduction <add>, %151, %cst_62 [1] : vector<8x128xf32> to vector<8xf32>
    %153 = vector.shape_cast %152 : vector<8xf32> to vector<8x1xf32>
    %cst_63 = arith.constant 3.125000e-02 : f32
    %154 = vector.broadcast %cst_63 : f32 to vector<8x1xf32>
    %155 = arith.mulf %153, %154 : vector<8x1xf32>
    %156 = vector.broadcast %155 : vector<8x1xf32> to vector<8x128xf32>
    %157 = arith.subf %151, %156 : vector<8x128xf32>
    %158 = arith.mulf %157, %157 : vector<8x128xf32>
    %cst_64 = arith.constant dense<0.000000e+00> : vector<8xf32>
    %159 = vector.multi_reduction <add>, %158, %cst_64 [1] : vector<8x128xf32> to vector<8xf32>
    %160 = vector.shape_cast %159 : vector<8xf32> to vector<8x1xf32>
    %cst_65 = arith.constant 9.600000e+01 : f32
    %161 = vector.broadcast %cst_65 : f32 to vector<8x1xf32>
    %162 = arith.mulf %161, %155 : vector<8x1xf32>
    %163 = arith.mulf %162, %155 : vector<8x1xf32>
    %164 = arith.subf %160, %163 : vector<8x1xf32>
    %cst_66 = arith.constant 3.125000e-02 : f32
    %165 = vector.broadcast %cst_66 : f32 to vector<8x1xf32>
    %166 = arith.mulf %164, %165 : vector<8x1xf32>
    %cst_67 = arith.constant 9.99999974E-6 : f32
    %167 = vector.broadcast %cst_67 : f32 to vector<8x1xf32>
    %168 = arith.addf %166, %167 : vector<8x1xf32>
    %169 = math.rsqrt %168 : vector<8x1xf32>
    %170 = vector.broadcast %169 : vector<8x1xf32> to vector<8x128xf32>
    %171 = arith.mulf %157, %170 : vector<8x128xf32>
    %172 = vector.broadcast %10 : vector<1x128xf32> to vector<8x128xf32>
    %173 = arith.mulf %171, %172 : vector<8x128xf32>
    %174 = vector.broadcast %11 : vector<1x128xf32> to vector<8x128xf32>
    %175 = arith.addf %173, %174 : vector<8x128xf32>
    %cst_68 = arith.constant 0.000000e+00 : f32
    %176 = vector.broadcast %cst_68 : f32 to vector<8x128xf32>
    %177 = arith.maximumf %175, %176 : vector<8x128xf32>
    %178 = arith.truncf %177 : vector<8x128xf32> to vector<8x128xbf16>
    %cst_69 = arith.constant dense<0.000000e+00> : vector<8x128xf32>
    %179 = tpu.matmul %178, %30, %cst_69 {dimension_numbers = #tpu.dot_dimension_numbers<[1], [0], [0], [1], [0, 0, 1, 1], [], []>} : vector<8x128xbf16>, vector<128x128xbf16>, vector<8x128xf32> -> vector<8x128xf32>
    %180 = vector.broadcast %12 : vector<1x128xf32> to vector<8x128xf32>
    %181 = arith.addf %179, %180 : vector<8x128xf32>
    %cst_70 = arith.constant dense<0.000000e+00> : vector<8xf32>
    %182 = vector.multi_reduction <add>, %181, %cst_70 [1] : vector<8x128xf32> to vector<8xf32>
    %183 = vector.shape_cast %182 : vector<8xf32> to vector<8x1xf32>
    %cst_71 = arith.constant 3.125000e-02 : f32
    %184 = vector.broadcast %cst_71 : f32 to vector<8x1xf32>
    %185 = arith.mulf %183, %184 : vector<8x1xf32>
    %186 = vector.broadcast %185 : vector<8x1xf32> to vector<8x128xf32>
    %187 = arith.subf %181, %186 : vector<8x128xf32>
    %188 = arith.mulf %187, %187 : vector<8x128xf32>
    %cst_72 = arith.constant dense<0.000000e+00> : vector<8xf32>
    %189 = vector.multi_reduction <add>, %188, %cst_72 [1] : vector<8x128xf32> to vector<8xf32>
    %190 = vector.shape_cast %189 : vector<8xf32> to vector<8x1xf32>
    %cst_73 = arith.constant 9.600000e+01 : f32
    %191 = vector.broadcast %cst_73 : f32 to vector<8x1xf32>
    %192 = arith.mulf %191, %185 : vector<8x1xf32>
    %193 = arith.mulf %192, %185 : vector<8x1xf32>
    %194 = arith.subf %190, %193 : vector<8x1xf32>
    %cst_74 = arith.constant 3.125000e-02 : f32
    %195 = vector.broadcast %cst_74 : f32 to vector<8x1xf32>
    %196 = arith.mulf %194, %195 : vector<8x1xf32>
    %cst_75 = arith.constant 9.99999974E-6 : f32
    %197 = vector.broadcast %cst_75 : f32 to vector<8x1xf32>
    %198 = arith.addf %196, %197 : vector<8x1xf32>
    %199 = math.rsqrt %198 : vector<8x1xf32>
    %200 = vector.broadcast %199 : vector<8x1xf32> to vector<8x128xf32>
    %201 = arith.mulf %187, %200 : vector<8x128xf32>
    %202 = vector.broadcast %13 : vector<1x128xf32> to vector<8x128xf32>
    %203 = arith.mulf %201, %202 : vector<8x128xf32>
    %204 = vector.broadcast %14 : vector<1x128xf32> to vector<8x128xf32>
    %205 = arith.addf %203, %204 : vector<8x128xf32>
    %cst_76 = arith.constant 0.000000e+00 : f32
    %206 = vector.broadcast %cst_76 : f32 to vector<8x128xf32>
    %207 = arith.maximumf %205, %206 : vector<8x128xf32>
    %c0_77 = arith.constant 0 : index
    %c0_78 = arith.constant 0 : index
    %208 = vector.load %arg5[%c0_77, %c0_78] : memref<128x128xbf16, #tpu.memory_space<vmem>>, vector<128x128xbf16>
    %209 = arith.truncf %207 : vector<8x128xf32> to vector<8x128xbf16>
    %cst_79 = arith.constant dense<0.000000e+00> : vector<8x128xf32>
    %210 = tpu.matmul %209, %208, %cst_79 {dimension_numbers = #tpu.dot_dimension_numbers<[1], [0], [0], [1], [0, 0, 1, 1], [], []>} : vector<8x128xbf16>, vector<128x128xbf16>, vector<8x128xf32> -> vector<8x128xf32>
    %c0_80 = arith.constant 0 : index
    %c0_81 = arith.constant 0 : index
    %211 = vector.load %arg9[%c0_80, %c0_81] : memref<1x128xf32, #tpu.memory_space<vmem>>, vector<1x128xf32>
    %212 = vector.broadcast %211 : vector<1x128xf32> to vector<8x128xf32>
    %213 = arith.addf %210, %212 : vector<8x128xf32>
    %214 = arith.mulf %213, %213 : vector<8x128xf32>
    %cst_82 = arith.constant dense<0.000000e+00> : vector<8xf32>
    %215 = vector.multi_reduction <add>, %214, %cst_82 [1] : vector<8x128xf32> to vector<8xf32>
    %216 = vector.shape_cast %215 : vector<8xf32> to vector<8x1xf32>
    %cst_83 = arith.constant 9.99999996E-13 : f32
    %217 = vector.broadcast %cst_83 : f32 to vector<8x1xf32>
    %218 = arith.addf %216, %217 : vector<8x1xf32>
    %219 = math.rsqrt %218 : vector<8x1xf32>
    %220 = vector.broadcast %219 : vector<8x1xf32> to vector<8x128xf32>
    %221 = arith.mulf %213, %220 : vector<8x128xf32>
    %c0_84 = arith.constant 0 : index
    %c0_85 = arith.constant 0 : index
    %222 = vector.load %arg11[%c0_84, %c0_85] : memref<8x128xf32, #tpu.memory_space<vmem>>, vector<8x128xf32>
    tpu.vector_store %arg11[%c0_84, %c0_85], %221 {strides = array<i32>} : memref<8x128xf32, #tpu.memory_space<vmem>>, vector<8x128xf32>,
    return
  }
  func.func @transform_0(%arg0: i32) -> (i32, i32) {
    %c0_i32 = arith.constant 0 : i32
    %c0_i32_0 = arith.constant 0 : i32
    return %arg0, %c0_i32 : i32, i32
  }
  func.func @transform_1(%arg0: i32) -> (i32, i32, i32) {
    %c0_i32 = arith.constant 0 : i32
    %c0_i32_0 = arith.constant 0 : i32
    %c0_i32_1 = arith.constant 0 : i32
    return %arg0, %c0_i32, %c0_i32_0 : i32, i32, i32
  }
  func.func @transform_2(%arg0: i32) -> (i32, i32) {
    %c0_i32 = arith.constant 0 : i32
    %c0_i32_0 = arith.constant 0 : i32
    %c0_i32_1 = arith.constant 0 : i32
    return %c0_i32, %c0_i32_0 : i32, i32
  }
  func.func @transform_3(%arg0: i32) -> (i32, i32, i32) {
    %c0_i32 = arith.constant 0 : i32
    %c0_i32_0 = arith.constant 0 : i32
    %c0_i32_1 = arith.constant 0 : i32
    %c0_i32_2 = arith.constant 0 : i32
    return %c0_i32, %c0_i32_0, %c0_i32_1 : i32, i32, i32
  }
  func.func @transform_4(%arg0: i32) -> (i32, i32) {
    %c0_i32 = arith.constant 0 : i32
    %c0_i32_0 = arith.constant 0 : i32
    %c0_i32_1 = arith.constant 0 : i32
    return %c0_i32, %c0_i32_0 : i32, i32
  }
  func.func @transform_5(%arg0: i32) -> (i32, i32) {
    %c0_i32 = arith.constant 0 : i32
    %c0_i32_0 = arith.constant 0 : i32
    %c0_i32_1 = arith.constant 0 : i32
    return %c0_i32, %c0_i32_0 : i32, i32
  }
  func.func @transform_6(%arg0: i32) -> (i32, i32) {
    %c0_i32 = arith.constant 0 : i32
    %c0_i32_0 = arith.constant 0 : i32
    %c0_i32_1 = arith.constant 0 : i32
    return %c0_i32, %c0_i32_0 : i32, i32
  }
  func.func @transform_7(%arg0: i32) -> (i32, i32) {
    %c0_i32 = arith.constant 0 : i32
    %c0_i32_0 = arith.constant 0 : i32
    %c0_i32_1 = arith.constant 0 : i32
    return %c0_i32, %c0_i32_0 : i32, i32
  }
  func.func @transform_8(%arg0: i32) -> (i32, i32) {
    %c0_i32 = arith.constant 0 : i32
    %c0_i32_0 = arith.constant 0 : i32
    %c0_i32_1 = arith.constant 0 : i32
    return %c0_i32, %c0_i32_0 : i32, i32
  }
  func.func @transform_9(%arg0: i32) -> (i32, i32, i32) {
    %c0_i32 = arith.constant 0 : i32
    %c0_i32_0 = arith.constant 0 : i32
    %c0_i32_1 = arith.constant 0 : i32
    %c0_i32_2 = arith.constant 0 : i32
    return %c0_i32, %c0_i32_0, %c0_i32_1 : i32, i32, i32
  }
  func.func @transform_10(%arg0: i32) -> (i32, i32) {
    %c0_i32 = arith.constant 0 : i32
    %c0_i32_0 = arith.constant 0 : i32
    return %arg0, %c0_i32 : i32, i32
  }
}

module attributes {stable_mosaic.version = 11 : i64} {
  func.func @state_aware_kernel(%arg0: i32, %arg1: memref<8x128xbf16, #tpu.memory_space<vmem>>, %arg2: memref<8x8x128xbf16, #tpu.memory_space<vmem>>, %arg3: memref<128x128xbf16, #tpu.memory_space<vmem>>, %arg4: memref<8x128x128xbf16, #tpu.memory_space<vmem>>, %arg5: memref<128x128xbf16, #tpu.memory_space<vmem>>, %arg6: memref<128x128xf32, #tpu.memory_space<vmem>>, %arg7: memref<128x128xf32, #tpu.memory_space<vmem>>, %arg8: memref<16x128xf32, #tpu.memory_space<vmem>>, %arg9: memref<1x128xf32, #tpu.memory_space<vmem>>, %arg10: memref<1x8x128xf32, #tpu.memory_space<vmem>>, %arg11: memref<8x128xf32, #tpu.memory_space<vmem>>) attributes {dimension_semantics = [#tpu.dimension_semantics<parallel>], iteration_bounds = array<i64: 1>, scalar_prefetch = 0 : i64, scratch_operands = 0 : i64, tpu.core_type = #tpu.core_type<tc>, window_params = [{transform_indices = @transform_0, window_bounds = array<i64: 8, 128>}, {transform_indices = @transform_1, window_bounds = array<i64: 8, 8, 128>}, {pipeline_mode = #tpu.pipeline_mode<synchronous>, transform_indices = @transform_2, window_bounds = array<i64: 128, 128>}, {pipeline_mode = #tpu.pipeline_mode<synchronous>, transform_indices = @transform_3, window_bounds = array<i64: 8, 128, 128>}, {pipeline_mode = #tpu.pipeline_mode<synchronous>, transform_indices = @transform_4, window_bounds = array<i64: 128, 128>}, {pipeline_mode = #tpu.pipeline_mode<synchronous>, transform_indices = @transform_5, window_bounds = array<i64: 128, 128>}, {pipeline_mode = #tpu.pipeline_mode<synchronous>, transform_indices = @transform_6, window_bounds = array<i64: 128, 128>}, {pipeline_mode = #tpu.pipeline_mode<synchronous>, transform_indices = @transform_7, window_bounds = array<i64: 16, 128>}, {pipeline_mode = #tpu.pipeline_mode<synchronous>, transform_indices = @transform_8, window_bounds = array<i64: 1, 128>}, {pipeline_mode = #tpu.pipeline_mode<synchronous>, transform_indices = @transform_9, window_bounds = array<i64: 1, 8, 128>}, {transform_indices = @transform_10, window_bounds = array<i64: 8, 128>}]} {
    %c0 = arith.constant 0 : index
    %c0_0 = arith.constant 0 : index
    %0 = vector.load %arg8[%c0, %c0_0] : memref<16x128xf32, #tpu.memory_space<vmem>>, vector<16x128xf32>
    %1 = vector.extract_strided_slice %0 {offsets = [0, 0], sizes = [1, 128], strides = [1, 1]} : vector<16x128xf32> to vector<1x128xf32>
    %2 = vector.extract_strided_slice %0 {offsets = [1, 0], sizes = [1, 128], strides = [1, 1]} : vector<16x128xf32> to vector<1x128xf32>
    %3 = vector.extract_strided_slice %0 {offsets = [2, 0], sizes = [1, 128], strides = [1, 1]} : vector<16x128xf32> to vector<1x128xf32>
    %4 = vector.extract_strided_slice %0 {offsets = [3, 0], sizes = [1, 128], strides = [1, 1]} : vector<16x128xf32> to vector<1x128xf32>
    %5 = vector.extract_strided_slice %0 {offsets = [4, 0], sizes = [1, 128], strides = [1, 1]} : vector<16x128xf32> to vector<1x128xf32>
    %6 = vector.extract_strided_slice %0 {offsets = [5, 0], sizes = [1, 128], strides = [1, 1]} : vector<16x128xf32> to vector<1x128xf32>
    %7 = vector.extract_strided_slice %0 {offsets = [6, 0], sizes = [1, 128], strides = [1, 1]} : vector<16x128xf32> to vector<1x128xf32>
    %8 = vector.extract_strided_slice %0 {offsets = [7, 0], sizes = [1, 128], strides = [1, 1]} : vector<16x128xf32> to vector<1x128xf32>
    %9 = vector.extract_strided_slice %0 {offsets = [8, 0], sizes = [1, 128], strides = [1, 1]} : vector<16x128xf32> to vector<1x128xf32>
    %10 = vector.extract_strided_slice %0 {offsets = [9, 0], sizes = [1, 128], strides = [1, 1]} : vector<16x128xf32> to vector<1x128xf32>
    %11 = vector.extract_strided_slice %0 {offsets = [10, 0], sizes = [1, 128], strides = [1, 1]} : vector<16x128xf32> to vector<1x128xf32>
    %12 = vector.extract_strided_slice %0 {offsets = [11, 0], sizes = [1, 128], strides = [1, 1]} : vector<16x128xf32> to vector<1x128xf32>
    %13 = vector.extract_strided_slice %0 {offsets = [12, 0], sizes = [1, 128], strides = [1, 1]} : vector<16x128xf32> to vector<1x128xf32>
    %14 = vector.extract_strided_slice %0 {offsets = [13, 0], sizes = [1, 128], strides = [1, 1]} : vector<16x128xf32> to vector<1x128xf32>
    %c0_1 = arith.constant 0 : index
    %c0_2 = arith.constant 0 : index
    %c0_3 = arith.constant 0 : index
    %15 = vector.load %arg4[%c0_1, %c0_2, %c0_3] : memref<8x128x128xbf16, #tpu.memory_space<vmem>>, vector<1x128x128xbf16>
    %16 = vector.shape_cast %15 : vector<1x128x128xbf16> to vector<128x128xbf16>
    %c1 = arith.constant 1 : index
    %c0_4 = arith.constant 0 : index
    %c0_5 = arith.constant 0 : index
    %17 = vector.load %arg4[%c1, %c0_4, %c0_5] : memref<8x128x128xbf16, #tpu.memory_space<vmem>>, vector<1x128x128xbf16>
    %18 = vector.shape_cast %17 : vector<1x128x128xbf16> to vector<128x128xbf16>
    %c2 = arith.constant 2 : index
    %c0_6 = arith.constant 0 : index
    %c0_7 = arith.constant 0 : index
    %19 = vector.load %arg4[%c2, %c0_6, %c0_7] : memref<8x128x128xbf16, #tpu.memory_space<vmem>>, vector<1x128x128xbf16>
    %20 = vector.shape_cast %19 : vector<1x128x128xbf16> to vector<128x128xbf16>
    %c3 = arith.constant 3 : index
    %c0_8 = arith.constant 0 : index
    %c0_9 = arith.constant 0 : index
    %21 = vector.load %arg4[%c3, %c0_8, %c0_9] : memref<8x128x128xbf16, #tpu.memory_space<vmem>>, vector<1x128x128xbf16>
    %22 = vector.shape_cast %21 : vector<1x128x128xbf16> to vector<128x128xbf16>
    %c4 = arith.constant 4 : index
    %c0_10 = arith.constant 0 : index
    %c0_11 = arith.constant 0 : index
    %23 = vector.load %arg4[%c4, %c0_10, %c0_11] : memref<8x128x128xbf16, #tpu.memory_space<vmem>>, vector<1x128x128xbf16>
    %24 = vector.shape_cast %23 : vector<1x128x128xbf16> to vector<128x128xbf16>
    %c5 = arith.constant 5 : index
    %c0_12 = arith.constant 0 : index
    %c0_13 = arith.constant 0 : index
    %25 = vector.load %arg4[%c5, %c0_12, %c0_13] : memref<8x128x128xbf16, #tpu.memory_space<vmem>>, vector<1x128x128xbf16>
    %26 = vector.shape_cast %25 : vector<1x128x128xbf16> to vector<128x128xbf16>
    %c6 = arith.constant 6 : index
    %c0_14 = arith.constant 0 : index
    %c0_15 = arith.constant 0 : index
    %27 = vector.load %arg4[%c6, %c0_14, %c0_15] : memref<8x128x128xbf16, #tpu.memory_space<vmem>>, vector<1x128x128xbf16>
    %28 = vector.shape_cast %27 : vector<1x128x128xbf16> to vector<128x128xbf16>
    %c7 = arith.constant 7 : index
    %c0_16 = arith.constant 0 : index
    %c0_17 = arith.constant 0 : index
    %29 = vector.load %arg4[%c7, %c0_16, %c0_17] : memref<8x128x128xbf16, #tpu.memory_space<vmem>>, vector<1x128x128xbf16>
    %30 = vector.shape_cast %29 : vector<1x128x128xbf16> to vector<128x128xbf16>
    %c0_18 = arith.constant 0 : index
    %c0_19 = arith.constant 0 : index
    %31 = vector.load %arg1[%c0_18, %c0_19] : memref<8x128xbf16, #tpu.memory_space<vmem>>, vector<8x128xbf16>
    %c0_20 = arith.constant 0 : index
    %c0_21 = arith.constant 0 : index
    %c0_22 = arith.constant 0 : index
    %32 = vector.load %arg2[%c0_20, %c0_21, %c0_22] : memref<8x8x128xbf16, #tpu.memory_space<vmem>>, vector<8x8x128xbf16>
    %33 = vector.shape_cast %32 : vector<8x8x128xbf16> to vector<64x128xbf16>
    %c0_23 = arith.constant 0 : index
    %c0_24 = arith.constant 0 : index
    %34 = vector.load %arg3[%c0_23, %c0_24] : memref<128x128xbf16, #tpu.memory_space<vmem>>, vector<128x128xbf16>
    %cst = arith.constant dense<0.000000e+00> : vector<8x128xf32>
    %35 = tpu.matmul %31, %34, %cst {dimension_numbers = #tpu.dot_dimension_numbers<[1], [0], [0], [1], [0, 0, 1, 1], [], []>} : vector<8x128xbf16>, vector<128x128xbf16>, vector<8x128xf32> -> vector<8x128xf32>
    %36 = vector.broadcast %1 : vector<1x128xf32> to vector<8x128xf32>
    %37 = arith.addf %35, %36 : vector<8x128xf32>
    %cst_25 = arith.constant dense<0.000000e+00> : vector<8xf32>
    %38 = vector.multi_reduction <add>, %37, %cst_25 [1] : vector<8x128xf32> to vector<8xf32>
    %39 = vector.shape_cast %38 : vector<8xf32> to vector<8x1xf32>
    %cst_26 = arith.constant 3.125000e-02 : f32
    %40 = vector.broadcast %cst_26 : f32 to vector<8x1xf32>
    %41 = arith.mulf %39, %40 : vector<8x1xf32>
    %42 = vector.broadcast %41 : vector<8x1xf32> to vector<8x128xf32>
    %43 = arith.subf %37, %42 : vector<8x128xf32>
    %44 = arith.mulf %43, %43 : vector<8x128xf32>
    %cst_27 = arith.constant dense<0.000000e+00> : vector<8xf32>
    %45 = vector.multi_reduction <add>, %44, %cst_27 [1] : vector<8x128xf32> to vector<8xf32>
    %46 = vector.shape_cast %45 : vector<8xf32> to vector<8x1xf32>
    %cst_28 = arith.constant 9.600000e+01 : f32
    %47 = vector.broadcast %cst_28 : f32 to vector<8x1xf32>
    %48 = arith.mulf %47, %41 : vector<8x1xf32>
    %49 = arith.mulf %48, %41 : vector<8x1xf32>
    %50 = arith.subf %46, %49 : vector<8x1xf32>
    %cst_29 = arith.constant 3.125000e-02 : f32
    %51 = vector.broadcast %cst_29 : f32 to vector<8x1xf32>
    %52 = arith.mulf %50, %51 : vector<8x1xf32>
    %cst_30 = arith.constant 9.99999974E-6 : f32
    %53 = vector.broadcast %cst_30 : f32 to vector<8x1xf32>
    %54 = arith.addf %52, %53 : vector<8x1xf32>
    %55 = math.rsqrt %54 : vector<8x1xf32>
    %56 = vector.broadcast %55 : vector<8x1xf32> to vector<8x128xf32>
    %57 = arith.mulf %43, %56 : vector<8x128xf32>
    %58 = vector.broadcast %2 : vector<1x128xf32> to vector<8x128xf32>
    %59 = arith.mulf %57, %58 : vector<8x128xf32>
    %60 = vector.broadcast %3 : vector<1x128xf32> to vector<8x128xf32>
    %61 = arith.addf %59, %60 : vector<8x128xf32>
    %cst_31 = arith.constant 0.000000e+00 : f32
    %62 = vector.broadcast %cst_31 : f32 to vector<8x128xf32>
    %63 = arith.maximumf %61, %62 : vector<8x128xf32>
    %64 = arith.truncf %63 : vector<8x128xf32> to vector<8x128xbf16>
    %cst_32 = arith.constant dense<0.000000e+00> : vector<8x128xf32>
    %65 = tpu.matmul %64, %16, %cst_32 {dimension_numbers = #tpu.dot_dimension_numbers<[1], [0], [0], [1], [0, 0, 1, 1], [], []>} : vector<8x128xbf16>, vector<128x128xbf16>, vector<8x128xf32> -> vector<8x128xf32>
    %66 = vector.broadcast %4 : vector<1x128xf32> to vector<8x128xf32>
    %67 = arith.addf %65, %66 : vector<8x128xf32>
    %c0_33 = arith.constant 0 : index
    %c0_34 = arith.constant 0 : index
    %68 = vector.load %arg3[%c0_33, %c0_34] : memref<128x128xbf16, #tpu.memory_space<vmem>>, vector<128x128xbf16>
    %cst_35 = arith.constant dense<0.000000e+00> : vector<64x128xf32>
    %69 = tpu.matmul %33, %68, %cst_35 {dimension_numbers = #tpu.dot_dimension_numbers<[1], [0], [0], [1], [0, 0, 1, 1], [], []>} : vector<64x128xbf16>, vector<128x128xbf16>, vector<64x128xf32> -> vector<64x128xf32>
    %70 = vector.broadcast %1 : vector<1x128xf32> to vector<64x128xf32>
    %71 = arith.addf %69, %70 : vector<64x128xf32>
    %cst_36 = arith.constant dense<0.000000e+00> : vector<64xf32>
    %72 = vector.multi_reduction <add>, %71, %cst_36 [1] : vector<64x128xf32> to vector<64xf32>
    %73 = vector.shape_cast %72 : vector<64xf32> to vector<64x1xf32>
    %cst_37 = arith.constant 3.125000e-02 : f32
    %74 = vector.broadcast %cst_37 : f32 to vector<64x1xf32>
    %75 = arith.mulf %73, %74 : vector<64x1xf32>
    %76 = vector.broadcast %75 : vector<64x1xf32> to vector<64x128xf32>
    %77 = arith.subf %71, %76 : vector<64x128xf32>
    %78 = arith.mulf %77, %77 : vector<64x128xf32>
    %cst_38 = arith.constant dense<0.000000e+00> : vector<64xf32>
    %79 = vector.multi_reduction <add>, %78, %cst_38 [1] : vector<64x128xf32> to vector<64xf32>
    %80 = vector.shape_cast %79 : vector<64xf32> to vector<64x1xf32>
    %cst_39 = arith.constant 9.600000e+01 : f32
    %81 = vector.broadcast %cst_39 : f32 to vector<64x1xf32>
    %82 = arith.mulf %81, %75 : vector<64x1xf32>
    %83 = arith.mulf %82, %75 : vector<64x1xf32>
    %84 = arith.subf %80, %83 : vector<64x1xf32>
    %cst_40 = arith.constant 3.125000e-02 : f32
    %85 = vector.broadcast %cst_40 : f32 to vector<64x1xf32>
    %86 = arith.mulf %84, %85 : vector<64x1xf32>
    %cst_41 = arith.constant 9.99999974E-6 : f32
    %87 = vector.broadcast %cst_41 : f32 to vector<64x1xf32>
    %88 = arith.addf %86, %87 : vector<64x1xf32>
    %89 = math.rsqrt %88 : vector<64x1xf32>
    %90 = vector.broadcast %89 : vector<64x1xf32> to vector<64x128xf32>
    %91 = arith.mulf %77, %90 : vector<64x128xf32>
    %92 = vector.broadcast %2 : vector<1x128xf32> to vector<64x128xf32>
    %93 = arith.mulf %91, %92 : vector<64x128xf32>
    %94 = vector.broadcast %3 : vector<1x128xf32> to vector<64x128xf32>
    %95 = arith.addf %93, %94 : vector<64x128xf32>
    %cst_42 = arith.constant 0.000000e+00 : f32
    %96 = vector.broadcast %cst_42 : f32 to vector<64x128xf32>
    %97 = arith.maximumf %95, %96 : vector<64x128xf32>
    %98 = arith.truncf %97 : vector<64x128xf32> to vector<64x128xbf16>
    %cst_43 = arith.constant dense<0.000000e+00> : vector<64x128xf32>
    %99 = tpu.matmul %98, %16, %cst_43 {dimension_numbers = #tpu.dot_dimension_numbers<[1], [0], [0], [1], [0, 0, 1, 1], [], []>} : vector<64x128xbf16>, vector<128x128xbf16>, vector<64x128xf32> -> vector<64x128xf32>
    %100 = vector.broadcast %4 : vector<1x128xf32> to vector<64x128xf32>
    %101 = arith.addf %99, %100 : vector<64x128xf32>
    %102 = arith.truncf %67 : vector<8x128xf32> to vector<8x128xbf16>
    %cst_44 = arith.constant dense<0.000000e+00> : vector<8x128xf32>
    %103 = tpu.matmul %102, %18, %cst_44 {dimension_numbers = #tpu.dot_dimension_numbers<[1], [0], [0], [1], [0, 0, 1, 1], [], []>} : vector<8x128xbf16>, vector<128x128xbf16>, vector<8x128xf32> -> vector<8x128xf32>
    %104 = vector.broadcast %5 : vector<1x128xf32> to vector<8x128xf32>
    %105 = arith.addf %103, %104 : vector<8x128xf32>
    %106 = arith.truncf %101 : vector<64x128xf32> to vector<64x128xbf16>
    %cst_45 = arith.constant dense<0.000000e+00> : vector<64x128xf32>
    %107 = tpu.matmul %106, %20, %cst_45 {dimension_numbers = #tpu.dot_dimension_numbers<[1], [0], [0], [1], [0, 0, 1, 1], [], []>} : vector<64x128xbf16>, vector<128x128xbf16>, vector<64x128xf32> -> vector<64x128xf32>
    %108 = vector.broadcast %6 : vector<1x128xf32> to vector<64x128xf32>
    %109 = arith.addf %107, %108 : vector<64x128xf32>
    %110 = arith.truncf %101 : vector<64x128xf32> to vector<64x128xbf16>
    %cst_46 = arith.constant dense<0.000000e+00> : vector<64x128xf32>
    %111 = tpu.matmul %110, %22, %cst_46 {dimension_numbers = #tpu.dot_dimension_numbers<[1], [0], [0], [1], [0, 0, 1, 1], [], []>} : vector<64x128xbf16>, vector<128x128xbf16>, vector<64x128xf32> -> vector<64x128xf32>
    %112 = vector.broadcast %7 : vector<1x128xf32> to vector<64x128xf32>
    %113 = arith.addf %111, %112 : vector<64x128xf32>
    %114 = vector.shape_cast %105 : vector<8x128xf32> to vector<8x1x128xf32>
    %115 = vector.shape_cast %109 : vector<64x128xf32> to vector<8x8x128xf32>
    %116 = vector.broadcast %114 : vector<8x1x128xf32> to vector<8x8x128xf32>
    %117 = arith.mulf %116, %115 : vector<8x8x128xf32>
    %118 = vector.shape_cast %117 : vector<8x8x128xf32> to vector<64x128xf32>
    %c0_47 = arith.constant 0 : index
    %c0_48 = arith.constant 0 : index
    %119 = vector.load %arg6[%c0_47, %c0_48] : memref<128x128xf32, #tpu.memory_space<vmem>>, vector<128x128xf32>
    %cst_49 = arith.constant dense<0.000000e+00> : vector<64x128xf32>
    %120 = tpu.matmul %118, %119, %cst_49 {dimension_numbers = #tpu.dot_dimension_numbers<[1], [0], [0], [1], [0, 0, 1, 1], [], []>} : vector<64x128xf32>, vector<128x128xf32>, vector<64x128xf32> -> vector<64x128xf32>
    %121 = vector.shape_cast %120 : vector<64x128xf32> to vector<8x8x128xf32>
    %c0_50 = arith.constant 0 : index
    %c0_51 = arith.constant 0 : index
    %c0_52 = arith.constant 0 : index
    %122 = vector.load %arg10[%c0_50, %c0_51, %c0_52] : memref<1x8x128xf32, #tpu.memory_space<vmem>>, vector<1x8x128xf32>
    %123 = vector.broadcast %122 : vector<1x8x128xf32> to vector<8x8x128xf32>
    %124 = arith.addf %121, %123 : vector<8x8x128xf32>
    %cst_53 = arith.constant dense<0xFF800000> : vector<8x128xf32>
    %125 = vector.multi_reduction <maximumf>, %124, %cst_53 [1] : vector<8x8x128xf32> to vector<8x128xf32>
    %126 = vector.shape_cast %125 : vector<8x128xf32> to vector<8x1x128xf32>
    %127 = vector.broadcast %126 : vector<8x1x128xf32> to vector<8x8x128xf32>
    %128 = arith.subf %124, %127 : vector<8x8x128xf32>
    %129 = math.exp %128 : vector<8x8x128xf32>
    %cst_54 = arith.constant dense<0.000000e+00> : vector<8x128xf32>
    %130 = vector.multi_reduction <add>, %129, %cst_54 [1] : vector<8x8x128xf32> to vector<8x128xf32>
    %131 = vector.shape_cast %130 : vector<8x128xf32> to vector<8x1x128xf32>
    %132 = tpu.reciprocal %131 {approx = true} : vector<8x1x128xf32> -> vector<8x1x128xf32>
    %133 = vector.broadcast %132 : vector<8x1x128xf32> to vector<8x8x128xf32>
    %134 = arith.mulf %129, %133 : vector<8x8x128xf32>
    %135 = vector.shape_cast %134 : vector<8x8x128xf32> to vector<64x128xf32>
    %c0_55 = arith.constant 0 : index
    %c0_56 = arith.constant 0 : index
    %136 = vector.load %arg7[%c0_55, %c0_56] : memref<128x128xf32, #tpu.memory_space<vmem>>, vector<128x128xf32>
    %cst_57 = arith.constant dense<0.000000e+00> : vector<64x128xf32>
    %137 = tpu.matmul %135, %136, %cst_57 {dimension_numbers = #tpu.dot_dimension_numbers<[1], [0], [0], [1], [0, 0, 1, 1], [], []>} : vector<64x128xf32>, vector<128x128xf32>, vector<64x128xf32> -> vector<64x128xf32>
    %138 = arith.mulf %137, %113 : vector<64x128xf32>
    %139 = vector.shape_cast %138 : vector<64x128xf32> to vector<8x8x128xf32>
    %cst_58 = arith.constant dense<0.000000e+00> : vector<8x128xf32>
    %140 = vector.multi_reduction <add>, %139, %cst_58 [1] : vector<8x8x128xf32> to vector<8x128xf32>
    %141 = arith.truncf %140 : vector<8x128xf32> to vector<8x128xbf16>
    %cst_59 = arith.constant dense<0.000000e+00> : vector<8x128xf32>
    %142 = tpu.matmul %141, %24, %cst_59 {dimension_numbers = #tpu.dot_dimension_numbers<[1], [0], [0], [1], [0, 0, 1, 1], [], []>} : vector<8x128xbf16>, vector<128x128xbf16>, vector<8x128xf32> -> vector<8x128xf32>
    %143 = vector.broadcast %8 : vector<1x128xf32> to vector<8x128xf32>
    %144 = arith.addf %142, %143 : vector<8x128xf32>
    %145 = arith.truncf %67 : vector<8x128xf32> to vector<8x128xbf16>
    %cst_60 = arith.constant dense<0.000000e+00> : vector<8x128xf32>
    %146 = tpu.matmul %145, %26, %cst_60 {dimension_numbers = #tpu.dot_dimension_numbers<[1], [0], [0], [1], [0, 0, 1, 1], [], []>} : vector<8x128xbf16>, vector<128x128xbf16>, vector<8x128xf32> -> vector<8x128xf32>
    %147 = arith.truncf %144 : vector<8x128xf32> to vector<8x128xbf16>
    %cst_61 = arith.constant dense<0.000000e+00> : vector<8x128xf32>
    %148 = tpu.matmul %147, %28, %cst_61 {dimension_numbers = #tpu.dot_dimension_numbers<[1], [0], [0], [1], [0, 0, 1, 1], [], []>} : vector<8x128xbf16>, vector<128x128xbf16>, vector<8x128xf32> -> vector<8x128xf32>
    %149 = arith.addf %146, %148 : vector<8x128xf32>
    %150 = vector.broadcast %9 : vector<1x128xf32> to vector<8x128xf32>
    %151 = arith.addf %149, %150 : vector<8x128xf32>
    %cst_62 = arith.constant dense<0.000000e+00> : vector<8xf32>
    %152 = vector.multi_reduction <add>, %151, %cst_62 [1] : vector<8x128xf32> to vector<8xf32>
    %153 = vector.shape_cast %152 : vector<8xf32> to vector<8x1xf32>
    %cst_63 = arith.constant 3.125000e-02 : f32
    %154 = vector.broadcast %cst_63 : f32 to vector<8x1xf32>
    %155 = arith.mulf %153, %154 : vector<8x1xf32>
    %156 = vector.broadcast %155 : vector<8x1xf32> to vector<8x128xf32>
    %157 = arith.subf %151, %156 : vector<8x128xf32>
    %158 = arith.mulf %157, %157 : vector<8x128xf32>
    %cst_64 = arith.constant dense<0.000000e+00> : vector<8xf32>
    %159 = vector.multi_reduction <add>, %158, %cst_64 [1] : vector<8x128xf32> to vector<8xf32>
    %160 = vector.shape_cast %159 : vector<8xf32> to vector<8x1xf32>
    %cst_65 = arith.constant 9.600000e+01 : f32
    %161 = vector.broadcast %cst_65 : f32 to vector<8x1xf32>
    %162 = arith.mulf %161, %155 : vector<8x1xf32>
    %163 = arith.mulf %162, %155 : vector<8x1xf32>
    %164 = arith.subf %160, %163 : vector<8x1xf32>
    %cst_66 = arith.constant 3.125000e-02 : f32
    %165 = vector.broadcast %cst_66 : f32 to vector<8x1xf32>
    %166 = arith.mulf %164, %165 : vector<8x1xf32>
    %cst_67 = arith.constant 9.99999974E-6 : f32
    %167 = vector.broadcast %cst_67 : f32 to vector<8x1xf32>
    %168 = arith.addf %166, %167 : vector<8x1xf32>
    %169 = math.rsqrt %168 : vector<8x1xf32>
    %170 = vector.broadcast %169 : vector<8x1xf32> to vector<8x128xf32>
    %171 = arith.mulf %157, %170 : vector<8x128xf32>
    %172 = vector.broadcast %10 : vector<1x128xf32> to vector<8x128xf32>
    %173 = arith.mulf %171, %172 : vector<8x128xf32>
    %174 = vector.broadcast %11 : vector<1x128xf32> to vector<8x128xf32>
    %175 = arith.addf %173, %174 : vector<8x128xf32>
    %cst_68 = arith.constant 0.000000e+00 : f32
    %176 = vector.broadcast %cst_68 : f32 to vector<8x128xf32>
    %177 = arith.maximumf %175, %176 : vector<8x128xf32>
    %178 = arith.truncf %177 : vector<8x128xf32> to vector<8x128xbf16>
    %cst_69 = arith.constant dense<0.000000e+00> : vector<8x128xf32>
    %179 = tpu.matmul %178, %30, %cst_69 {dimension_numbers = #tpu.dot_dimension_numbers<[1], [0], [0], [1], [0, 0, 1, 1], [], []>} : vector<8x128xbf16>, vector<128x128xbf16>, vector<8x128xf32> -> vector<8x128xf32>
    %180 = vector.broadcast %12 : vector<1x128xf32> to vector<8x128xf32>
    %181 = arith.addf %179, %180 : vector<8x128xf32>
    %cst_70 = arith.constant dense<0.000000e+00> : vector<8xf32>
    %182 = vector.multi_reduction <add>, %181, %cst_70 [1] : vector<8x128xf32> to vector<8xf32>
    %183 = vector.shape_cast %182 : vector<8xf32> to vector<8x1xf32>
    %cst_71 = arith.constant 3.125000e-02 : f32
    %184 = vector.broadcast %cst_71 : f32 to vector<8x1xf32>
    %185 = arith.mulf %183, %184 : vector<8x1xf32>
    %186 = vector.broadcast %185 : vector<8x1xf32> to vector<8x128xf32>
    %187 = arith.subf %181, %186 : vector<8x128xf32>
    %188 = arith.mulf %187, %187 : vector<8x128xf32>
    %cst_72 = arith.constant dense<0.000000e+00> : vector<8xf32>
    %189 = vector.multi_reduction <add>, %188, %cst_72 [1] : vector<8x128xf32> to vector<8xf32>
    %190 = vector.shape_cast %189 : vector<8xf32> to vector<8x1xf32>
    %cst_73 = arith.constant 9.600000e+01 : f32
    %191 = vector.broadcast %cst_73 : f32 to vector<8x1xf32>
    %192 = arith.mulf %191, %185 : vector<8x1xf32>
    %193 = arith.mulf %192, %185 : vector<8x1xf32>
    %194 = arith.subf %190, %193 : vector<8x1xf32>
    %cst_74 = arith.constant 3.125000e-02 : f32
    %195 = vector.broadcast %cst_74 : f32 to vector<8x1xf32>
    %196 = arith.mulf %194, %195 : vector<8x1xf32>
    %cst_75 = arith.constant 9.99999974E-6 : f32
    %197 = vector.broadcast %cst_75 : f32 to vector<8x1xf32>
    %198 = arith.addf %196, %197 : vector<8x1xf32>
    %199 = math.rsqrt %198 : vector<8x1xf32>
    %200 = vector.broadcast %199 : vector<8x1xf32> to vector<8x128xf32>
    %201 = arith.mulf %187, %200 : vector<8x128xf32>
    %202 = vector.broadcast %13 : vector<1x128xf32> to vector<8x128xf32>
    %203 = arith.mulf %201, %202 : vector<8x128xf32>
    %204 = vector.broadcast %14 : vector<1x128xf32> to vector<8x128xf32>
    %205 = arith.addf %203, %204 : vector<8x128xf32>
    %cst_76 = arith.constant 0.000000e+00 : f32
    %206 = vector.broadcast %cst_76 : f32 to vector<8x128xf32>
    %207 = arith.maximumf %205, %206 : vector<8x128xf32>
    %c0_77 = arith.constant 0 : index
    %c0_78 = arith.constant 0 : index
    %208 = vector.load %arg5[%c0_77, %c0_78] : memref<128x128xbf16, #tpu.memory_space<vmem>>, vector<128x128xbf16>
    %209 = arith.truncf %207 : vector<8x128xf32> to vector<8x128xbf16>
    %cst_79 = arith.constant dense<0.000000e+00> : vector<8x128xf32>
    %210 = tpu.matmul %209, %208, %cst_79 {dimension_numbers = #tpu.dot_dimension_numbers<[1], [0], [0], [1], [0, 0, 1, 1], [], []>} : vector<8x128xbf16>, vector<128x128xbf16>, vector<8x128xf32> -> vector<8x128xf32>
    %c0_80 = arith.constant 0 : index
    %c0_81 = arith.constant 0 : index
    %211 = vector.load %arg9[%c0_80, %c0_81] : memref<1x128xf32, #tpu.memory_space<vmem>>, vector<1x128xf32>
    %212 = vector.broadcast %211 : vector<1x128xf32> to vector<8x128xf32>
    %213 = arith.addf %210, %212 : vector<8x128xf32>
    %214 = arith.mulf %213, %213 : vector<8x128xf32>
    %cst_82 = arith.constant dense<0.000000e+00> : vector<8xf32>
    %215 = vector.multi_reduction <add>, %214, %cst_82 [1] : vector<8x128xf32> to vector<8xf32>
    %216 = vector.shape_cast %215 : vector<8xf32> to vector<8x1xf32>
    %cst_83 = arith.constant 9.99999996E-13 : f32
    %217 = vector.broadcast %cst_83 : f32 to vector<8x1xf32>
    %218 = arith.addf %216, %217 : vector<8x1xf32>
    %219 = math.rsqrt %218 : vector<8x1xf32>
    %220 = vector.broadcast %219 : vector<8x1xf32> to vector<8x128xf32>
    %221 = arith.mulf %213, %220 : vector<8x128xf32>
    %c0_84 = arith.constant 0 : index
    %c0_85 = arith.constant 0 : index
    %222 = vector.load %arg11[%c0_84, %c0_85] : memref<8x128xf32, #tpu.memory_space<vmem>>, vector<8x128xf32>
    tpu.vector_store %arg11[%c0_84, %c0_85], %221 {strides = array<i32>} : memref<8x128xf32, #tpu.memory_space<vmem>>, vector<8x128xf32>,
    return
  }
  func.func @transform_0(%arg0: i32) -> (i32, i32) {
    %c0_i32 = arith.constant 0 : i32
    %c0_i32_0 = arith.constant 0 : i32
    return %arg0, %c0_i32 : i32, i32
  }
  func.func @transform_1(%arg0: i32) -> (i32, i32, i32) {
    %c0_i32 = arith.constant 0 : i32
    %c0_i32_0 = arith.constant 0 : i32
    %c0_i32_1 = arith.constant 0 : i32
    return %arg0, %c0_i32, %c0_i32_0 : i32, i32, i32
  }
  func.func @transform_2(%arg0: i32) -> (i32, i32) {
    %c0_i32 = arith.constant 0 : i32
    %c0_i32_0 = arith.constant 0 : i32
    %c0_i32_1 = arith.constant 0 : i32
    return %c0_i32, %c0_i32_0 : i32, i32
  }
  func.func @transform_3(%arg0: i32) -> (i32, i32, i32) {
    %c0_i32 = arith.constant 0 : i32
    %c0_i32_0 = arith.constant 0 : i32
    %c0_i32_1 = arith.constant 0 : i32
    %c0_i32_2 = arith.constant 0 : i32
    return %c0_i32, %c0_i32_0, %c0_i32_1 : i32, i32, i32
  }
  func.func @transform_4(%arg0: i32) -> (i32, i32) {
    %c0_i32 = arith.constant 0 : i32
    %c0_i32_0 = arith.constant 0 : i32
    %c0_i32_1 = arith.constant 0 : i32
    return %c0_i32, %c0_i32_0 : i32, i32
  }
  func.func @transform_5(%arg0: i32) -> (i32, i32) {
    %c0_i32 = arith.constant 0 : i32
    %c0_i32_0 = arith.constant 0 : i32
    %c0_i32_1 = arith.constant 0 : i32
    return %c0_i32, %c0_i32_0 : i32, i32
  }
  func.func @transform_6(%arg0: i32) -> (i32, i32) {
    %c0_i32 = arith.constant 0 : i32
    %c0_i32_0 = arith.constant 0 : i32
    %c0_i32_1 = arith.constant 0 : i32
    return %c0_i32, %c0_i32_0 : i32, i32
  }
  func.func @transform_7(%arg0: i32) -> (i32, i32) {
    %c0_i32 = arith.constant 0 : i32
    %c0_i32_0 = arith.constant 0 : i32
    %c0_i32_1 = arith.constant 0 : i32
    return %c0_i32, %c0_i32_0 : i32, i32
  }
  func.func @transform_8(%arg0: i32) -> (i32, i32) {
    %c0_i32 = arith.constant 0 : i32
    %c0_i32_0 = arith.constant 0 : i32
    %c0_i32_1 = arith.constant 0 : i32
    return %c0_i32, %c0_i32_0 : i32, i32
  }
  func.func @transform_9(%arg0: i32) -> (i32, i32, i32) {
    %c0_i32 = arith.constant 0 : i32
    %c0_i32_0 = arith.constant 0 : i32
    %c0_i32_1 = arith.constant 0 : i32
    %c0_i32_2 = arith.constant 0 : i32
    return %c0_i32, %c0_i32_0, %c0_i32_1 : i32, i32, i32
  }
  func.func @transform_10(%arg0: i32) -> (i32, i32) {
    %c0_i32 = arith.constant 0 : i32
    %c0_i32_0 = arith.constant 0 : i32
    return %arg0, %c0_i32 : i32, i32
  }
}

</mosaic_0001>

<bundles_post_ra>
// kernel: tpu_custom_call.1
= control target key start
LH: loop header
LB: loop body
LE: loop exit
PB: predicated region body
PF: predicated region fallthrough
CT: control target
= control target key end

     0   :  { %15 = vsyncpa [#allocation3], 0  ;;  %s3821_s0 = inlined_call_operand.hbm [shape: bf16[8,128], index: 0, kind: input, shape index: {}]   ;;  %s3822_s1 = inlined_call_operand.hbm [shape: bf16[8,8,128], index: 1, kind: input, shape index: {}]   ;;  %s3823_s2 = inlined_call_operand.hbm [shape: bf16[128,128], index: 2, kind: input, shape index: {}]   ;;  %s3824_s3 = inlined_call_operand.hbm [shape: bf16[8,128,128], index: 3, kind: input, shape index: {}]   ;;  %s3825_s4 = inlined_call_operand.hbm [shape: bf16[128,128], index: 4, kind: input, shape index: {}]   ;;  %s3826_s5 = inlined_call_operand.hbm [shape: f32[128,128], index: 5, kind: input, shape index: {}]   ;;  %s3827_s6 = inlined_call_operand.hbm [shape: f32[128,128], index: 6, kind: input, shape index: {}]   ;;  %s3828_s7 = inlined_call_operand.vmem [shape: f32[16,128], index: 7, kind: input, shape index: {}]   ;;  %s3829_s8 = inlined_call_operand.vmem [shape: f32[1,128], index: 8, kind: input, shape index: {}]   ;;  %s3830_s9 = inlined_call_operand.vmem [shape: f32[1,8,128], index: 9, kind: input, shape index: {}]   ;;  %s3831_s10 = inlined_call_operand.hbm [shape: f32[8,128], index: 10, kind: output, shape index: {}]  }
   0x1   :  { %16 = vsyncpa [#allocation6], 0 }
   0x2   :  { %17 = vsyncpa [#allocation9], 0 }
   0x3   :  { %18 = vsyncpa [#allocation12], 0 }
   0x4   :  { %19 = vsyncpa [#allocation4], 0  ;;  %s3265_s13 = smov [#allocation5]   ;;  %s3079_s17 = scalar_lea.hbm %s3822_s1, 512 }
   0x5   :  { %s35_s14 = sshll.u32 %s3265_s13, 4  ;;  %p3080_p0 = scmp.ne.s32.totalorder %s3822_s1, %s3079_s17  ;;  %s36_s14 = int_to_ptr.vmem [resolvable:$true] %s35_s14 }
   0x6   :  { %p3083_p1 = scmp.lt.u32.totalorder %s3079_s17, %s3822_s1 }
   0x8   :  { %p3085_p2 = pnand %p3083_p1, %p3080_p0 }
   0xa   :  { %3088 = shalt.err (!%p3085_p2)
}
   0xb   :  { %s3089_s22 = scalar_lea.vmem %s36_s14, 512  ;;  %p3094_p4 = scmp.lt.s32.totalorder %s36_s14, %s36_s14 }
   0xc   :  { %p3090_p3 = scmp.ne.s32.totalorder %s36_s14, %s3089_s22  ;;  %p3095_p5 = scmp.lt.s32.totalorder %s3089_s22, %s3089_s22 }
   0xe   :  { %p3096_p6 = por %p3095_p5, %p3094_p4 }
  0x10   :  { %p3097_p7 = pnand %p3096_p6, %p3090_p3 }
  0x12   :  { %3100 = shalt.err (!%p3097_p7)
}
  0x13   :  { %s3266_s23 = smov 64   ;;  %s3267_s24 = smov 4  }
  0x14   :  { %41 = dma.hbm_to_vmem [thread:$0]  %s3822_s1, 512, %s36_s14, [#allocation6], %s3266_s23, %s3266_s23, %s3267_s24  }
  0x15   :  { %s3268_s27 = smov [#allocation8]   ;;  %s3269_s29 = smov [#allocation11]  }
  0x16   :  { %s59_s28 = sshll.u32 %s3268_s27, 4  ;;  %s83_s30 = sshll.u32 %s3269_s29, 4  ;;  %s60_s28 = int_to_ptr.vmem [resolvable:$true] %s59_s28  ;;  %s84_s30 = int_to_ptr.vmem [resolvable:$true] %s83_s30 }
  0x17   :  { %s3101_s13 = scalar_lea.hbm %s3824_s3, 8192 }
  0x18   :  { %p3102_p8 = scmp.ne.s32.totalorder %s3824_s3, %s3101_s13  ;;  %p3105_p9 = scmp.lt.u32.totalorder %s3101_s13, %s3824_s3 }
  0x1a   :  { %p3107_p10 = pnand %p3105_p9, %p3102_p8 }
  0x1c   :  { %3110 = shalt.err (!%p3107_p10)
}
  0x1d   :  { %s3111_s1 = scalar_lea.vmem %s60_s28, 8192  ;;  %p3116_p12 = scmp.lt.s32.totalorder %s60_s28, %s60_s28 }
  0x1e   :  { %p3112_p11 = scmp.ne.s32.totalorder %s60_s28, %s3111_s1  ;;  %p3117_p13 = scmp.lt.s32.totalorder %s3111_s1, %s3111_s1 }
  0x20   :  { %p3118_p0 = por %p3117_p13, %p3116_p12 }
  0x22   :  { %p3119_p1 = pnand %p3118_p0, %p3112_p11 }
  0x24   :  { %3122 = shalt.err (!%p3119_p1)
}
  0x25   :  { %65 = dma.hbm_to_vmem [thread:$0]  %s3824_s3, 8192, %s60_s28, [#allocation9], %s3266_s23, %s3266_s23, %s3267_s24  }
  0x26   :  { %s3123_s22 = scalar_lea.hbm %s3826_s5, 2048 }
  0x27   :  { %p3124_p2 = scmp.ne.s32.totalorder %s3826_s5, %s3123_s22  ;;  %p3127_p3 = scmp.lt.u32.totalorder %s3123_s22, %s3826_s5 }
  0x29   :  { %p3129_p4 = pnand %p3127_p3, %p3124_p2 }
  0x2b   :  { %3132 = shalt.err (!%p3129_p4)
}
  0x2c   :  { %s3133_s11 = scalar_lea.vmem %s84_s30, 2048  ;;  %p3138_p6 = scmp.lt.s32.totalorder %s84_s30, %s84_s30 }
  0x2d   :  { %p3134_p5 = scmp.ne.s32.totalorder %s84_s30, %s3133_s11  ;;  %p3139_p7 = scmp.lt.s32.totalorder %s3133_s11, %s3133_s11 }
  0x2f   :  { %p3140_p8 = por %p3139_p7, %p3138_p6 }
  0x31   :  { %p3141_p9 = pnand %p3140_p8, %p3134_p5 }
  0x33   :  { %3144 = shalt.err (!%p3141_p9)
}
  0x34   :  { %s3270_s3 = smov 128   ;;  %s3271_s28 = smov 8  }
  0x35   :  { %89 = dma.hbm_to_vmem [thread:$0]  %s3826_s5, 2048, %s84_s30, [#allocation12], %s3270_s3, %s3270_s3, %s3271_s28  }
  0x36   :  { %s3272_s15 = smov [#allocation2]   ;;  %s3273_s17 = smov [#allocation7]  }
  0x37   :  { %s26_s16 = sshll.u32 %s3272_s15, 4  ;;  %s47_s18 = sshll.u32 %s3273_s17, 4  ;;  %s27_s16 = int_to_ptr.vmem [resolvable:$true] %s26_s16  ;;  %s48_s18 = int_to_ptr.vmem [resolvable:$true] %s47_s18 }
  0x38   :  { %s3145_s19 = scalar_lea.hbm %s3821_s0, 64 }
  0x39   :  { %p3146_p10 = scmp.ne.s32.totalorder %s3821_s0, %s3145_s19  ;;  %p3149_p11 = scmp.lt.u32.totalorder %s3145_s19, %s3821_s0 }
  0x3b   :  { %p3151_p12 = pnand %p3149_p11, %p3146_p10 }
  0x3d   :  { %3154 = shalt.err (!%p3151_p12)
}
  0x3e   :  { %s3155_s5 = scalar_lea.vmem %s27_s16, 64  ;;  %p3160_p0 = scmp.lt.s32.totalorder %s27_s16, %s27_s16 }
  0x3f   :  { %p3156_p13 = scmp.ne.s32.totalorder %s27_s16, %s3155_s5  ;;  %p3161_p1 = scmp.lt.s32.totalorder %s3155_s5, %s3155_s5 }
  0x41   :  { %p3162_p2 = por %p3161_p1, %p3160_p0 }
  0x43   :  { %p3163_p3 = pnand %p3162_p2, %p3156_p13 }
  0x45   :  { %3166 = shalt.err (!%p3163_p3)
}
  0x46   :  { %29 = dma.hbm_to_vmem [thread:$0]  %s3821_s0, 64, %s27_s16, [#allocation3]  }
  0x47   :  { %s3167_s11 = scalar_lea.hbm %s3823_s2, 1024 }
  0x48   :  { %p3168_p4 = scmp.ne.s32.totalorder %s3823_s2, %s3167_s11  ;;  %p3171_p5 = scmp.lt.u32.totalorder %s3167_s11, %s3823_s2 }
  0x4a   :  { %p3173_p6 = pnand %p3171_p5, %p3168_p4 }
  0x4c   :  { %3176 = shalt.err (!%p3173_p6)
}
  0x4d   :  { %s3177_s1 = scalar_lea.vmem %s48_s18, 1024  ;;  %p3182_p8 = scmp.lt.s32.totalorder %s48_s18, %s48_s18 }
  0x4e   :  { %p3178_p7 = scmp.ne.s32.totalorder %s48_s18, %s3177_s1  ;;  %p3183_p9 = scmp.lt.s32.totalorder %s3177_s1, %s3177_s1 }
  0x50   :  { %p3184_p10 = por %p3183_p9, %p3182_p8 }
  0x52   :  { %p3185_p11 = pnand %p3184_p10, %p3178_p7 }
  0x54   :  { %3188 = shalt.err (!%p3185_p11)
}
  0x55   :  { %53 = dma.hbm_to_vmem [thread:$0]  %s3823_s2, 1024, %s48_s18, [#allocation6], %s3266_s23, %s3266_s23, %s3267_s24  }
  0x56   :  { %s3274_s14 = smov [#allocation10]   ;;  %s3275_s20 = smov [#allocation13]  }
  0x57   :  { %s71_s19 = sshll.u32 %s3274_s14, 4  ;;  %s95_s21 = sshll.u32 %s3275_s20, 4  ;;  %s72_s19 = int_to_ptr.vmem [resolvable:$true] %s71_s19  ;;  %s96_s21 = int_to_ptr.vmem [resolvable:$true] %s95_s21 }
  0x58   :  { %s3189_s5 = scalar_lea.hbm %s3825_s4, 1024 }
  0x59   :  { %p3190_p12 = scmp.ne.s32.totalorder %s3825_s4, %s3189_s5  ;;  %p3193_p13 = scmp.lt.u32.totalorder %s3189_s5, %s3825_s4 }
  0x5b   :  { %p3195_p0 = pnand %p3193_p13, %p3190_p12 }
  0x5d   :  { %3198 = shalt.err (!%p3195_p0)
}
  0x5e   :  { %s3199_s2 = scalar_lea.vmem %s72_s19, 1024  ;;  %p3204_p2 = scmp.lt.s32.totalorder %s72_s19, %s72_s19 }
  0x5f   :  { %p3200_p1 = scmp.ne.s32.totalorder %s72_s19, %s3199_s2  ;;  %p3205_p3 = scmp.lt.s32.totalorder %s3199_s2, %s3199_s2 }
  0x61   :  { %p3206_p4 = por %p3205_p3, %p3204_p2 }
  0x63   :  { %p3207_p5 = pnand %p3206_p4, %p3200_p1 }
  0x65   :  { %3210 = shalt.err (!%p3207_p5)
}
  0x66   :  { %77 = dma.hbm_to_vmem [thread:$0]  %s3825_s4, 1024, %s72_s19, [#allocation9], %s3266_s23, %s3266_s23, %s3267_s24  }
  0x67   :  { %s3211_s15 = scalar_lea.hbm %s3827_s6, 2048 }
  0x68   :  { %p3212_p6 = scmp.ne.s32.totalorder %s3827_s6, %s3211_s15  ;;  %p3215_p7 = scmp.lt.u32.totalorder %s3211_s15, %s3827_s6 }
  0x6a   :  { %p3217_p8 = pnand %p3215_p7, %p3212_p6 }
  0x6c   :  { %3220 = shalt.err (!%p3217_p8)
}
  0x6d   :  { %s3221_s14 = scalar_lea.vmem %s96_s21, 2048  ;;  %p3226_p10 = scmp.lt.s32.totalorder %s96_s21, %s96_s21 }
  0x6e   :  { %p3222_p9 = scmp.ne.s32.totalorder %s96_s21, %s3221_s14  ;;  %p3227_p11 = scmp.lt.s32.totalorder %s3221_s14, %s3221_s14 }
  0x70   :  { %p3228_p12 = por %p3227_p11, %p3226_p10 }
  0x72   :  { %p3229_p13 = pnand %p3228_p12, %p3222_p9 }
  0x74   :  { %3232 = shalt.err (!%p3229_p13)
}
  0x75   :  { %101 = dma.hbm_to_vmem [thread:$0]  %s3827_s6, 2048, %s96_s21, [#allocation12], %s3270_s3, %s3270_s3, %s3271_s28  }
  0x76   :  { %3255 = dma.done.wait [#allocation3], 64  }
  0x77   :  { %3256 = vsyncadd [#allocation3], 4294967232 }
  0x78   :  { %3257 = dma.done.wait [#allocation6], 1536  }
  0x79   :  { %3258 = vsyncadd [#allocation6], 4294965760 }
  0x7a   :  { %3259 = dma.done.wait [#allocation9], 9216  }
  0x7b   :  { %3260 = vsyncadd [#allocation9], 4294958080 }
  0x7c   :  { %3261 = dma.done.wait [#allocation12], 4096  }
  0x7d   :  { %3262 = vsyncadd [#allocation12], 4294963200  ;;  %v3276_v0 = vmov 0.0   ;;  %vm3277_vm0 = vmmov 0   ;;  %v2938_v1 = vld [vmem:[#allocation7] sm:$0xff]   ;;  %v2939_v2 = vld [vmem:[#allocation7 + $0x8] sm:$0xff]   ;;  %v292_v14 = vlaneseq }
  0x7e   :  { %2515 = vmatprep.subr.bf16.mxu0 %v3276_v0  ;;  %2531 = vmatprep.mubr.msk.bf16.mxu0 %vm3277_vm0, %v3276_v0  ;;  %v2940_v3 = vld [vmem:[#allocation7 + $0x10] sm:$0xff]   ;;  %v2941_v4 = vld [vmem:[#allocation7 + $0x18] sm:$0xff]   ;;  %v2942_v5 = vld [vmem:[#allocation7 + $0x20] sm:$0xff]   ;;  %vm1696_vm1 = vcmask 1041409   ;;  %vm1698_vm2 = vcmask 1042434   ;;  %vm1700_vm3 = vcmask 1043459  }
  0x7f   :  { %2535 = vmatprep.subr.bf16.mxu1 %v3276_v0  ;;  %2551 = vmatprep.mubr.msk.bf16.mxu1 %vm3277_vm0, %v3276_v0  ;;  %v2943_v6 = vld [vmem:[#allocation7 + $0x28] sm:$0xff]   ;;  %v2944_v7 = vld [vmem:[#allocation7 + $0x30] sm:$0xff]   ;;  %v2945_v8 = vld [vmem:[#allocation7 + $0x38] sm:$0xff]   ;;  %v3453_v15 = vshrl.u32 %v292_v14, 7  ;;  %vm1702_vm4 = vcmask 1044484   ;;  %vm1704_vm5 = vcmask 1045509  }
  0x80   :  { %2516 = vmatpush3.bf16.msra.mxu0 %v2938_v1  ;;  %v267_v9 = vld [vmem:[#allocation2] sm:$0xf]  ;;  %v2946_v10 = vld [vmem:[#allocation5] sm:$0xff]   ;;  %v2947_v11 = vld [vmem:[#allocation5 + $0x8] sm:$0xff]   ;;  %vm1706_vm6 = vcmask 1046534   ;;  %vm1708_vm7 = vcmask 1047559  }
  0x81   :  { %2517 = vmatprep.subr.bf16.mxu0 %v3276_v0  ;;  %v2948_v12 = vld [vmem:[#allocation5 + $0x10] sm:$0xff]   ;;  %v2949_v13 = vld [vmem:[#allocation5 + $0x18] sm:$0xff]   ;;  %v3456_v16 = vsub.s32 0, %v3453_v15  ;;  %v3461_v17 = vld [vmem:[%s3828_s7] sm:$0xff]  ;;  %s3279_s25 = smov [#allocation14]  }
  0x82   :  { %v3471_v40 = vld [vmem:[#allocation8] sm:$0xff]   ;;  %v3482_v45 = vld [vmem:[#allocation8 + $0x8] sm:$0xff]   ;;  %v3486_v46 = vld [vmem:[#allocation8 + $0x10] sm:$0xff]   ;;  %s2250_s5 = sshll.u32 %s3279_s25, 4  ;;  %s2251_s5 = int_to_ptr.vmem [resolvable:$true] %s2250_s5 }
  0x83   :  { %v295_v18 = vrot.slane %v3461_v17, %v3456_v16  ;;  %2536 = vmatpush3.bf16.msra.mxu1 %v3471_v40  ;;  %v3490_v47 = vld [vmem:[#allocation8 + $0x18] sm:$0xff]   ;;  %v3493_v48 = vld [vmem:[#allocation8 + $0x20] sm:$0xff]   ;;  %v3497_v50 = vld [vmem:[#allocation8 + $0x28] sm:$0xff]   ;;  %s3233_s30 = scalar_lea.vmem %s2251_s5, 128  ;;  %p3238_p1 = scmp.lt.s32.totalorder %s2251_s5, %s2251_s5 }
  0x84   :  { %2518 = vmatpush3.bf16.msra.mxu0 %v2939_v2  ;;  %2537 = vmatprep.subr.bf16.mxu1 %v3276_v0  ;;  %v3508_v56 = vld [vmem:[#allocation8 + $0x30] sm:$0xff]   ;;  %p3234_p0 = scmp.ne.s32.totalorder %s2251_s5, %s3233_s30  ;;  %p3239_p2 = scmp.lt.s32.totalorder %s3233_s30, %s3233_s30 }
  0x85   :  { %2519 = vmatprep.subr.bf16.mxu0 %v3276_v0 }
  0x86   :  { %p3240_p3 = por %p3239_p2, %p3238_p1 }
  0x87   :  { %2538 = vmatpush3.bf16.msra.mxu1 %v3482_v45 }
  0x88   :  { %2520 = vmatpush3.bf16.msra.mxu0 %v2940_v3  ;;  %2539 = vmatprep.subr.bf16.mxu1 %v3276_v0  ;;  %p3241_p4 = pnand %p3240_p3, %p3234_p0 }
  0x89   :  { %2521 = vmatprep.subr.bf16.mxu0 %v3276_v0 }
  0x8b   :  { %2540 = vmatpush3.bf16.msra.mxu1 %v3486_v46 }
  0x8c   :  { %2522 = vmatpush3.bf16.msra.mxu0 %v2941_v4  ;;  %2541 = vmatprep.subr.bf16.mxu1 %v3276_v0 }
  0x8d   :  { %2523 = vmatprep.subr.bf16.mxu0 %v3276_v0 }
  0x8f   :  { %2542 = vmatpush3.bf16.msra.mxu1 %v3490_v47 }
  0x90   :  { %2524 = vmatpush3.bf16.msra.mxu0 %v2942_v5  ;;  %2543 = vmatprep.subr.bf16.mxu1 %v3276_v0 }
  0x91   :  { %2525 = vmatprep.subr.bf16.mxu0 %v3276_v0 }
  0x93   :  { %2544 = vmatpush3.bf16.msra.mxu1 %v3493_v48 }
  0x94   :  { %2526 = vmatpush3.bf16.msra.mxu0 %v2943_v6  ;;  %2545 = vmatprep.subr.bf16.mxu1 %v3276_v0 }
  0x95   :  { %2527 = vmatprep.subr.bf16.mxu0 %v3276_v0 }
  0x97   :  { %2546 = vmatpush3.bf16.msra.mxu1 %v3497_v50 }
  0x98   :  { %2528 = vmatpush3.bf16.msra.mxu0 %v2944_v7  ;;  %2547 = vmatprep.subr.bf16.mxu1 %v3276_v0 }
  0x99   :  { %2529 = vmatprep.subr.bf16.mxu0 %v3276_v0 }
  0x9b   :  { %2548 = vmatpush3.bf16.msra.mxu1 %v3508_v56 }
  0x9c   :  { %2530 = vmatpush3.bf16.msra.mxu0 %v2945_v8  ;;  %2549 = vmatprep.subr.bf16.mxu1 %v3276_v0 }
  0x9d   :  { %2555 = vmatprep.subr.bf16.mxu0 %v2938_v1 }
  0x9f   :  { %2532 = vmatmul.mubr.bf16.vlgmr.msra.gmra.mrb[0].mxu0 %v267_v9 }
  0xa0   :  { %2556 = vmatpush3.bf16.msra.mxu0 %v2938_v1  ;;  %2571 = vmatprep.mubr.bf16.mxu0 %v2946_v10  ;;  %v3526_v1 = vld [vmem:[#allocation8 + $0x38] sm:$0xff]  }
  0xa1   :  { %2557 = vmatprep.subr.bf16.mxu0 %v2939_v2  ;;  %2550 = vmatpush3.bf16.msra.mxu1 %v3526_v1 }
  0xa2   :  { %2579 = vmatprep.subr.bf16.mxu1 %v3471_v40 }
  0xa4   :  { %2558 = vmatpush3.bf16.msra.mxu0 %v2939_v2 }
  0xa5   :  { %2559 = vmatprep.subr.bf16.mxu0 %v2940_v3 }
  0xa8   :  { %2560 = vmatpush3.bf16.msra.mxu0 %v2940_v3 }
  0xa9   :  { %2561 = vmatprep.subr.bf16.mxu0 %v2941_v4 }
  0xac   :  { %2562 = vmatpush3.bf16.msra.mxu0 %v2941_v4 }
  0xad   :  { %2563 = vmatprep.subr.bf16.mxu0 %v2942_v5 }
  0xb0   :  { %2564 = vmatpush3.bf16.msra.mxu0 %v2942_v5 }
  0xb1   :  { %2565 = vmatprep.subr.bf16.mxu0 %v2943_v6 }
  0xb4   :  { %2566 = vmatpush3.bf16.msra.mxu0 %v2943_v6 }
  0xb5   :  { %2567 = vmatprep.subr.bf16.mxu0 %v2944_v7 }
  0xb8   :  { %2568 = vmatpush3.bf16.msra.mxu0 %v2944_v7 }
  0xb9   :  { %2569 = vmatprep.subr.bf16.mxu0 %v2945_v8 }
  0xbc   :  { %2570 = vmatpush3.bf16.msra.mxu0 %v2945_v8 }
  0xbd   :  { %2603 = vmatprep.subr.bf16.mxu0 %v3276_v0 }
  0xbf   :  { %2572 = vmatmul.mubr.bf16.vlgmr.msra.gmra.mrb[4].mxu0 %v2947_v11 }
  0xc0   :  { %2575 = vmatprep.mubr.bf16.mxu0 %v2948_v12 }
  0xc7   :  { %2576 = vmatmul.mubr.bf16.gmra.mrb[8].mxu0 %v2949_v13 }
  0xc8   :  { %2619 = vmatprep.mubr.msk.bf16.mxu0 %vm3277_vm0, %v3276_v0 }
 0x172   :  { %v378_v19 = vpop.f32.mrb[0].mxu0 }
 0x173   :  { %v379_v20 = vadd.f32 %v378_v19, %v295_v18  ;;  %v2533_v21 = vpop.f32.mrb[1].mxu0 }
 0x174   :  { %v381_v22 = vpop.f32.mrb[2].mxu0 }
 0x175   :  { %v2534_v23 = vpop.f32.mrb[3].mxu0  ;;  %384 = vadd.xlane.f32.xlu0 %v379_v20 }
 0x192   :  { %v2573_v24 = vpop.f32.mrb[4].mxu0 }
 0x193   :  { %v560_v25 = vpop.f32.mrb[5].mxu0  ;;  %v569_v31 = vadd.f32 %v2573_v24, %v295_v18  ;;  %v2958_v24 = vld [vmem:[#allocation8 + $0x40] sm:$0xff]  }
 0x194   :  { %v561_v26 = vadd.f32 %v560_v25, %v295_v18  ;;  %v2574_v27 = vpop.f32.mrb[6].mxu0  ;;  %2604 = vmatpush3.bf16.msra.mxu0 %v2958_v24  ;;  %v2959_v25 = vld [vmem:[#allocation8 + $0x48] sm:$0xff]  }
 0x195   :  { %v563_v28 = vpop.f32.mrb[7].mxu0  ;;  %v572_v30 = vadd.f32 %v2574_v27, %v295_v18  ;;  %2605 = vmatprep.subr.bf16.mxu0 %v3276_v0  ;;  %v2961_v27 = vld [vmem:[#allocation8 + $0x58] sm:$0xff]  }
 0x196   :  { %v564_v29 = vadd.f32 %v563_v28, %v295_v18  ;;  %591 = vadd.xlane.f32.xlu0 %v561_v26  ;;  %v2962_v28 = vld [vmem:[#allocation8 + $0x60] sm:$0xff]  }
 0x198   :  { %593 = vadd.xlane.f32.xlu1 %v564_v29  ;;  %2606 = vmatpush3.bf16.msra.mxu0 %v2959_v25 }
 0x199   :  { %2607 = vmatprep.subr.bf16.mxu0 %v3276_v0 }
 0x19a   :  { %v2577_v32 = vpop.f32.mrb[8].mxu0  ;;  %597 = vadd.xlane.f32.xlu0 %v572_v30 }
 0x19b   :  { %v576_v33 = vpop.f32.mrb[9].mxu0  ;;  %v3465_v38 = vadd.f32 %v2577_v32, %v295_v18 }
 0x19c   :  { %v2578_v34 = vpop.f32.mrb[10].mxu0  ;;  %595 = vadd.xlane.f32.xlu1 %v569_v31  ;;  %v577_v36 = vadd.f32 %v576_v33, %v295_v18 }
 0x19d   :  { %v579_v35 = vpop.f32.mrb[11].mxu0  ;;  %v3467_v39 = vadd.f32 %v2578_v34, %v295_v18 }
 0x19e   :  { %v580_v37 = vadd.f32 %v579_v35, %v295_v18 }
 0x1a0   :  { %599 = vadd.xlane.f32.xlu1 %v577_v36  ;;  %601 = vadd.xlane.f32.xlu0 %v580_v37 }
 0x1a4   :  { %603 = vadd.xlane.f32.xlu1 %v3465_v38  ;;  %605 = vadd.xlane.f32.xlu0 %v3467_v39 }
 0x202   :  { %v385_v41 = vpop.xlane.xlu0 %384 }
 0x203   :  { %v3475_v42 = vmul.f32 0.03125, %v385_v41 }
 0x205   :  { %v3478_v43 = vsub.f32 %v379_v20, %v3475_v42 }
 0x207   :  { %v388_v44 = vmul.f32 %v3478_v43, %v3478_v43 }
 0x209   :  { %389 = vadd.xlane.f32.xlu1 %v388_v44 }
 0x223   :  { %v592_v49 = vpop.xlane.xlu0 %591 }
 0x224   :  { %v3499_v51 = vmul.f32 0.03125, %v592_v49 }
 0x225   :  { %v594_v52 = vpop.xlane.xlu1 %593 }
 0x226   :  { %v3502_v53 = vmul.f32 0.03125, %v594_v52  ;;  %v3505_v54 = vsub.f32 %v561_v26, %v3499_v51  ;;  %v2960_v26 = vld [vmem:[#allocation8 + $0x50] sm:$0xff]  }
 0x227   :  { %v598_v55 = vpop.xlane.xlu0 %597  ;;  %2608 = vmatpush3.bf16.msra.mxu0 %v2960_v26 }
 0x228   :  { %v3510_v57 = vmul.f32 0.03125, %v598_v55  ;;  %v623_v58 = vmul.f32 %v3505_v54, %v3505_v54  ;;  %v3515_v59 = vsub.f32 %v564_v29, %v3502_v53  ;;  %2609 = vmatprep.subr.bf16.mxu0 %v3276_v0  ;;  %v2963_v29 = vld [vmem:[#allocation8 + $0x68] sm:$0xff]  }
 0x229   :  { %v596_v60 = vpop.xlane.xlu1 %595 }
 0x22a   :  { %v3518_v61 = vmul.f32 0.03125, %v596_v60  ;;  %631 = vadd.xlane.f32.xlu0 %v623_v58  ;;  %v624_v62 = vmul.f32 %v3515_v59, %v3515_v59  ;;  %v3523_v63 = vsub.f32 %v572_v30, %v3510_v57  ;;  %v2964_v30 = vld [vmem:[#allocation8 + $0x70] sm:$0xff]   ;;  %v647_v60 = vmul.f32 96.0, %v3499_v51 }
 0x22b   :  { %2610 = vmatpush3.bf16.msra.mxu0 %v2961_v27 }
 0x22c   :  { %633 = vadd.xlane.f32.xlu1 %v624_v62  ;;  %v3529_v2 = vsub.f32 %v569_v31, %v3518_v61  ;;  %v626_v8 = vmul.f32 %v3523_v63, %v3523_v63  ;;  %2611 = vmatprep.subr.bf16.mxu0 %v3276_v0  ;;  %v391_v31 = vmul.f32 96.0, %v3475_v42  ;;  %v648_v62 = vmul.f32 96.0, %v3502_v53 }
 0x22d   :  { %v600_v3 = vpop.xlane.xlu1 %599  ;;  %v602_v4 = vpop.xlane.xlu0 %601 }
 0x22e   :  { %v3532_v5 = vmul.f32 0.03125, %v600_v3  ;;  %v3534_v6 = vmul.f32 0.03125, %v602_v4  ;;  %v625_v7 = vmul.f32 %v3529_v2, %v3529_v2  ;;  %v392_v32 = vmul.f32 %v391_v31, %v3475_v42 }
 0x22f   :  { %2612 = vmatpush3.bf16.msra.mxu0 %v2962_v28 }
 0x230   :  { %635 = vadd.xlane.f32.xlu0 %v625_v7  ;;  %637 = vadd.xlane.f32.xlu1 %v626_v8  ;;  %v3542_v9 = vsub.f32 %v577_v36, %v3532_v5  ;;  %v3545_v10 = vsub.f32 %v580_v37, %v3534_v6  ;;  %v400_v37 = vsub.s32 1, %v3453_v15  ;;  %v656_v7 = vmul.f32 %v648_v62, %v3502_v53 }
 0x231   :  { %v604_v11 = vpop.xlane.xlu1 %603  ;;  %v606_v12 = vpop.xlane.xlu0 %605  ;;  %2613 = vmatprep.subr.bf16.mxu0 %v3276_v0  ;;  %v650_v8 = vmul.f32 96.0, %v3510_v57 }
 0x232   :  { %v3548_v13 = vmul.f32 0.03125, %v604_v11  ;;  %v3550_v14 = vmul.f32 0.03125, %v606_v12  ;;  %v627_v18 = vmul.f32 %v3542_v9, %v3542_v9  ;;  %v628_v19 = vmul.f32 %v3545_v10, %v3545_v10 }
 0x233   :  { %2614 = vmatpush3.bf16.msra.mxu0 %v2963_v29  ;;  %v649_v11 = vmul.f32 96.0, %v3518_v61 }
 0x234   :  { %639 = vadd.xlane.f32.xlu0 %v627_v18  ;;  %641 = vadd.xlane.f32.xlu1 %v628_v19  ;;  %v3558_v20 = vsub.f32 %v3465_v38, %v3548_v13  ;;  %v3562_v21 = vsub.f32 %v3467_v39, %v3550_v14  ;;  %v405_v38 = vsub.s32 2, %v3453_v15  ;;  %v3582_v39 = vrot.slane %v3461_v17, %v400_v37 }
 0x235   :  { %2615 = vmatprep.subr.bf16.mxu0 %v3276_v0  ;;  %v652_v19 = vmul.f32 96.0, %v3534_v6  ;;  %v657_v53 = vmul.f32 %v649_v11, %v3518_v61  ;;  %v653_v61 = vmul.f32 96.0, %v3548_v13 }
 0x236   :  { %v629_v22 = vmul.f32 %v3558_v20, %v3558_v20  ;;  %v630_v23 = vmul.f32 %v3562_v21, %v3562_v21  ;;  %v3588_v42 = vrot.slane %v3461_v17, %v405_v38 }
 0x237   :  { %2616 = vmatpush3.bf16.msra.mxu0 %v2964_v30  ;;  %v660_v29 = vmul.f32 %v652_v19, %v3534_v6 }
 0x238   :  { %643 = vadd.xlane.f32.xlu0 %v629_v22  ;;  %645 = vadd.xlane.f32.xlu1 %v630_v23  ;;  %v651_v22 = vmul.f32 96.0, %v3532_v5  ;;  %v658_v23 = vmul.f32 %v650_v8, %v3510_v57 }
 0x239   :  { %2617 = vmatprep.subr.bf16.mxu0 %v3276_v0 }
 0x23a   :  { %v659_v30 = vmul.f32 %v651_v22, %v3532_v5 }
 0x296   :  { %v390_v33 = vpop.xlane.xlu1 %389 }
 0x297   :  { %v393_v34 = vsub.f32 %v390_v33, %v392_v32 }
 0x299   :  { %v394_v35 = vmul.f32 0.03125, %v393_v34 }
 0x29b   :  { %v395_v36 = vadd.f32 1e-05, %v394_v35 }
 0x29d   :  { %3022 = vrsqrt.f32 %v395_v36 }
 0x2a7   :  { %v3023_v41 = vpop.eup %3022 }
 0x2a8   :  { %v397_v44 = vmul.f32 %v3023_v41, %v3478_v43  ;;  %v655_v43 = vmul.f32 %v647_v60, %v3499_v51 }
 0x2aa   :  { %v402_v49 = vmul.f32 %v3582_v39, %v397_v44  ;;  %v661_v44 = vmul.f32 %v653_v61, %v3548_v13 }
 0x2ac   :  { %v407_v52 = vadd.f32 %v3588_v42, %v402_v49 }
 0x2ae   :  { %v408_v55 = vmax.f32 %v407_v52, 0.0 }
 0x2b0   :  { %v409_v58 = vpack.c.bf16 %v408_v55, %v408_v55 }
 0x2b2   :  { %2552 = vmatmul.mubr.bf16.vlgmr.msra.gmra.mrb[0].mxu1 %v409_v58 }
 0x2b3   :  { %2580 = vmatpush3.bf16.msra.mxu1 %v3471_v40 }
 0x2b4   :  { %2581 = vmatprep.subr.bf16.mxu1 %v3482_v45 }
 0x2b7   :  { %v632_v3 = vpop.xlane.xlu0 %631  ;;  %2582 = vmatpush3.bf16.msra.mxu1 %v3482_v45 }
 0x2b8   :  { %v663_v4 = vsub.f32 %v632_v3, %v655_v43  ;;  %2583 = vmatprep.subr.bf16.mxu1 %v3486_v46 }
 0x2b9   :  { %v634_v12 = vpop.xlane.xlu1 %633 }
 0x2ba   :  { %v671_v40 = vmul.f32 0.03125, %v663_v4  ;;  %v664_v18 = vsub.f32 %v634_v12, %v656_v7 }
 0x2bb   :  { %2584 = vmatpush3.bf16.msra.mxu1 %v3486_v46  ;;  %v654_v46 = vmul.f32 96.0, %v3550_v14 }
 0x2bc   :  { %v679_v51 = vadd.f32 1e-05, %v671_v40  ;;  %v672_v45 = vmul.f32 0.03125, %v664_v18  ;;  %2585 = vmatprep.subr.bf16.mxu1 %v3490_v47 }
 0x2bd   :  { %v638_v24 = vpop.xlane.xlu1 %637  ;;  %v636_v25 = vpop.xlane.xlu0 %635  ;;  %v662_v6 = vmul.f32 %v654_v46, %v3550_v14 }
 0x2be   :  { %3024 = vrsqrt.f32 %v679_v51  ;;  %v680_v26 = vadd.f32 1e-05, %v672_v45  ;;  %v666_v27 = vsub.f32 %v638_v24, %v658_v23  ;;  %v665_v28 = vsub.f32 %v636_v25, %v657_v53 }
 0x2bf   :  { %2586 = vmatpush3.bf16.msra.mxu1 %v3490_v47 }
 0x2c0   :  { %3026 = vrsqrt.f32 %v680_v26  ;;  %v674_v57 = vmul.f32 0.03125, %v666_v27  ;;  %v673_v31 = vmul.f32 0.03125, %v665_v28  ;;  %2587 = vmatprep.subr.bf16.mxu1 %v3493_v48 }
 0x2c1   :  { %v642_v32 = vpop.xlane.xlu1 %641  ;;  %v640_v33 = vpop.xlane.xlu0 %639 }
 0x2c2   :  { %v682_v34 = vadd.f32 1e-05, %v674_v57  ;;  %v681_v35 = vadd.f32 1e-05, %v673_v31  ;;  %v668_v36 = vsub.f32 %v642_v32, %v660_v29  ;;  %v667_v41 = vsub.f32 %v640_v33, %v659_v30 }
 0x2c3   :  { %2588 = vmatpush3.bf16.msra.mxu1 %v3493_v48 }
 0x2c4   :  { %3028 = vrsqrt.f32 %v682_v34  ;;  %v676_v5 = vmul.f32 0.03125, %v668_v36  ;;  %v675_v47 = vmul.f32 0.03125, %v667_v41  ;;  %2589 = vmatprep.subr.bf16.mxu1 %v3497_v50 }
 0x2c5   :  { %3030 = vrsqrt.f32 %v681_v35  ;;  %v646_v49 = vpop.xlane.xlu1 %645  ;;  %v644_v52 = vpop.xlane.xlu0 %643 }
 0x2c6   :  { %v684_v55 = vadd.f32 1e-05, %v676_v5  ;;  %v683_v58 = vadd.f32 1e-05, %v675_v47  ;;  %v670_v60 = vsub.f32 %v646_v49, %v662_v6  ;;  %v669_v62 = vsub.f32 %v644_v52, %v661_v44  ;;  %v2965_v44 = vld [vmem:[#allocation8 + $0x78] sm:$0xff]   ;;  %v2967_v49 = vld [vmem:[#allocation8 + $0xc0] sm:$0xff]  }
 0x2c7   :  { %2590 = vmatpush3.bf16.msra.mxu1 %v3497_v50  ;;  %2618 = vmatpush3.bf16.msra.mxu0 %v2965_v44  ;;  %v2968_v52 = vld [vmem:[#allocation8 + $0x88] sm:$0xff]  }
 0x2c8   :  { %v3025_v43 = vpop.eup %3024  ;;  %3032 = vrsqrt.f32 %v684_v55  ;;  %v678_v14 = vmul.f32 0.03125, %v670_v60  ;;  %v677_v48 = vmul.f32 0.03125, %v669_v62  ;;  %2591 = vmatprep.subr.bf16.mxu1 %v3508_v56  ;;  %2647 = vmatprep.subr.bf16.mxu0 %v2967_v49  ;;  %v2972_v55 = vld [vmem:[#allocation8 + $0x98] sm:$0xff]   ;;  %v2978_v60 = vld [vmem:[#allocation8 + $0xb0] sm:$0xff]   ;;  %v1234_v44 = vld [vmem:[#allocation11 + $0x48] sm:$0xff] }
 0x2c9   :  { %3034 = vrsqrt.f32 %v683_v58  ;;  %v695_v13 = vmul.f32 %v3025_v43, %v3505_v54  ;;  %v2976_v58 = vld [vmem:[#allocation8 + $0xa8] sm:$0xff]   ;;  %v2980_v62 = vld [vmem:[#allocation8 + $0xb8] sm:$0xff]   ;;  %v412_v43 = vsub.s32 3, %v3453_v15 }
 0x2ca   :  { %v3027_v3 = vpop.eup %3026  ;;  %v686_v4 = vadd.f32 1e-05, %v678_v14  ;;  %v685_v7 = vadd.f32 1e-05, %v677_v48 }
 0x2cb   :  { %2592 = vmatpush3.bf16.msra.mxu1 %v3508_v56  ;;  %v696_v8 = vmul.f32 %v3027_v3, %v3515_v59  ;;  %v703_v11 = vmul.f32 %v695_v13, %v3582_v39  ;;  %v413_v14 = vrot.slane %v3461_v17, %v412_v43 }
 0x2cc   :  { %3036 = vrsqrt.f32 %v686_v4  ;;  %2593 = vmatprep.subr.bf16.mxu1 %v3526_v1 }
 0x2cd   :  { %3038 = vrsqrt.f32 %v685_v7  ;;  %v704_v50 = vmul.f32 %v696_v8, %v3582_v39  ;;  %v711_v12 = vadd.f32 %v703_v11, %v3588_v42  ;;  %v2969_v11 = vld [vmem:[#allocation8 + $0xc8] sm:$0xff]  }
 0x2ce   :  { %v3029_v40 = vpop.eup %3028 }
 0x2cf   :  { %v3031_v18 = vpop.eup %3030  ;;  %v698_v54 = vmul.f32 %v3029_v40, %v3523_v63  ;;  %v712_v19 = vadd.f32 %v704_v50, %v3588_v42  ;;  %2594 = vmatpush3.bf16.msra.mxu1 %v3526_v1  ;;  %v719_v59 = vmax.f32 %v711_v12, 0.0  ;;  %v2971_v50 = vld [vmem:[#allocation8 + $0xd0] sm:$0xff]   ;;  %v2973_v12 = vld [vmem:[#allocation8 + $0xd8] sm:$0xff]   ;;  %v2975_v40 = vld [vmem:[#allocation8 + $0xe0] sm:$0xff]  }
 0x2d0   :  { %v697_v56 = vmul.f32 %v3031_v18, %v3529_v2  ;;  %v2977_v18 = vld [vmem:[#allocation8 + $0xe8] sm:$0xff]  }
 0x2d1   :  { %v720_v22 = vmax.f32 %v712_v19, 0.0  ;;  %v706_v51 = vmul.f32 %v698_v54, %v3582_v39  ;;  %v2979_v54 = vld [vmem:[#allocation8 + $0xf0] sm:$0xff]   ;;  %v2981_v19 = vld [vmem:[#allocation8 + $0xf8] sm:$0xff]  }
 0x2d2   :  { %v3033_v45 = vpop.eup %3032  ;;  %v705_v23 = vmul.f32 %v697_v56, %v3582_v39 }
 0x2d3   :  { %v3035_v53 = vpop.eup %3034  ;;  %v727_v24 = vpack.c.bf16 %v720_v22, %v719_v59  ;;  %v714_v25 = vadd.f32 %v706_v51, %v3588_v42  ;;  %v700_v26 = vmul.f32 %v3033_v45, %v3545_v10 }
 0x2d4   :  { %v713_v63 = vadd.f32 %v705_v23, %v3588_v42  ;;  %v699_v27 = vmul.f32 %v3035_v53, %v3542_v9 }
 0x2d5   :  { %2595 = vmatprep.mubr.bf16.mxu1 %v727_v24  ;;  %v722_v1 = vmax.f32 %v714_v25, 0.0  ;;  %v708_v2 = vmul.f32 %v700_v26, %v3582_v39 }
 0x2d6   :  { %v3037_v28 = vpop.eup %3036  ;;  %v721_v29 = vmax.f32 %v713_v63, 0.0  ;;  %v707_v30 = vmul.f32 %v699_v27, %v3582_v39 }
 0x2d7   :  { %v3039_v46 = vpop.eup %3038  ;;  %v716_v57 = vadd.f32 %v708_v2, %v3588_v42  ;;  %v702_v31 = vmul.f32 %v3037_v28, %v3562_v21 }
 0x2d8   :  { %v728_v61 = vpack.c.bf16 %v722_v1, %v721_v29  ;;  %v715_v10 = vadd.f32 %v707_v30, %v3588_v42  ;;  %v701_v32 = vmul.f32 %v3039_v46, %v3558_v20  ;;  %v2966_v20 = vld [vmem:[#allocation8 + $0x80] sm:$0xff]  }
 0x2d9   :  { %v724_v33 = vmax.f32 %v716_v57, 0.0  ;;  %v710_v9 = vmul.f32 %v702_v31, %v3582_v39  ;;  %2623 = vmatprep.subr.bf16.mxu1 %v2966_v20 }
 0x2da   :  { %2596 = vmatmul.mubr.bf16.vlgmr.msra.gmra.mrb[4].mxu1 %v728_v61  ;;  %v723_v34 = vmax.f32 %v715_v10, 0.0  ;;  %v709_v35 = vmul.f32 %v701_v32, %v3582_v39  ;;  %v2970_v39 = vld [vmem:[#allocation8 + $0x90] sm:$0xff]   ;;  %v1225_v61 = vld [vmem:[#allocation11] sm:$0xff]  ;;  %v1226_v10 = vld [vmem:[#allocation11 + $0x8] sm:$0xff] }
 0x2db   :  { %v718_v36 = vadd.f32 %v710_v9, %v3588_v42  ;;  %2624 = vmatpush3.bf16.msra.mxu1 %v2966_v20  ;;  %v1227_v32 = vld [vmem:[#allocation11 + $0x10] sm:$0xff]  ;;  %v1228_v9 = vld [vmem:[#allocation11 + $0x18] sm:$0xff] }
 0x2dc   :  { %v729_v41 = vpack.c.bf16 %v724_v33, %v723_v34  ;;  %v717_v6 = vadd.f32 %v709_v35, %v3588_v42  ;;  %2625 = vmatprep.subr.bf16.mxu1 %v2968_v52  ;;  %v2974_v42 = vld [vmem:[#allocation8 + $0xa0] sm:$0xff]   ;;  %v2859_v33 = vpack.c.bf16 %v1226_v10, %v1225_v61  ;;  %v2863_v34 = vpack.c.bf16 %v1228_v9, %v1227_v32 }
 0x2dd   :  { %v726_v5 = vmax.f32 %v718_v36, 0.0  ;;  %v1229_v35 = vld [vmem:[#allocation11 + $0x20] sm:$0xff]  ;;  %v1230_v36 = vld [vmem:[#allocation11 + $0x28] sm:$0xff] }
 0x2de   :  { %2599 = vmatprep.mubr.bf16.mxu1 %v729_v41  ;;  %v725_v21 = vmax.f32 %v717_v6, 0.0  ;;  %v2867_v41 = vpack.c.bf16 %v1230_v36, %v1229_v35  ;;  %v1231_v6 = vld [vmem:[#allocation11 + $0x30] sm:$0xff] }
 0x2df   :  { %2626 = vmatpush3.bf16.msra.mxu1 %v2968_v52  ;;  %v1236_v52 = vld [vmem:[#allocation11 + $0x58] sm:$0xff] }
 0x2e0   :  { %v730_v47 = vpack.c.bf16 %v726_v5, %v725_v21  ;;  %2627 = vmatprep.subr.bf16.mxu1 %v2970_v39  ;;  %v1232_v5 = vld [vmem:[#allocation11 + $0x38] sm:$0xff] }
 0x2e1   :  { %v2871_v21 = vpack.c.bf16 %v1232_v5, %v1231_v6 }
 0x2e2   :  { %2600 = vmatmul.mubr.bf16.gmra.mrb[8].mxu1 %v730_v47  ;;  %v1233_v47 = vld [vmem:[#allocation11 + $0x40] sm:$0xff] }
 0x2e3   :  { %2628 = vmatpush3.bf16.msra.mxu1 %v2970_v39  ;;  %v2875_v20 = vpack.c.bf16 %v1234_v44, %v1233_v47 }
 0x2e4   :  { %2629 = vmatprep.subr.bf16.mxu1 %v2972_v55 }
 0x2e7   :  { %2630 = vmatpush3.bf16.msra.mxu1 %v2972_v55  ;;  %v1237_v55 = vld [vmem:[#allocation11 + $0x60] sm:$0xff] }
 0x2e8   :  { %2631 = vmatprep.subr.bf16.mxu1 %v2974_v42 }
 0x2eb   :  { %2632 = vmatpush3.bf16.msra.mxu1 %v2974_v42  ;;  %v1238_v42 = vld [vmem:[#allocation11 + $0x68] sm:$0xff] }
 0x2ec   :  { %2633 = vmatprep.subr.bf16.mxu1 %v2976_v58 }
 0x2ef   :  { %2634 = vmatpush3.bf16.msra.mxu1 %v2976_v58  ;;  %v2883_v58 = vpack.c.bf16 %v1238_v42, %v1237_v55 }
 0x2f0   :  { %2635 = vmatprep.subr.bf16.mxu1 %v2978_v60 }
 0x2f3   :  { %2636 = vmatpush3.bf16.msra.mxu1 %v2978_v60  ;;  %v1239_v60 = vld [vmem:[#allocation11 + $0x70] sm:$0xff] }
 0x2f4   :  { %2637 = vmatprep.subr.bf16.mxu1 %v2980_v62 }
 0x2f7   :  { %2638 = vmatpush3.bf16.msra.mxu1 %v2980_v62  ;;  %v1240_v62 = vld [vmem:[#allocation11 + $0x78] sm:$0xff] }
 0x2f8   :  { %2860 = vmatprep.subr.bf16.mxu1 %v2859_v33 }
 0x385   :  { %v496_v48 = vpop.f32.mrb[0].mxu1 }
 0x386   :  { %v497_v13 = vadd.f32 %v496_v48, %v413_v14  ;;  %v2553_v3 = vpop.f32.mrb[1].mxu1 }
 0x387   :  { %v499_v4 = vpop.f32.mrb[2].mxu1 }
 0x388   :  { %v3651_v7 = vpack.c.bf16 %v497_v13, %v497_v13  ;;  %v2554_v8 = vpop.f32.mrb[3].mxu1 }
 0x389   :  { %v799_v8 = vsub.s32 4, %v3453_v15 }
 0x38a   :  { %2620 = vmatmul.mubr.bf16.vlgmr.msra.gmra.mrb[12].mxu0 %v3651_v7 }
 0x38b   :  { %2648 = vmatpush3.bf16.msra.mxu0 %v2967_v49  ;;  %v1235_v49 = vld [vmem:[#allocation11 + $0x50] sm:$0xff] }
 0x38c   :  { %2649 = vmatprep.subr.bf16.mxu0 %v2969_v11  ;;  %v2879_v39 = vpack.c.bf16 %v1236_v52, %v1235_v49 }
 0x38f   :  { %2650 = vmatpush3.bf16.msra.mxu0 %v2969_v11  ;;  %v3278_v11 = vmov 1966171168  }
 0x390   :  { %2651 = vmatprep.subr.bf16.mxu0 %v2971_v50 }
 0x393   :  { %2652 = vmatpush3.bf16.msra.mxu0 %v2971_v50  ;;  %v1130_v50 = vunpack.c.l.s4 %v3278_v11 }
 0x394   :  { %2653 = vmatprep.subr.bf16.mxu0 %v2973_v12 }
 0x397   :  { %2654 = vmatpush3.bf16.msra.mxu0 %v2973_v12  ;;  %v800_v12 = vrot.slane %v3461_v17, %v799_v8 }
 0x398   :  { %2655 = vmatprep.subr.bf16.mxu0 %v2975_v40 }
 0x39b   :  { %2656 = vmatpush3.bf16.msra.mxu0 %v2975_v40  ;;  %v1131_v40 = vunpack.c.0.s8 %v1130_v50 }
 0x39c   :  { %2657 = vmatprep.subr.bf16.mxu0 %v2977_v18 }
 0x39f   :  { %2658 = vmatpush3.bf16.msra.mxu0 %v2977_v18 }
 0x3a0   :  { %2659 = vmatprep.subr.bf16.mxu0 %v2979_v54 }
 0x3a3   :  { %2660 = vmatpush3.bf16.msra.mxu0 %v2979_v54  ;;  %v1134_v54 = vsub.s32 %v1131_v40, %v3453_v15 }
 0x3a4   :  { %2661 = vmatprep.subr.bf16.mxu0 %v2981_v19 }
 0x3a7   :  { %2662 = vmatpush3.bf16.msra.mxu0 %v2981_v19 }
 0x3ad   :  { %v2597_v56 = vpop.f32.mrb[4].mxu1 }
 0x3ae   :  { %v765_v59 = vpop.f32.mrb[5].mxu1  ;;  %v774_v51 = vadd.f32 %v2597_v56, %v413_v14 }
 0x3af   :  { %v2598_v22 = vpop.f32.mrb[6].mxu1  ;;  %v766_v53 = vadd.f32 %v765_v59, %v413_v14 }
 0x3b0   :  { %v777_v45 = vadd.f32 %v2598_v22, %v413_v14  ;;  %v768_v23 = vpop.f32.mrb[7].mxu1 }
 0x3b1   :  { %v769_v24 = vadd.f32 %v768_v23, %v413_v14 }
 0x3b2   :  { %v890_v25 = vpack.c.bf16 %v777_v45, %v774_v51  ;;  %v895_v51 = vsub.s32 5, %v3453_v15 }
 0x3b3   :  { %v889_v26 = vpack.c.bf16 %v769_v24, %v766_v53 }
 0x3b4   :  { %v896_v53 = vrot.slane %v3461_v17, %v895_v51 }
 0x3b5   :  { %v2601_v63 = vpop.f32.mrb[8].mxu1  ;;  %2639 = vmatprep.mubr.bf16.mxu1 %v889_v26  ;;  %2663 = vmatprep.mubr.bf16.mxu0 %v889_v26 }
 0x3b6   :  { %v781_v27 = vpop.f32.mrb[9].mxu1  ;;  %2640 = vmatmul.mubr.bf16.vlgmr.msra.gmra.mrb[12].mxu1 %v890_v25  ;;  %2664 = vmatmul.mubr.bf16.vlgmr.msra.gmra.mrb[16].mxu0 %v890_v25  ;;  %v790_v2 = vadd.f32 %v2601_v63, %v413_v14 }
 0x3b7   :  { %v2602_v1 = vpop.f32.mrb[10].mxu1  ;;  %v782_v30 = vadd.f32 %v781_v27, %v413_v14  ;;  %2862 = vmatpush3.bf16.msra.mxu1 %v2859_v33 }
 0x3b8   :  { %v793_v28 = vadd.f32 %v2602_v1, %v413_v14  ;;  %v784_v29 = vpop.f32.mrb[11].mxu1  ;;  %2864 = vmatprep.subr.bf16.mxu1 %v2863_v34 }
 0x3b9   :  { %v785_v46 = vadd.f32 %v784_v29, %v413_v14  ;;  %v2887_v14 = vpack.c.bf16 %v1240_v62, %v1239_v60 }
 0x3ba   :  { %v892_v57 = vpack.c.bf16 %v793_v28, %v790_v2 }
 0x3bb   :  { %v891_v31 = vpack.c.bf16 %v785_v46, %v782_v30  ;;  %2866 = vmatpush3.bf16.msra.mxu1 %v2863_v34 }
 0x3bc   :  { %2868 = vmatprep.subr.bf16.mxu1 %v2867_v41 }
 0x3bd   :  { %2643 = vmatprep.mubr.bf16.mxu1 %v891_v31  ;;  %2667 = vmatprep.mubr.bf16.mxu0 %v891_v31 }
 0x3be   :  { %2644 = vmatmul.mubr.bf16.gmra.mrb[16].mxu1 %v892_v57  ;;  %2668 = vmatmul.mubr.bf16.gmra.mrb[20].mxu0 %v892_v57 }
 0x3bf   :  { %2870 = vmatpush3.bf16.msra.mxu1 %v2867_v41 }
 0x3c0   :  { %2872 = vmatprep.subr.bf16.mxu1 %v2871_v21 }
 0x3c3   :  { %2874 = vmatpush3.bf16.msra.mxu1 %v2871_v21 }
 0x3c4   :  { %2876 = vmatprep.subr.bf16.mxu1 %v2875_v20 }
 0x3c7   :  { %2878 = vmatpush3.bf16.msra.mxu1 %v2875_v20 }
 0x3c8   :  { %2880 = vmatprep.subr.bf16.mxu1 %v2879_v39 }
 0x3cb   :  { %2882 = vmatpush3.bf16.msra.mxu1 %v2879_v39 }
 0x3cc   :  { %2884 = vmatprep.subr.bf16.mxu1 %v2883_v58 }
 0x3cf   :  { %2886 = vmatpush3.bf16.msra.mxu1 %v2883_v58 }
 0x3d0   :  { %2888 = vmatprep.subr.bf16.mxu1 %v2887_v14 }
 0x3d3   :  { %2890 = vmatpush3.bf16.msra.mxu1 %v2887_v14 }
 0x3d4   :  { %2759 = vmatprep.subr.bf16.mxu1 %v3276_v0 }
 0x45d   :  { %v883_v48 = vpop.f32.mrb[12].mxu0 }
 0x45e   :  { %v2621_v13 = vpop.f32.mrb[13].mxu0  ;;  %v884_v18 = vadd.f32 %v883_v48, %v800_v12 }
 0x45f   :  { %v886_v3 = vpop.f32.mrb[14].mxu0 }
 0x460   :  { %v2622_v4 = vpop.f32.mrb[15].mxu0  ;;  %v1135_v19 = vrot.slane %v884_v18, %v1134_v54  ;;  %v1128_v56 = vcombine.high %v884_v18, %v884_v18 }
 0x462   :  { %v1143_v59 = vcombine.high %v1135_v19, %v1135_v19  ;;  %v1151_v22 = vrot.slane %v1135_v19, %v1134_v54  ;;  %v1142_v45 = vrot.slane %v1128_v56, %v1134_v54  ;;  %v1492_v19 = vld [vmem:[#allocation13 + $0x8] sm:$0xff] }
 0x464   :  { %v1165_v23 = vrot.slane %v1143_v59, %v1134_v54  ;;  %v1173_v24 = vcombine.high %v1151_v22, %v1151_v22  ;;  %v1144_v25 = vcombine.high %v1142_v45, %v1142_v45  ;;  %v1158_v1 = vrot.slane %v1142_v45, %v1134_v54  ;;  %v1493_v59 = vld [vmem:[#allocation13 + $0x10] sm:$0xff] }
 0x465   :  { %v1180_v57 = vrot.slane %v1151_v22, %v3456_v16  ;;  %v1494_v22 = vld [vmem:[#allocation13 + $0x18] sm:$0xff] }
 0x466   :  { %v1175_v26 = vcombine.high %v1165_v23, %v1165_v23  ;;  %v1188_v28 = vrot.slane %v1173_v24, %v3456_v16  ;;  %v1172_v34 = vrot.slane %v1144_v25, %v1134_v54  ;;  %v1184_v41 = vrot.slane %v1165_v23, %v3456_v16  ;;  %v1491_v54 = vld [vmem:[#allocation13] sm:$0xff]  ;;  %v1497_v25 = vld [vmem:[#allocation13 + $0x30] sm:$0xff] }
 0x467   :  { %v1174_v5 = vcombine.high %v1158_v1, %v1158_v1  ;;  %v1196_v58 = vrot.slane %v1158_v1, %v3456_v16  ;;  %v2891_v56 = vpack.c.bf16 %v1492_v19, %v1491_v54  ;;  %v2895_v45 = vpack.c.bf16 %v1494_v22, %v1493_v59  ;;  %v1495_v23 = vld [vmem:[#allocation13 + $0x20] sm:$0xff] }
 0x468   :  { %v1192_v32 = vrot.slane %v1175_v26, %v3456_v16  ;;  %v1176_v47 = vcombine.high %v1172_v34, %v1172_v34  ;;  %v1200_v12 = vrot.slane %v1172_v34, %v3456_v16  ;;  %v1498_v26 = vld [vmem:[#allocation13 + $0x38] sm:$0xff] }
 0x469   :  { %v1204_v52 = vrot.slane %v1174_v5, %v3456_v16  ;;  %2892 = vmatprep.subr.bf16.mxu0 %v2891_v56  ;;  %v2903_v1 = vpack.c.bf16 %v1498_v26, %v1497_v25 }
 0x46a   :  { %v1208_v13 = vrot.slane %v1176_v47, %v3456_v16  ;;  %2894 = vmatpush3.bf16.msra.mxu0 %v2891_v56 }
 0x46b   :  { %2896 = vmatprep.subr.bf16.mxu0 %v2895_v45 }
 0x46e   :  { %2898 = vmatpush3.bf16.msra.mxu0 %v2895_v45 }
 0x489   :  { %v2641_v63 = vpop.f32.mrb[12].mxu1  ;;  %v3664_v27 = vpop.f32.mrb[16].mxu0 }
 0x48a   :  { %v988_v2 = vadd.f32 %v2641_v63, %v896_v53  ;;  %v979_v29 = vpop.f32.mrb[13].mxu1  ;;  %v3667_v30 = vpop.f32.mrb[17].mxu0  ;;  %v1499_v63 = vld [vmem:[#allocation13 + $0x40] sm:$0xff] }
 0x48b   :  { %v980_v46 = vadd.f32 %v979_v29, %v896_v53  ;;  %v2642_v31 = vpop.f32.mrb[14].mxu1  ;;  %v3670_v61 = vpop.f32.mrb[18].mxu0  ;;  %v1501_v29 = vld [vmem:[#allocation13 + $0x50] sm:$0xff] }
 0x48c   :  { %v1219_v17 = vmul.f32 %v1188_v28, %v988_v2  ;;  %v991_v10 = vadd.f32 %v2642_v31, %v896_v53  ;;  %v982_v33 = vpop.f32.mrb[15].mxu1  ;;  %v3673_v9 = vpop.f32.mrb[19].mxu0  ;;  %v1500_v2 = vld [vmem:[#allocation13 + $0x48] sm:$0xff]  ;;  %v1503_v31 = vld [vmem:[#allocation13 + $0x60] sm:$0xff] }
 0x48d   :  { %v1217_v35 = vmul.f32 %v1180_v57, %v980_v46  ;;  %v983_v36 = vadd.f32 %v982_v33, %v896_v53  ;;  %v2907_v28 = vpack.c.bf16 %v1500_v2, %v1499_v63  ;;  %v1502_v46 = vld [vmem:[#allocation13 + $0x58] sm:$0xff] }
 0x48e   :  { %v1220_v6 = vmul.f32 %v1192_v32, %v991_v10  ;;  %v2911_v57 = vpack.c.bf16 %v1502_v46, %v1501_v29  ;;  %v1505_v32 = vld [vmem:[#allocation13 + $0x70] sm:$0xff]  ;;  %v1506_v33 = vld [vmem:[#allocation13 + $0x78] sm:$0xff] }
 0x48f   :  { %v1218_v21 = vmul.f32 %v1184_v41, %v983_v36  ;;  %2703 = vmatprep.mubr.f32.mxu1 %v1217_v35  ;;  %v2919_v34 = vpack.c.bf16 %v1506_v33, %v1505_v32  ;;  %v1346_v35 = vld [vmem:[%s3830_s9] sm:$0xff] }
 0x491   :  { %v2645_v44 = vpop.f32.mrb[16].mxu1  ;;  %v3676_v20 = vpop.f32.mrb[20].mxu0  ;;  %2704 = vmatmul.mubr.f32.vlgmr.msra.gmra.mrb[20].mxu1 %v1218_v21 }
 0x492   :  { %v1004_v49 = vadd.f32 %v2645_v44, %v896_v53  ;;  %v995_v39 = vpop.f32.mrb[17].mxu1  ;;  %v3679_v55 = vpop.f32.mrb[21].mxu0  ;;  %2706 = vmatprep.mubr.f32.mxu1 %v1219_v17  ;;  %v1504_v17 = vld [vmem:[#allocation13 + $0x68] sm:$0xff] }
 0x493   :  { %v996_v42 = vadd.f32 %v995_v39, %v896_v53  ;;  %v2646_v60 = vpop.f32.mrb[18].mxu1  ;;  %v3682_v62 = vpop.f32.mrb[22].mxu0  ;;  %v2915_v10 = vpack.c.bf16 %v1504_v17, %v1503_v31 }
 0x494   :  { %v1223_v14 = vmul.f32 %v1204_v52, %v1004_v49  ;;  %v1007_v48 = vadd.f32 %v2646_v60, %v896_v53  ;;  %v998_v3 = vpop.f32.mrb[19].mxu1  ;;  %v3685_v4 = vpop.f32.mrb[23].mxu0 }
 0x495   :  { %v1221_v11 = vmul.f32 %v1196_v58, %v996_v42  ;;  %v999_v50 = vadd.f32 %v998_v3, %v896_v53  ;;  %2707 = vmatmul.mubr.f32.gmra.mrb[22].mxu1 %v1220_v6  ;;  %v1496_v53 = vld [vmem:[#allocation13 + $0x28] sm:$0xff] }
 0x496   :  { %v1224_v40 = vmul.f32 %v1208_v13, %v1007_v48  ;;  %v2899_v24 = vpack.c.bf16 %v1496_v53, %v1495_v23 }
 0x497   :  { %v1222_v18 = vmul.f32 %v1200_v12, %v999_v50  ;;  %2709 = vmatprep.mubr.f32.mxu1 %v1221_v11 }
 0x498   :  { %2900 = vmatprep.subr.bf16.mxu0 %v2899_v24 }
 0x499   :  { %2710 = vmatmul.mubr.f32.gmra.mrb[24].mxu1 %v1222_v18  ;;  %2902 = vmatpush3.bf16.msra.mxu0 %v2899_v24 }
 0x49a   :  { %2712 = vmatprep.mubr.f32.mxu1 %v1223_v14  ;;  %2904 = vmatprep.subr.bf16.mxu0 %v2903_v1 }
 0x49d   :  { %2713 = vmatmul.mubr.f32.gmra.mrb[26].mxu1 %v1224_v40  ;;  %2906 = vmatpush3.bf16.msra.mxu0 %v2903_v1 }
 0x49e   :  { %2775 = vmatprep.mubr.msk.bf16.mxu1 %vm3277_vm0, %v3276_v0  ;;  %2908 = vmatprep.subr.bf16.mxu0 %v2907_v28 }
 0x4a1   :  { %2910 = vmatpush3.bf16.msra.mxu0 %v2907_v28 }
 0x4a2   :  { %2912 = vmatprep.subr.bf16.mxu0 %v2911_v57 }
 0x4a5   :  { %2914 = vmatpush3.bf16.msra.mxu0 %v2911_v57 }
 0x4a6   :  { %2916 = vmatprep.subr.bf16.mxu0 %v2915_v10 }
 0x4a9   :  { %2918 = vmatpush3.bf16.msra.mxu0 %v2915_v10 }
 0x4aa   :  { %2920 = vmatprep.subr.bf16.mxu0 %v2919_v34 }
 0x4ad   :  { %2922 = vmatpush3.bf16.msra.mxu0 %v2919_v34 }
 0x4ae   :  { %2779 = vmatprep.subr.bf16.mxu0 %v3276_v0 }
 0x564   :  { %v2705_v36 = vpop.f32.mrb[20].mxu1 }
 0x565   :  { %v1348_v41 = vadd.f32 %v2705_v36, %v1346_v35  ;;  %v1307_v6 = vpop.f32.mrb[21].mxu1 }
 0x566   :  { %v1347_v5 = vadd.f32 %v1346_v35, %v1307_v6 }
 0x567   :  { %v1361_v21 = vrot.slane %v1348_v41, 4 }
 0x568   :  { %v1355_v47 = vrot.slane %v1347_v5, 4  ;;  %v2708_v44 = vpop.f32.mrb[22].mxu1 }
 0x569   :  { %v1362_v49 = vmax.f32 %v1348_v41, %v1361_v21  ;;  %v1350_v52 = vadd.f32 %v2708_v44, %v1346_v35  ;;  %v1317_v39 = vpop.f32.mrb[23].mxu1 }
 0x56a   :  { %v1356_v42 = vmax.f32 %v1347_v5, %v1355_v47  ;;  %v1349_v58 = vadd.f32 %v1346_v35, %v1317_v39 }
 0x56b   :  { %v1363_v60 = vrot.slane %v1362_v49, 2  ;;  %v1373_v14 = vrot.slane %v1350_v52, 4 }
 0x56c   :  { %v1357_v48 = vrot.slane %v1356_v42, 2  ;;  %v1367_v13 = vrot.slane %v1349_v58, 4  ;;  %v2711_v3 = vpop.f32.mrb[24].mxu1 }
 0x56d   :  { %v1364_v11 = vmax.f32 %v1362_v49, %v1363_v60  ;;  %v1374_v50 = vmax.f32 %v1350_v52, %v1373_v14  ;;  %v1352_v12 = vadd.f32 %v2711_v3, %v1346_v35  ;;  %v1327_v40 = vpop.f32.mrb[25].mxu1 }
 0x56e   :  { %v1358_v18 = vmax.f32 %v1356_v42, %v1357_v48  ;;  %v1368_v54 = vmax.f32 %v1349_v58, %v1367_v13  ;;  %v1351_v19 = vadd.f32 %v1346_v35, %v1327_v40 }
 0x56f   :  { %v1365_v56 = vrot.slane %v1364_v11, 1  ;;  %v1375_v59 = vrot.slane %v1374_v50, 2  ;;  %v1385_v22 = vrot.slane %v1352_v12, 4 }
 0x570   :  { %v1359_v45 = vrot.slane %v1358_v18, 1  ;;  %v1369_v23 = vrot.slane %v1368_v54, 2  ;;  %v1379_v53 = vrot.slane %v1351_v19, 4  ;;  %v2714_v24 = vpop.f32.mrb[26].mxu1 }
 0x571   :  { %v1366_v25 = vmax.f32 %v1364_v11, %v1365_v56  ;;  %v1376_v26 = vmax.f32 %v1374_v50, %v1375_v59  ;;  %v1386_v63 = vmax.f32 %v1352_v12, %v1385_v22  ;;  %v1354_v1 = vadd.f32 %v2714_v24, %v1346_v35  ;;  %v1337_v2 = vpop.f32.mrb[27].mxu1 }
 0x572   :  { %v1360_v28 = vmax.f32 %v1358_v18, %v1359_v45  ;;  %v1370_v29 = vmax.f32 %v1368_v54, %v1369_v23  ;;  %v1380_v46 = vmax.f32 %v1351_v19, %v1379_v53  ;;  %v1353_v57 = vadd.f32 %v1346_v35, %v1337_v2 }
 0x573   :  { %v1404_v31 = vsub.f32 %v1348_v41, %v1366_v25  ;;  %v1377_v17 = vrot.slane %v1376_v26, 1  ;;  %v1387_v10 = vrot.slane %v1386_v63, 2  ;;  %v1397_v32 = vrot.slane %v1354_v1, 4 }
 0x574   :  { %v1403_v33 = vsub.f32 %v1347_v5, %v1360_v28  ;;  %v1371_v34 = vrot.slane %v1370_v29, 1  ;;  %v1381_v36 = vrot.slane %v1380_v46, 2  ;;  %v1391_v6 = vrot.slane %v1353_v57, 4 }
 0x575   :  { %v1413_v21 = vmul.f32 1.442695, %v1404_v31  ;;  %v1378_v47 = vmax.f32 %v1376_v26, %v1377_v17  ;;  %v1388_v44 = vmax.f32 %v1386_v63, %v1387_v10  ;;  %v1398_v49 = vmax.f32 %v1354_v1, %v1397_v32 }
 0x576   :  { %v1411_v39 = vmul.f32 1.442695, %v1403_v33  ;;  %v1372_v42 = vmax.f32 %v1370_v29, %v1371_v34  ;;  %v1382_v60 = vmax.f32 %v1380_v46, %v1381_v36  ;;  %v1392_v14 = vmax.f32 %v1353_v57, %v1391_v6 }
 0x577   :  { %3040 = vpow2.f32 %v1413_v21  ;;  %v1406_v48 = vsub.f32 %v1350_v52, %v1378_v47  ;;  %v1389_v13 = vrot.slane %v1388_v44, 1  ;;  %v1399_v35 = vrot.slane %v1398_v49, 2 }
 0x578   :  { %3042 = vpow2.f32 %v1411_v39  ;;  %v1405_v41 = vsub.f32 %v1349_v58, %v1372_v42  ;;  %v1383_v3 = vrot.slane %v1382_v60, 1  ;;  %v1393_v11 = vrot.slane %v1392_v14, 2 }
 0x579   :  { %v1417_v5 = vmul.f32 1.442695, %v1406_v48  ;;  %v1390_v50 = vmax.f32 %v1388_v44, %v1389_v13  ;;  %v1400_v40 = vmax.f32 %v1398_v49, %v1399_v35 }
 0x57a   :  { %v1415_v18 = vmul.f32 1.442695, %v1405_v41  ;;  %v1384_v54 = vmax.f32 %v1382_v60, %v1383_v3  ;;  %v1394_v56 = vmax.f32 %v1392_v14, %v1393_v11 }
 0x57b   :  { %3044 = vpow2.f32 %v1417_v5  ;;  %v1408_v59 = vsub.f32 %v1352_v12, %v1390_v50  ;;  %v1401_v22 = vrot.slane %v1400_v40, 1 }
 0x57c   :  { %3046 = vpow2.f32 %v1415_v18  ;;  %v1407_v45 = vsub.f32 %v1351_v19, %v1384_v54  ;;  %v1395_v23 = vrot.slane %v1394_v56, 1 }
 0x57d   :  { %v1421_v53 = vmul.f32 1.442695, %v1408_v59  ;;  %v1402_v52 = vmax.f32 %v1400_v40, %v1401_v22 }
 0x57e   :  { %v1419_v24 = vmul.f32 1.442695, %v1407_v45  ;;  %v1396_v25 = vmax.f32 %v1394_v56, %v1395_v23 }
 0x57f   :  { %3048 = vpow2.f32 %v1421_v53  ;;  %v1410_v58 = vsub.f32 %v1354_v1, %v1402_v52 }
 0x580   :  { %3050 = vpow2.f32 %v1419_v24  ;;  %v1409_v26 = vsub.f32 %v1353_v57, %v1396_v25 }
 0x581   :  { %v3694_v63 = vpop.eup %3040  ;;  %v1425_v2 = vmul.f32 1.442695, %v1410_v58 }
 0x582   :  { %v3696_v28 = vpop.eup %3042  ;;  %v1423_v29 = vmul.f32 1.442695, %v1409_v26  ;;  %v1433_v12 = vrot.slane %v3694_v63, 4 }
 0x583   :  { %3052 = vpow2.f32 %v1425_v2  ;;  %v1427_v19 = vrot.slane %v3696_v28, 4 }
 0x584   :  { %3054 = vpow2.f32 %v1423_v29  ;;  %v1434_v46 = vadd.f32 %v3694_v63, %v1433_v12 }
 0x585   :  { %v3701_v31 = vpop.eup %3044  ;;  %v1428_v1 = vadd.f32 %v3696_v28, %v1427_v19 }
 0x586   :  { %v3704_v17 = vpop.eup %3046  ;;  %v1435_v57 = vrot.slane %v1434_v46, 2  ;;  %v1445_v10 = vrot.slane %v3701_v31, 4 }
 0x587   :  { %v1429_v32 = vrot.slane %v1428_v1, 2  ;;  %v1439_v33 = vrot.slane %v3704_v17, 4 }
 0x588   :  { %v1436_v34 = vadd.f32 %v1435_v57, %v1434_v46  ;;  %v1446_v36 = vadd.f32 %v3701_v31, %v1445_v10 }
 0x589   :  { %v3709_v6 = vpop.eup %3048  ;;  %v1430_v21 = vadd.f32 %v1429_v32, %v1428_v1  ;;  %v1440_v47 = vadd.f32 %v3704_v17, %v1439_v33 }
 0x58a   :  { %v3051_v44 = vpop.eup %3050  ;;  %v1437_v49 = vrot.slane %v1436_v34, 1  ;;  %v1447_v39 = vrot.slane %v1446_v36, 2  ;;  %v1457_v42 = vrot.slane %v3709_v6, 4 }
 0x58b   :  { %v1431_v60 = vrot.slane %v1430_v21, 1  ;;  %v1441_v14 = vrot.slane %v1440_v47, 2  ;;  %v1451_v48 = vrot.slane %v3051_v44, 4 }
 0x58c   :  { %v1438_v13 = vadd.f32 %v1437_v49, %v1436_v34  ;;  %v1448_v35 = vadd.f32 %v1447_v39, %v1446_v36  ;;  %v1458_v41 = vadd.f32 %v3709_v6, %v1457_v42 }
 0x58d   :  { %v3053_v3 = vpop.eup %3052  ;;  %v1432_v11 = vadd.f32 %v1431_v60, %v1430_v21  ;;  %v1442_v5 = vadd.f32 %v1441_v14, %v1440_v47  ;;  %v1452_v50 = vadd.f32 %v3051_v44, %v1451_v48 }
 0x58e   :  { %v3055_v40 = vpop.eup %3054  ;;  %3056 = vrcp.f32 %v1438_v13  ;;  %v1449_v18 = vrot.slane %v1448_v35, 1  ;;  %v1459_v54 = vrot.slane %v1458_v41, 2  ;;  %v1469_v56 = vrot.slane %v3053_v3, 4 }
 0x58f   :  { %3058 = vrcp.f32 %v1432_v11  ;;  %v1443_v59 = vrot.slane %v1442_v5, 1  ;;  %v1453_v22 = vrot.slane %v1452_v50, 2  ;;  %v1463_v45 = vrot.slane %v3055_v40, 4 }
 0x590   :  { %v1450_v23 = vadd.f32 %v1449_v18, %v1448_v35  ;;  %v1460_v53 = vadd.f32 %v1459_v54, %v1458_v41  ;;  %v1470_v52 = vadd.f32 %v3053_v3, %v1469_v56  ;;  %v2989_v18 = vld [vmem:[#allocation8 + $0x138] sm:$0xff]   ;;  %v2998_v54 = vld [vmem:[#allocation8 + $0x180] sm:$0xff]   ;;  %v2999_v56 = vld [vmem:[#allocation8 + $0x188] sm:$0xff]  }
 0x591   :  { %v1444_v24 = vadd.f32 %v1443_v59, %v1442_v5  ;;  %v1454_v25 = vadd.f32 %v1453_v22, %v1452_v50  ;;  %v1464_v58 = vadd.f32 %v3055_v40, %v1463_v45  ;;  %v2987_v50 = vld [vmem:[#allocation8 + $0x128] sm:$0xff]   ;;  %v3000_v59 = vld [vmem:[#allocation8 + $0x190] sm:$0xff]   ;;  %v3001_v22 = vld [vmem:[#allocation8 + $0x198] sm:$0xff]  }
 0x592   :  { %3060 = vrcp.f32 %v1450_v23  ;;  %v1461_v26 = vrot.slane %v1460_v53, 1  ;;  %v1471_v2 = vrot.slane %v1470_v52, 2  ;;  %v3002_v45 = vld [vmem:[#allocation8 + $0x1a0] sm:$0xff]   ;;  %v3003_v23 = vld [vmem:[#allocation8 + $0x1a8] sm:$0xff]  }
 0x593   :  { %3062 = vrcp.f32 %v1444_v24  ;;  %v1455_v29 = vrot.slane %v1454_v25, 1  ;;  %v1465_v12 = vrot.slane %v1464_v58, 2  ;;  %v3740_v24 = vld [vmem:[%s3828_s7] sm:$0xff] }
 0x594   :  { %v1462_v19 = vadd.f32 %v1461_v26, %v1460_v53  ;;  %v1472_v46 = vadd.f32 %v1471_v2, %v1470_v52  ;;  %v3004_v53 = vld [vmem:[#allocation8 + $0x1b0] sm:$0xff]   ;;  %v1012_v52 = vsub.s32 6, %v3453_v15 }
 0x595   :  { %v1456_v1 = vadd.f32 %v1455_v29, %v1454_v25  ;;  %v1466_v57 = vadd.f32 %v1465_v12, %v1464_v58 }
 0x596   :  { %3064 = vrcp.f32 %v1462_v19  ;;  %v1473_v10 = vrot.slane %v1472_v46, 1  ;;  %v1013_v25 = vrot.slane %v3740_v24, %v1012_v52 }
 0x597   :  { %3066 = vrcp.f32 %v1456_v1  ;;  %v1467_v32 = vrot.slane %v1466_v57, 1 }
 0x598   :  { %v3057_v33 = vpop.eup %3056  ;;  %v1474_v34 = vadd.f32 %v1473_v10, %v1472_v46  ;;  %v1100_v58 = vadd.f32 %v3673_v9, %v1013_v25  ;;  %v1097_v26 = vadd.f32 %v3667_v30, %v1013_v25  ;;  %v1108_v46 = vadd.f32 %v3670_v61, %v1013_v25 }
 0x599   :  { %v3059_v36 = vpop.eup %3058  ;;  %v1468_v21 = vadd.f32 %v1467_v32, %v1466_v57  ;;  %v1484_v49 = vmul.f32 %v3057_v33, %v3694_v63  ;;  %v1105_v57 = vadd.f32 %v3664_v27, %v1013_v25  ;;  %v1116_v9 = vadd.f32 %v3685_v4, %v1013_v25 }
 0x59a   :  { %v1483_v47 = vmul.f32 %v3059_v36, %v3696_v28  ;;  %3068 = vrcp.f32 %v1474_v34 }
 0x59b   :  { %3070 = vrcp.f32 %v1468_v21 }
 0x59c   :  { %v3061_v39 = vpop.eup %3060  ;;  %2747 = vmatprep.mubr.f32.mxu0 %v1483_v47 }
 0x59d   :  { %v3063_v42 = vpop.eup %3062  ;;  %2748 = vmatmul.mubr.f32.vlgmr.msra.gmra.mrb[24].mxu0 %v1484_v49  ;;  %v1486_v14 = vmul.f32 %v3061_v39, %v3701_v31  ;;  %v2983_v31 = vld [vmem:[#allocation8 + $0x108] sm:$0xff]   ;;  %v1113_v39 = vadd.f32 %v3679_v55, %v1013_v25 }
 0x59e   :  { %v1485_v60 = vmul.f32 %v3063_v42, %v3704_v17  ;;  %v2982_v17 = vld [vmem:[#allocation8 + $0x100] sm:$0xff]   ;;  %2780 = vmatpush3.bf16.msra.mxu0 %v2998_v54 }
 0x59f   :  { %2760 = vmatpush3.bf16.msra.mxu1 %v2982_v17  ;;  %2781 = vmatprep.subr.bf16.mxu0 %v3276_v0 }
 0x5a0   :  { %v3065_v48 = vpop.eup %3064  ;;  %2750 = vmatprep.mubr.f32.mxu0 %v1485_v60  ;;  %2761 = vmatprep.subr.bf16.mxu1 %v3276_v0 }
 0x5a1   :  { %v3067_v13 = vpop.eup %3066  ;;  %2751 = vmatmul.mubr.f32.gmra.mrb[26].mxu0 %v1486_v14  ;;  %v1488_v41 = vmul.f32 %v3065_v48, %v3709_v6  ;;  %v2984_v6 = vld [vmem:[#allocation8 + $0x110] sm:$0xff]  }
 0x5a2   :  { %v1487_v35 = vmul.f32 %v3067_v13, %v3051_v44  ;;  %v2985_v44 = vld [vmem:[#allocation8 + $0x118] sm:$0xff]   ;;  %2782 = vmatpush3.bf16.msra.mxu0 %v2999_v56 }
 0x5a3   :  { %2762 = vmatpush3.bf16.msra.mxu1 %v2983_v31  ;;  %2783 = vmatprep.subr.bf16.mxu0 %v3276_v0 }
 0x5a4   :  { %v3069_v28 = vpop.eup %3068  ;;  %2753 = vmatprep.mubr.f32.mxu0 %v1487_v35  ;;  %2763 = vmatprep.subr.bf16.mxu1 %v3276_v0  ;;  %v1121_v35 = vadd.f32 %v3676_v20, %v1013_v25 }
 0x5a5   :  { %v3071_v11 = vpop.eup %3070  ;;  %2754 = vmatmul.mubr.f32.gmra.mrb[28].mxu0 %v1488_v41  ;;  %v1490_v5 = vmul.f32 %v3069_v28, %v3053_v3  ;;  %v2986_v3 = vld [vmem:[#allocation8 + $0x120] sm:$0xff]  }
 0x5a6   :  { %v1489_v63 = vmul.f32 %v3071_v11, %v3055_v40  ;;  %v2988_v40 = vld [vmem:[#allocation8 + $0x130] sm:$0xff]   ;;  %2784 = vmatpush3.bf16.msra.mxu0 %v3000_v59 }
 0x5a7   :  { %2764 = vmatpush3.bf16.msra.mxu1 %v2984_v6  ;;  %2785 = vmatprep.subr.bf16.mxu0 %v3276_v0 }
 0x5a8   :  { %2756 = vmatprep.mubr.f32.mxu0 %v1489_v63  ;;  %2765 = vmatprep.subr.bf16.mxu1 %v3276_v0  ;;  %v1124_v63 = vadd.f32 %v3682_v62, %v1013_v25 }
 0x5a9   :  { %2757 = vmatmul.mubr.f32.gmra.mrb[30].mxu0 %v1490_v5 }
 0x5aa   :  { %2795 = vmatprep.mubr.msk.bf16.mxu0 %vm3277_vm0, %v3276_v0  ;;  %2786 = vmatpush3.bf16.msra.mxu0 %v3001_v22 }
 0x5ab   :  { %2766 = vmatpush3.bf16.msra.mxu1 %v2985_v44  ;;  %2787 = vmatprep.subr.bf16.mxu0 %v3276_v0 }
 0x5ac   :  { %2767 = vmatprep.subr.bf16.mxu1 %v3276_v0 }
 0x5ae   :  { %2788 = vmatpush3.bf16.msra.mxu0 %v3002_v45 }
 0x5af   :  { %2768 = vmatpush3.bf16.msra.mxu1 %v2986_v3  ;;  %2789 = vmatprep.subr.bf16.mxu0 %v3276_v0 }
 0x5b0   :  { %2769 = vmatprep.subr.bf16.mxu1 %v3276_v0 }
 0x5b2   :  { %2790 = vmatpush3.bf16.msra.mxu0 %v3003_v23 }
 0x5b3   :  { %2770 = vmatpush3.bf16.msra.mxu1 %v2987_v50  ;;  %2791 = vmatprep.subr.bf16.mxu0 %v3276_v0 }
 0x5b4   :  { %2771 = vmatprep.subr.bf16.mxu1 %v3276_v0 }
 0x5b6   :  { %2792 = vmatpush3.bf16.msra.mxu0 %v3004_v53 }
 0x5b7   :  { %2772 = vmatpush3.bf16.msra.mxu1 %v2988_v40  ;;  %2793 = vmatprep.subr.bf16.mxu0 %v3276_v0 }
 0x5b8   :  { %2773 = vmatprep.subr.bf16.mxu1 %v3276_v0 }
 0x5bb   :  { %2774 = vmatpush3.bf16.msra.mxu1 %v2989_v18 }
 0x5bc   :  { %2799 = vmatprep.subr.bf16.mxu1 %v3276_v0 }
 0x670   :  { %v2749_v2 = vpop.f32.mrb[24].mxu0 }
 0x671   :  { %v1613_v29 = vmul.f32 %v2749_v2, %v1100_v58  ;;  %v1573_v12 = vpop.f32.mrb[25].mxu0 }
 0x672   :  { %v1612_v19 = vmul.f32 %v1573_v12, %v1097_v26 }
 0x673   :  { %v1626_v1 = vrot.slane %v1613_v29, 4 }
 0x674   :  { %v1620_v10 = vrot.slane %v1612_v19, 4  ;;  %v2752_v32 = vpop.f32.mrb[26].mxu0 }
 0x675   :  { %v1627_v33 = vadd.f32 %v1626_v1, %v1613_v29  ;;  %v1615_v34 = vmul.f32 %v2752_v32, %v1108_v46  ;;  %v1583_v36 = vpop.f32.mrb[27].mxu0 }
 0x676   :  { %v1621_v21 = vadd.f32 %v1620_v10, %v1612_v19  ;;  %v1614_v47 = vmul.f32 %v1583_v36, %v1105_v57 }
 0x677   :  { %v1628_v49 = vrot.slane %v1627_v33, 2  ;;  %v1638_v30 = vrot.slane %v1615_v34, 4 }
 0x678   :  { %v1622_v42 = vrot.slane %v1621_v21, 2  ;;  %v1632_v60 = vrot.slane %v1614_v47, 4  ;;  %v2755_v14 = vpop.f32.mrb[28].mxu0 }
 0x679   :  { %v1629_v61 = vadd.f32 %v1628_v49, %v1627_v33  ;;  %v1639_v48 = vadd.f32 %v1638_v30, %v1615_v34  ;;  %v1617_v13 = vmul.f32 %v2755_v14, %v1116_v9  ;;  %v1593_v27 = vpop.f32.mrb[29].mxu0 }
 0x67a   :  { %v1623_v41 = vadd.f32 %v1622_v42, %v1621_v21  ;;  %v1633_v28 = vadd.f32 %v1632_v60, %v1614_v47  ;;  %v1616_v11 = vmul.f32 %v1593_v27, %v1113_v39 }
 0x67b   :  { %v1630_v5 = vrot.slane %v1629_v61, 1  ;;  %v1640_v4 = vrot.slane %v1639_v48, 2  ;;  %v1650_v17 = vrot.slane %v1617_v13, 4 }
 0x67c   :  { %v1624_v31 = vrot.slane %v1623_v41, 1  ;;  %v1634_v55 = vrot.slane %v1633_v28, 2  ;;  %v1644_v6 = vrot.slane %v1616_v11, 4  ;;  %v2758_v44 = vpop.f32.mrb[30].mxu0 }
 0x67d   :  { %v1631_v3 = vadd.f32 %v1630_v5, %v1629_v61  ;;  %v1641_v50 = vadd.f32 %v1640_v4, %v1639_v48  ;;  %v1651_v40 = vadd.f32 %v1650_v17, %v1617_v13  ;;  %v1619_v18 = vmul.f32 %v2758_v44, %v1124_v63  ;;  %v1603_v54 = vpop.f32.mrb[31].mxu0 }
 0x67e   :  { %v1625_v56 = vadd.f32 %v1624_v31, %v1623_v41  ;;  %v1635_v20 = vadd.f32 %v1634_v55, %v1633_v28  ;;  %v1645_v59 = vadd.f32 %v1644_v6, %v1616_v11  ;;  %v1618_v22 = vmul.f32 %v1603_v54, %v1121_v35  ;;  %v2991_v54 = vld [vmem:[#allocation8 + $0x148] sm:$0xff]  }
 0x67f   :  { %v1669_v45 = vpack.c.bf16 %v1631_v3, %v1631_v3  ;;  %v1642_v23 = vrot.slane %v1641_v50, 1  ;;  %v1652_v62 = vrot.slane %v1651_v40, 2  ;;  %v1662_v53 = vrot.slane %v1619_v18, 4 }
 0x680   :  { %v1668_v52 = vpack.c.bf16 %v1625_v56, %v1625_v56  ;;  %v1636_v25 = vrot.slane %v1635_v20, 1  ;;  %v1646_v58 = vrot.slane %v1645_v59, 2  ;;  %v1656_v26 = vrot.slane %v1618_v22, 4  ;;  %v2992_v56 = vld [vmem:[#allocation8 + $0x150] sm:$0xff]  }
 0x681   :  { %v1689_v2 = vunpack.c.l.b16 %v1669_v45  ;;  %v1643_v29 = vadd.f32 %v1642_v23, %v1641_v50  ;;  %v1653_v12 = vadd.f32 %v1652_v62, %v1651_v40  ;;  %v1663_v19 = vadd.f32 %v1662_v53, %v1619_v18  ;;  %v2990_v40 = vld [vmem:[#allocation8 + $0x140] sm:$0xff]   ;;  %v2996_v45 = vld [vmem:[#allocation8 + $0x170] sm:$0xff]   ;;  %v2997_v23 = vld [vmem:[#allocation8 + $0x178] sm:$0xff]  }
 0x682   :  { %v1688_v46 = vunpack.c.l.b16 %v1668_v52  ;;  %v1637_v1 = vadd.f32 %v1636_v25, %v1635_v20  ;;  %v1647_v57 = vadd.f32 %v1646_v58, %v1645_v59  ;;  %v1657_v10 = vadd.f32 %v1656_v26, %v1618_v22  ;;  %v2993_v20 = vld [vmem:[#allocation8 + $0x158] sm:$0xff]   ;;  %v2994_v59 = vld [vmem:[#allocation8 + $0x160] sm:$0xff]   ;;  %v2995_v22 = vld [vmem:[#allocation8 + $0x168] sm:$0xff]  }
 0x683   :  { %v1671_v32 = vpack.c.bf16 %v1643_v29, %v1643_v29  ;;  %v1654_v33 = vrot.slane %v1653_v12, 1  ;;  %v1664_v34 = vrot.slane %v1663_v19, 2  ;;  %v3005_v62 = vld [vmem:[#allocation8 + $0x1b8] sm:$0xff]   ;;  %v1678_v53 = vsub.s32 7, %v3453_v15 }
 0x684   :  { %v1697_v36 = vsel %vm1696_vm1, %v1689_v2, %v1688_v46  ;;  %v1670_v21 = vpack.c.bf16 %v1637_v1, %v1637_v1  ;;  %v1648_v47 = vrot.slane %v1647_v57, 1  ;;  %v1658_v9 = vrot.slane %v1657_v10, 2  ;;  %2794 = vmatpush3.bf16.msra.mxu0 %v3005_v62  ;;  %v3017_v62 = vld [vmem:[#allocation10 + $0x18] sm:$0xff]  }
 0x685   :  { %v1655_v49 = vadd.f32 %v1654_v33, %v1653_v12  ;;  %v1665_v30 = vadd.f32 %v1664_v34, %v1663_v19  ;;  %v1691_v14 = vunpack.c.l.b16 %v1671_v32  ;;  %2819 = vmatprep.subr.bf16.mxu0 %v3276_v0  ;;  %v1679_v52 = vrot.slane %v3740_v24, %v1678_v53  ;;  %v3018_v53 = vld [vmem:[#allocation10 + $0x20] sm:$0xff]  }
 0x686   :  { %v1690_v39 = vunpack.c.l.b16 %v1670_v21  ;;  %v1649_v42 = vadd.f32 %v1648_v47, %v1647_v57  ;;  %v1659_v60 = vadd.f32 %v1658_v9, %v1657_v10  ;;  %v3773_v57 = vld [vmem:[%s3828_s7 + $0x8] sm:$0xff]  ;;  %v3006_v47 = vld [vmem:[#allocation8 + $0x1c0] sm:$0xff]  }
 0x687   :  { %v1673_v61 = vpack.c.bf16 %v1655_v49, %v1655_v49  ;;  %v1666_v48 = vrot.slane %v1665_v30, 1  ;;  %v1980_v24 = vrot.slane %v3773_v57, %v3456_v16  ;;  %v3008_v16 = vld [vmem:[#allocation8 + $0x1d0] sm:$0xff]  }
 0x688   :  { %v1699_v13 = vsel %vm1698_vm2, %v1690_v39, %v1697_v36  ;;  %v1672_v27 = vpack.c.bf16 %v1649_v42, %v1649_v42  ;;  %v1660_v35 = vrot.slane %v1659_v60, 1  ;;  %v3007_v42 = vld [vmem:[#allocation8 + $0x1c8] sm:$0xff]  }
 0x689   :  { %v1701_v41 = vsel %vm1700_vm3, %v1691_v14, %v1699_v13  ;;  %v1667_v28 = vadd.f32 %v1666_v48, %v1665_v30  ;;  %v1693_v5 = vunpack.c.l.b16 %v1673_v61  ;;  %v3010_v14 = vld [vmem:[#allocation8 + $0x1e0] sm:$0xff]   ;;  %v3011_v61 = vld [vmem:[#allocation8 + $0x1e8] sm:$0xff]   ;;  %v3012_v48 = vld [vmem:[#allocation8 + $0x1f0] sm:$0xff]  }
 0x68a   :  { %v1692_v11 = vunpack.c.l.b16 %v1672_v27  ;;  %v1661_v63 = vadd.f32 %v1660_v35, %v1659_v60  ;;  %v3009_v60 = vld [vmem:[#allocation8 + $0x1d8] sm:$0xff]  }
 0x68b   :  { %v1675_v4 = vpack.c.bf16 %v1667_v28, %v1667_v28  ;;  %v3013_v13 = vld [vmem:[#allocation8 + $0x1f8] sm:$0xff]  }
 0x68c   :  { %v1703_v17 = vsel %vm1702_vm4, %v1692_v11, %v1701_v41  ;;  %v1674_v31 = vpack.c.bf16 %v1661_v63, %v1661_v63 }
 0x68d   :  { %v1705_v55 = vsel %vm1704_vm5, %v1693_v5, %v1703_v17  ;;  %v1695_v44 = vunpack.c.l.b16 %v1675_v4  ;;  %v1999_v5 = vrot.slane %v3773_v57, %v400_v37 }
 0x68e   :  { %v1694_v6 = vunpack.c.l.b16 %v1674_v31  ;;  %v2004_v31 = vrot.slane %v3773_v57, %v405_v38 }
 0x690   :  { %v1707_v3 = vsel %vm1706_vm6, %v1694_v6, %v1705_v55 }
 0x691   :  { %v1709_v50 = vsel %vm1708_vm7, %v1695_v44, %v1707_v3 }
 0x692   :  { %v1710_v18 = vpack.c.b16 %v1709_v50, %v1709_v50  ;;  %v2011_v50 = vrot.slane %v3773_v57, %v412_v43  ;;  %v3016_v43 = vld [vmem:[#allocation10 + $0x10] sm:$0xff]  }
 0x694   :  { %2776 = vmatmul.mubr.bf16.vlgmr.msra.gmra.mrb[28].mxu1 %v1710_v18 }
 0x695   :  { %2800 = vmatpush3.bf16.msra.mxu1 %v2990_v40  ;;  %2815 = vmatprep.mubr.msk.bf16.mxu1 %vm3277_vm0, %v3276_v0 }
 0x696   :  { %2801 = vmatprep.subr.bf16.mxu1 %v3276_v0 }
 0x699   :  { %2802 = vmatpush3.bf16.msra.mxu1 %v2991_v54 }
 0x69a   :  { %2803 = vmatprep.subr.bf16.mxu1 %v3276_v0 }
 0x69d   :  { %2804 = vmatpush3.bf16.msra.mxu1 %v2992_v56 }
 0x69e   :  { %2805 = vmatprep.subr.bf16.mxu1 %v3276_v0 }
 0x6a1   :  { %2806 = vmatpush3.bf16.msra.mxu1 %v2993_v20  ;;  %v3014_v20 = vld [vmem:[#allocation10] sm:$0xff]  }
 0x6a2   :  { %2807 = vmatprep.subr.bf16.mxu1 %v3276_v0 }
 0x6a5   :  { %2808 = vmatpush3.bf16.msra.mxu1 %v2994_v59 }
 0x6a6   :  { %2809 = vmatprep.subr.bf16.mxu1 %v3276_v0 }
 0x6a9   :  { %2810 = vmatpush3.bf16.msra.mxu1 %v2995_v22 }
 0x6aa   :  { %2811 = vmatprep.subr.bf16.mxu1 %v3276_v0 }
 0x6ad   :  { %2812 = vmatpush3.bf16.msra.mxu1 %v2996_v45 }
 0x6ae   :  { %2813 = vmatprep.subr.bf16.mxu1 %v3276_v0 }
 0x6b1   :  { %2814 = vmatpush3.bf16.msra.mxu1 %v2997_v23  ;;  %v3015_v23 = vld [vmem:[#allocation10 + $0x8] sm:$0xff]  }
 0x6b2   :  { %2839 = vmatprep.subr.bf16.mxu1 %v3276_v0 }
 0x6b4   :  { %2816 = vmatmul.mubr.bf16.vlgmr.msra.gmra.mrb[32].mxu1 %v3651_v7 }
 0x6b5   :  { %2855 = vmatprep.mubr.msk.bf16.mxu1 %vm3277_vm0, %v3276_v0  ;;  %2840 = vmatpush3.bf16.msra.mxu1 %v3014_v20 }
 0x6b6   :  { %2841 = vmatprep.subr.bf16.mxu1 %v3276_v0 }
 0x6b9   :  { %2842 = vmatpush3.bf16.msra.mxu1 %v3015_v23 }
 0x6ba   :  { %2843 = vmatprep.subr.bf16.mxu1 %v3276_v0 }
 0x6bd   :  { %2844 = vmatpush3.bf16.msra.mxu1 %v3016_v43 }
 0x6be   :  { %2845 = vmatprep.subr.bf16.mxu1 %v3276_v0 }
 0x6c1   :  { %2846 = vmatpush3.bf16.msra.mxu1 %v3017_v62 }
 0x6c2   :  { %2847 = vmatprep.subr.bf16.mxu1 %v3276_v0 }
 0x6c5   :  { %2848 = vmatpush3.bf16.msra.mxu1 %v3018_v53 }
 0x6c6   :  { %2849 = vmatprep.subr.bf16.mxu1 %v3276_v0 }
 0x767   :  { %v1794_v25 = vpop.f32.mrb[28].mxu1 }
 0x768   :  { %v1795_v58 = vadd.f32 %v1794_v25, %v1679_v52  ;;  %v2777_v26 = vpop.f32.mrb[29].mxu1  ;;  %v3019_v52 = vld [vmem:[#allocation10 + $0x28] sm:$0xff]   ;;  %v3020_v25 = vld [vmem:[#allocation10 + $0x30] sm:$0xff]  }
 0x769   :  { %v1797_v2 = vpop.f32.mrb[30].mxu1  ;;  %2850 = vmatpush3.bf16.msra.mxu1 %v3019_v52 }
 0x76a   :  { %v1800_v29 = vpack.c.bf16 %v1795_v58, %v1795_v58  ;;  %v2778_v12 = vpop.f32.mrb[31].mxu1  ;;  %2851 = vmatprep.subr.bf16.mxu1 %v3276_v0  ;;  %v3021_v58 = vld [vmem:[#allocation10 + $0x38] sm:$0xff]  }
 0x76c   :  { %2796 = vmatmul.mubr.bf16.vlgmr.msra.gmra.mrb[32].mxu0 %v1800_v29 }
 0x76d   :  { %2835 = vmatprep.mubr.msk.bf16.mxu0 %vm3277_vm0, %v3276_v0  ;;  %2820 = vmatpush3.bf16.msra.mxu0 %v3006_v47 }
 0x76e   :  { %2821 = vmatprep.subr.bf16.mxu0 %v3276_v0  ;;  %2852 = vmatpush3.bf16.msra.mxu1 %v3020_v25 }
 0x76f   :  { %2853 = vmatprep.subr.bf16.mxu1 %v3276_v0 }
 0x771   :  { %2822 = vmatpush3.bf16.msra.mxu0 %v3007_v42 }
 0x772   :  { %2823 = vmatprep.subr.bf16.mxu0 %v3276_v0  ;;  %2854 = vmatpush3.bf16.msra.mxu1 %v3021_v58 }
 0x775   :  { %2824 = vmatpush3.bf16.msra.mxu0 %v3008_v16 }
 0x776   :  { %2825 = vmatprep.subr.bf16.mxu0 %v3276_v0 }
 0x779   :  { %2826 = vmatpush3.bf16.msra.mxu0 %v3009_v60 }
 0x77a   :  { %2827 = vmatprep.subr.bf16.mxu0 %v3276_v0 }
 0x77d   :  { %2828 = vmatpush3.bf16.msra.mxu0 %v3010_v14 }
 0x77e   :  { %2829 = vmatprep.subr.bf16.mxu0 %v3276_v0 }
 0x781   :  { %2830 = vmatpush3.bf16.msra.mxu0 %v3011_v61 }
 0x782   :  { %2831 = vmatprep.subr.bf16.mxu0 %v3276_v0 }
 0x785   :  { %2832 = vmatpush3.bf16.msra.mxu0 %v3012_v48 }
 0x786   :  { %2833 = vmatprep.subr.bf16.mxu0 %v3276_v0 }
 0x787   :  { %v1971_v7 = vpop.f32.mrb[32].mxu1 }
 0x788   :  { %v2817_v19 = vpop.f32.mrb[33].mxu1 }
 0x789   :  { %v1974_v46 = vpop.f32.mrb[34].mxu1  ;;  %2834 = vmatpush3.bf16.msra.mxu0 %v3013_v13 }
 0x78a   :  { %v2818_v1 = vpop.f32.mrb[35].mxu1  ;;  %v2117_v46 = vrot.slane %v3773_v57, %v799_v8 }
 0x83f   :  { %v1883_v10 = vpop.f32.mrb[32].mxu0 }
 0x840   :  { %v1972_v32 = vadd.f32 %v1971_v7, %v1883_v10  ;;  %v2797_v33 = vpop.f32.mrb[33].mxu0  ;;  %v2122_v10 = vrot.slane %v3773_v57, %v895_v51 }
 0x841   :  { %v1886_v34 = vpop.f32.mrb[34].mxu0 }
 0x842   :  { %v2798_v36 = vpop.f32.mrb[35].mxu0  ;;  %v1981_v21 = vadd.f32 %v1980_v24, %v1972_v32 }
 0x843   :  { %v2338_v36 = vld [vmem:[%s3829_s8] ss:$0 sm:$0xff] }
 0x844   :  { %1982 = vadd.xlane.f32.xlu0 %v1981_v21 }
 0x8d1   :  { %v1983_v9 = vpop.xlane.xlu0 %1982 }
 0x8d2   :  { %v1984_v49 = vmul.f32 0.03125, %v1983_v9 }
 0x8d4   :  { %v1985_v30 = vsub.f32 %v1981_v21, %v1984_v49  ;;  %v1989_v27 = vmul.f32 96.0, %v1984_v49 }
 0x8d6   :  { %v1986_v39 = vmul.f32 %v1985_v30, %v1985_v30  ;;  %v1990_v35 = vmul.f32 %v1989_v27, %v1984_v49 }
 0x8d8   :  { %1987 = vadd.xlane.f32.xlu1 %v1986_v39 }
 0x965   :  { %v1988_v41 = vpop.xlane.xlu1 %1987 }
 0x966   :  { %v1991_v28 = vsub.f32 %v1988_v41, %v1990_v35 }
 0x968   :  { %v1992_v11 = vmul.f32 0.03125, %v1991_v28 }
 0x96a   :  { %v1993_v63 = vadd.f32 1e-05, %v1992_v11 }
 0x96c   :  { %3072 = vrsqrt.f32 %v1993_v63 }
 0x976   :  { %v3073_v4 = vpop.eup %3072 }
 0x977   :  { %v1995_v17 = vmul.f32 %v3073_v4, %v1985_v30 }
 0x979   :  { %v2000_v55 = vmul.f32 %v1999_v5, %v1995_v17 }
 0x97b   :  { %v2005_v6 = vadd.f32 %v2004_v31, %v2000_v55 }
 0x97d   :  { %v2006_v44 = vmax.f32 %v2005_v6, 0.0 }
 0x97f   :  { %v2007_v3 = vpack.c.bf16 %v2006_v44, %v2006_v44 }
 0x981   :  { %2836 = vmatmul.mubr.bf16.vlgmr.msra.gmra.mrb[36].mxu0 %v2007_v3 }
 0xa54   :  { %v2094_v40 = vpop.f32.mrb[36].mxu0 }
 0xa55   :  { %v2095_v18 = vadd.f32 %v2094_v40, %v2011_v50  ;;  %v2837_v54 = vpop.f32.mrb[37].mxu0 }
 0xa56   :  { %v2097_v56 = vpop.f32.mrb[38].mxu0 }
 0xa57   :  { %2100 = vadd.xlane.f32.xlu0 %v2095_v18  ;;  %v2838_v37 = vpop.f32.mrb[39].mxu0 }
 0xae4   :  { %v2101_v38 = vpop.xlane.xlu0 %2100 }
 0xae5   :  { %v2102_v59 = vmul.f32 0.03125, %v2101_v38 }
 0xae7   :  { %v2103_v22 = vsub.f32 %v2095_v18, %v2102_v59  ;;  %v2107_v26 = vmul.f32 96.0, %v2102_v59 }
 0xae9   :  { %v2104_v45 = vmul.f32 %v2103_v22, %v2103_v22  ;;  %v2108_v2 = vmul.f32 %v2107_v26, %v2102_v59 }
 0xaeb   :  { %2105 = vadd.xlane.f32.xlu1 %v2104_v45 }
 0xb78   :  { %v2106_v29 = vpop.xlane.xlu1 %2105 }
 0xb79   :  { %v2109_v12 = vsub.f32 %v2106_v29, %v2108_v2 }
 0xb7b   :  { %v2110_v7 = vmul.f32 0.03125, %v2109_v12 }
 0xb7d   :  { %v2111_v19 = vadd.f32 1e-05, %v2110_v7 }
 0xb7f   :  { %3074 = vrsqrt.f32 %v2111_v19 }
 0xb89   :  { %v3075_v1 = vpop.eup %3074 }
 0xb8a   :  { %v2113_v24 = vmul.f32 %v3075_v1, %v2103_v22 }
 0xb8c   :  { %v2118_v32 = vmul.f32 %v2117_v46, %v2113_v24 }
 0xb8e   :  { %v2123_v0 = vadd.f32 %v2122_v10, %v2118_v32 }
 0xb90   :  { %v2124_v33 = vmax.f32 %v2123_v0, 0.0 }
 0xb92   :  { %v2141_v34 = vpack.c.bf16 %v2124_v33, %v2124_v33 }
 0xb94   :  { %2856 = vmatmul.mubr.bf16.vlgmr.msra.gmra.mrb[36].mxu1 %v2141_v34 }
 0xc67   :  { %v2231_v21 = vpop.f32.mrb[36].mxu1 }
 0xc68   :  { %v2232_v47 = vadd.f32 %v2338_v36, %v2231_v21  ;;  %v2857_v9 = vpop.f32.mrb[37].mxu1 }
 0xc69   :  { %v2234_v49 = vpop.f32.mrb[38].mxu1 }
 0xc6a   :  { %v2858_v8 = vpop.f32.mrb[39].mxu1  ;;  %v2237_v30 = vmul.f32 %v2232_v47, %v2232_v47 }
 0xc6c   :  { %2238 = vadd.xlane.f32.xlu0 %v2237_v30 }
 0xcf9   :  { %v2239_v39 = vpop.xlane.xlu0 %2238 }
 0xcfa   :  { %v2240_v15 = vadd.f32 1e-12, %v2239_v39 }
 0xcfc   :  { %3076 = vrsqrt.f32 %v2240_v15 }
 0xd06   :  { %v3077_v51 = vpop.eup %3076 }
 0xd07   :  { %v2242_v57 = vmul.f32 %v3077_v51, %v2232_v47 }
 0xd09   :  { %2243 = vst [vmem:[#allocation14] sm:$0xff] %v2242_v57 }
 0xd0a   :  { %3244 = shalt.err (!%p3241_p4)
}
 0xd0b   :  { %s3245_s27 = scalar_lea.hbm %s3831_s10, 128 }
 0xd0c   :  { %p3246_p5 = scmp.ne.s32.totalorder %s3831_s10, %s3245_s27  ;;  %p3249_p6 = scmp.lt.u32.totalorder %s3245_s27, %s3831_s10 }
 0xd0e   :  { %p3251_p7 = pnand %p3249_p6, %p3246_p5 }
 0xd10   :  { %3254 = shalt.err (!%p3251_p7)
}
 0xd11   :  { %2253 = dma.vmem_to_hbm [thread:$0]  %s2251_s5, 128, %s3831_s10, [#allocation4]  }
 0xd12   :  { %3263 = dma.done.wait [#allocation4], 128  }
 0xd13   :  { %3264 = vsyncadd [#allocation4], 4294967168 }
 0xd14   :  { %2257 = vsyncpa [#allocation3], 1 }
 0xd15   :  { %2258 = vsyncpa [#allocation6], 1 }
 0xd16   :  { %2259 = vsyncpa [#allocation9], 1 }
 0xd17   :  { %2260 = vsyncpa [#allocation12], 1 }
 0xd18   :  { %2261 = vsyncpa [#allocation4], 1 }

// kernel: tpu_custom_call.1
= control target key start
LH: loop header
LB: loop body
LE: loop exit
PB: predicated region body
PF: predicated region fallthrough
CT: control target
= control target key end

     0   :  { %15 = vsyncpa [#allocation3], 0  ;;  %s3821_s0 = inlined_call_operand.hbm [shape: bf16[8,128], index: 0, kind: input, shape index: {}]   ;;  %s3822_s1 = inlined_call_operand.hbm [shape: bf16[8,8,128], index: 1, kind: input, shape index: {}]   ;;  %s3823_s2 = inlined_call_operand.hbm [shape: bf16[128,128], index: 2, kind: input, shape index: {}]   ;;  %s3824_s3 = inlined_call_operand.hbm [shape: bf16[8,128,128], index: 3, kind: input, shape index: {}]   ;;  %s3825_s4 = inlined_call_operand.hbm [shape: bf16[128,128], index: 4, kind: input, shape index: {}]   ;;  %s3826_s5 = inlined_call_operand.hbm [shape: f32[128,128], index: 5, kind: input, shape index: {}]   ;;  %s3827_s6 = inlined_call_operand.hbm [shape: f32[128,128], index: 6, kind: input, shape index: {}]   ;;  %s3828_s7 = inlined_call_operand.vmem [shape: f32[16,128], index: 7, kind: input, shape index: {}]   ;;  %s3829_s8 = inlined_call_operand.vmem [shape: f32[1,128], index: 8, kind: input, shape index: {}]   ;;  %s3830_s9 = inlined_call_operand.vmem [shape: f32[1,8,128], index: 9, kind: input, shape index: {}]   ;;  %s3831_s10 = inlined_call_operand.hbm [shape: f32[8,128], index: 10, kind: output, shape index: {}]  }
   0x1   :  { %16 = vsyncpa [#allocation6], 0 }
   0x2   :  { %17 = vsyncpa [#allocation9], 0 }
   0x3   :  { %18 = vsyncpa [#allocation12], 0 }
   0x4   :  { %19 = vsyncpa [#allocation4], 0  ;;  %s3265_s13 = smov [#allocation5]   ;;  %s3079_s17 = scalar_lea.hbm %s3822_s1, 512 }
   0x5   :  { %s35_s14 = sshll.u32 %s3265_s13, 4  ;;  %p3080_p0 = scmp.ne.s32.totalorder %s3822_s1, %s3079_s17  ;;  %s36_s14 = int_to_ptr.vmem [resolvable:$true] %s35_s14 }
   0x6   :  { %p3083_p1 = scmp.lt.u32.totalorder %s3079_s17, %s3822_s1 }
   0x8   :  { %p3085_p2 = pnand %p3083_p1, %p3080_p0 }
   0xa   :  { %3088 = shalt.err (!%p3085_p2)
}
   0xb   :  { %s3089_s22 = scalar_lea.vmem %s36_s14, 512  ;;  %p3094_p4 = scmp.lt.s32.totalorder %s36_s14, %s36_s14 }
   0xc   :  { %p3090_p3 = scmp.ne.s32.totalorder %s36_s14, %s3089_s22  ;;  %p3095_p5 = scmp.lt.s32.totalorder %s3089_s22, %s3089_s22 }
   0xe   :  { %p3096_p6 = por %p3095_p5, %p3094_p4 }
  0x10   :  { %p3097_p7 = pnand %p3096_p6, %p3090_p3 }
  0x12   :  { %3100 = shalt.err (!%p3097_p7)
}
  0x13   :  { %s3266_s23 = smov 64   ;;  %s3267_s24 = smov 4  }
  0x14   :  { %41 = dma.hbm_to_vmem [thread:$0]  %s3822_s1, 512, %s36_s14, [#allocation6], %s3266_s23, %s3266_s23, %s3267_s24  }
  0x15   :  { %s3268_s27 = smov [#allocation8]   ;;  %s3269_s29 = smov [#allocation11]  }
  0x16   :  { %s59_s28 = sshll.u32 %s3268_s27, 4  ;;  %s83_s30 = sshll.u32 %s3269_s29, 4  ;;  %s60_s28 = int_to_ptr.vmem [resolvable:$true] %s59_s28  ;;  %s84_s30 = int_to_ptr.vmem [resolvable:$true] %s83_s30 }
  0x17   :  { %s3101_s13 = scalar_lea.hbm %s3824_s3, 8192 }
  0x18   :  { %p3102_p8 = scmp.ne.s32.totalorder %s3824_s3, %s3101_s13  ;;  %p3105_p9 = scmp.lt.u32.totalorder %s3101_s13, %s3824_s3 }
  0x1a   :  { %p3107_p10 = pnand %p3105_p9, %p3102_p8 }
  0x1c   :  { %3110 = shalt.err (!%p3107_p10)
}
  0x1d   :  { %s3111_s1 = scalar_lea.vmem %s60_s28, 8192  ;;  %p3116_p12 = scmp.lt.s32.totalorder %s60_s28, %s60_s28 }
  0x1e   :  { %p3112_p11 = scmp.ne.s32.totalorder %s60_s28, %s3111_s1  ;;  %p3117_p13 = scmp.lt.s32.totalorder %s3111_s1, %s3111_s1 }
  0x20   :  { %p3118_p0 = por %p3117_p13, %p3116_p12 }
  0x22   :  { %p3119_p1 = pnand %p3118_p0, %p3112_p11 }
  0x24   :  { %3122 = shalt.err (!%p3119_p1)
}
  0x25   :  { %65 = dma.hbm_to_vmem [thread:$0]  %s3824_s3, 8192, %s60_s28, [#allocation9], %s3266_s23, %s3266_s23, %s3267_s24  }
  0x26   :  { %s3123_s22 = scalar_lea.hbm %s3826_s5, 2048 }
  0x27   :  { %p3124_p2 = scmp.ne.s32.totalorder %s3826_s5, %s3123_s22  ;;  %p3127_p3 = scmp.lt.u32.totalorder %s3123_s22, %s3826_s5 }
  0x29   :  { %p3129_p4 = pnand %p3127_p3, %p3124_p2 }
  0x2b   :  { %3132 = shalt.err (!%p3129_p4)
}
  0x2c   :  { %s3133_s11 = scalar_lea.vmem %s84_s30, 2048  ;;  %p3138_p6 = scmp.lt.s32.totalorder %s84_s30, %s84_s30 }
  0x2d   :  { %p3134_p5 = scmp.ne.s32.totalorder %s84_s30, %s3133_s11  ;;  %p3139_p7 = scmp.lt.s32.totalorder %s3133_s11, %s3133_s11 }
  0x2f   :  { %p3140_p8 = por %p3139_p7, %p3138_p6 }
  0x31   :  { %p3141_p9 = pnand %p3140_p8, %p3134_p5 }
  0x33   :  { %3144 = shalt.err (!%p3141_p9)
}
  0x34   :  { %s3270_s3 = smov 128   ;;  %s3271_s28 = smov 8  }
  0x35   :  { %89 = dma.hbm_to_vmem [thread:$0]  %s3826_s5, 2048, %s84_s30, [#allocation12], %s3270_s3, %s3270_s3, %s3271_s28  }
  0x36   :  { %s3272_s15 = smov [#allocation2]   ;;  %s3273_s17 = smov [#allocation7]  }
  0x37   :  { %s26_s16 = sshll.u32 %s3272_s15, 4  ;;  %s47_s18 = sshll.u32 %s3273_s17, 4  ;;  %s27_s16 = int_to_ptr.vmem [resolvable:$true] %s26_s16  ;;  %s48_s18 = int_to_ptr.vmem [resolvable:$true] %s47_s18 }
  0x38   :  { %s3145_s19 = scalar_lea.hbm %s3821_s0, 64 }
  0x39   :  { %p3146_p10 = scmp.ne.s32.totalorder %s3821_s0, %s3145_s19  ;;  %p3149_p11 = scmp.lt.u32.totalorder %s3145_s19, %s3821_s0 }
  0x3b   :  { %p3151_p12 = pnand %p3149_p11, %p3146_p10 }
  0x3d   :  { %3154 = shalt.err (!%p3151_p12)
}
  0x3e   :  { %s3155_s5 = scalar_lea.vmem %s27_s16, 64  ;;  %p3160_p0 = scmp.lt.s32.totalorder %s27_s16, %s27_s16 }
  0x3f   :  { %p3156_p13 = scmp.ne.s32.totalorder %s27_s16, %s3155_s5  ;;  %p3161_p1 = scmp.lt.s32.totalorder %s3155_s5, %s3155_s5 }
  0x41   :  { %p3162_p2 = por %p3161_p1, %p3160_p0 }
  0x43   :  { %p3163_p3 = pnand %p3162_p2, %p3156_p13 }
  0x45   :  { %3166 = shalt.err (!%p3163_p3)
}
  0x46   :  { %29 = dma.hbm_to_vmem [thread:$0]  %s3821_s0, 64, %s27_s16, [#allocation3]  }
  0x47   :  { %s3167_s11 = scalar_lea.hbm %s3823_s2, 1024 }
  0x48   :  { %p3168_p4 = scmp.ne.s32.totalorder %s3823_s2, %s3167_s11  ;;  %p3171_p5 = scmp.lt.u32.totalorder %s3167_s11, %s3823_s2 }
  0x4a   :  { %p3173_p6 = pnand %p3171_p5, %p3168_p4 }
  0x4c   :  { %3176 = shalt.err (!%p3173_p6)
}
  0x4d   :  { %s3177_s1 = scalar_lea.vmem %s48_s18, 1024  ;;  %p3182_p8 = scmp.lt.s32.totalorder %s48_s18, %s48_s18 }
  0x4e   :  { %p3178_p7 = scmp.ne.s32.totalorder %s48_s18, %s3177_s1  ;;  %p3183_p9 = scmp.lt.s32.totalorder %s3177_s1, %s3177_s1 }
  0x50   :  { %p3184_p10 = por %p3183_p9, %p3182_p8 }
  0x52   :  { %p3185_p11 = pnand %p3184_p10, %p3178_p7 }
  0x54   :  { %3188 = shalt.err (!%p3185_p11)
}
  0x55   :  { %53 = dma.hbm_to_vmem [thread:$0]  %s3823_s2, 1024, %s48_s18, [#allocation6], %s3266_s23, %s3266_s23, %s3267_s24  }
  0x56   :  { %s3274_s14 = smov [#allocation10]   ;;  %s3275_s20 = smov [#allocation13]  }
  0x57   :  { %s71_s19 = sshll.u32 %s3274_s14, 4  ;;  %s95_s21 = sshll.u32 %s3275_s20, 4  ;;  %s72_s19 = int_to_ptr.vmem [resolvable:$true] %s71_s19  ;;  %s96_s21 = int_to_ptr.vmem [resolvable:$true] %s95_s21 }
  0x58   :  { %s3189_s5 = scalar_lea.hbm %s3825_s4, 1024 }
  0x59   :  { %p3190_p12 = scmp.ne.s32.totalorder %s3825_s4, %s3189_s5  ;;  %p3193_p13 = scmp.lt.u32.totalorder %s3189_s5, %s3825_s4 }
  0x5b   :  { %p3195_p0 = pnand %p3193_p13, %p3190_p12 }
  0x5d   :  { %3198 = shalt.err (!%p3195_p0)
}
  0x5e   :  { %s3199_s2 = scalar_lea.vmem %s72_s19, 1024  ;;  %p3204_p2 = scmp.lt.s32.totalorder %s72_s19, %s72_s19 }
  0x5f   :  { %p3200_p1 = scmp.ne.s32.totalorder %s72_s19, %s3199_s2  ;;  %p3205_p3 = scmp.lt.s32.totalorder %s3199_s2, %s3199_s2 }
  0x61   :  { %p3206_p4 = por %p3205_p3, %p3204_p2 }
  0x63   :  { %p3207_p5 = pnand %p3206_p4, %p3200_p1 }
  0x65   :  { %3210 = shalt.err (!%p3207_p5)
}
  0x66   :  { %77 = dma.hbm_to_vmem [thread:$0]  %s3825_s4, 1024, %s72_s19, [#allocation9], %s3266_s23, %s3266_s23, %s3267_s24  }
  0x67   :  { %s3211_s15 = scalar_lea.hbm %s3827_s6, 2048 }
  0x68   :  { %p3212_p6 = scmp.ne.s32.totalorder %s3827_s6, %s3211_s15  ;;  %p3215_p7 = scmp.lt.u32.totalorder %s3211_s15, %s3827_s6 }
  0x6a   :  { %p3217_p8 = pnand %p3215_p7, %p3212_p6 }
  0x6c   :  { %3220 = shalt.err (!%p3217_p8)
}
  0x6d   :  { %s3221_s14 = scalar_lea.vmem %s96_s21, 2048  ;;  %p3226_p10 = scmp.lt.s32.totalorder %s96_s21, %s96_s21 }
  0x6e   :  { %p3222_p9 = scmp.ne.s32.totalorder %s96_s21, %s3221_s14  ;;  %p3227_p11 = scmp.lt.s32.totalorder %s3221_s14, %s3221_s14 }
  0x70   :  { %p3228_p12 = por %p3227_p11, %p3226_p10 }
  0x72   :  { %p3229_p13 = pnand %p3228_p12, %p3222_p9 }
  0x74   :  { %3232 = shalt.err (!%p3229_p13)
}
  0x75   :  { %101 = dma.hbm_to_vmem [thread:$0]  %s3827_s6, 2048, %s96_s21, [#allocation12], %s3270_s3, %s3270_s3, %s3271_s28  }
  0x76   :  { %3255 = dma.done.wait [#allocation3], 64  }
  0x77   :  { %3256 = vsyncadd [#allocation3], 4294967232 }
  0x78   :  { %3257 = dma.done.wait [#allocation6], 1536  }
  0x79   :  { %3258 = vsyncadd [#allocation6], 4294965760 }
  0x7a   :  { %3259 = dma.done.wait [#allocation9], 9216  }
  0x7b   :  { %3260 = vsyncadd [#allocation9], 4294958080 }
  0x7c   :  { %3261 = dma.done.wait [#allocation12], 4096  }
  0x7d   :  { %3262 = vsyncadd [#allocation12], 4294963200  ;;  %v3276_v0 = vmov 0.0   ;;  %vm3277_vm0 = vmmov 0   ;;  %v2938_v1 = vld [vmem:[#allocation7] sm:$0xff]   ;;  %v2939_v2 = vld [vmem:[#allocation7 + $0x8] sm:$0xff]   ;;  %v292_v14 = vlaneseq }
  0x7e   :  { %2515 = vmatprep.subr.bf16.mxu0 %v3276_v0  ;;  %2531 = vmatprep.mubr.msk.bf16.mxu0 %vm3277_vm0, %v3276_v0  ;;  %v2940_v3 = vld [vmem:[#allocation7 + $0x10] sm:$0xff]   ;;  %v2941_v4 = vld [vmem:[#allocation7 + $0x18] sm:$0xff]   ;;  %v2942_v5 = vld [vmem:[#allocation7 + $0x20] sm:$0xff]   ;;  %vm1696_vm1 = vcmask 1041409   ;;  %vm1698_vm2 = vcmask 1042434   ;;  %vm1700_vm3 = vcmask 1043459  }
  0x7f   :  { %2535 = vmatprep.subr.bf16.mxu1 %v3276_v0  ;;  %2551 = vmatprep.mubr.msk.bf16.mxu1 %vm3277_vm0, %v3276_v0  ;;  %v2943_v6 = vld [vmem:[#allocation7 + $0x28] sm:$0xff]   ;;  %v2944_v7 = vld [vmem:[#allocation7 + $0x30] sm:$0xff]   ;;  %v2945_v8 = vld [vmem:[#allocation7 + $0x38] sm:$0xff]   ;;  %v3453_v15 = vshrl.u32 %v292_v14, 7  ;;  %vm1702_vm4 = vcmask 1044484   ;;  %vm1704_vm5 = vcmask 1045509  }
  0x80   :  { %2516 = vmatpush3.bf16.msra.mxu0 %v2938_v1  ;;  %v267_v9 = vld [vmem:[#allocation2] sm:$0xf]  ;;  %v2946_v10 = vld [vmem:[#allocation5] sm:$0xff]   ;;  %v2947_v11 = vld [vmem:[#allocation5 + $0x8] sm:$0xff]   ;;  %vm1706_vm6 = vcmask 1046534   ;;  %vm1708_vm7 = vcmask 1047559  }
  0x81   :  { %2517 = vmatprep.subr.bf16.mxu0 %v3276_v0  ;;  %v2948_v12 = vld [vmem:[#allocation5 + $0x10] sm:$0xff]   ;;  %v2949_v13 = vld [vmem:[#allocation5 + $0x18] sm:$0xff]   ;;  %v3456_v16 = vsub.s32 0, %v3453_v15  ;;  %v3461_v17 = vld [vmem:[%s3828_s7] sm:$0xff]  ;;  %s3279_s25 = smov [#allocation14]  }
  0x82   :  { %v3471_v40 = vld [vmem:[#allocation8] sm:$0xff]   ;;  %v3482_v45 = vld [vmem:[#allocation8 + $0x8] sm:$0xff]   ;;  %v3486_v46 = vld [vmem:[#allocation8 + $0x10] sm:$0xff]   ;;  %s2250_s5 = sshll.u32 %s3279_s25, 4  ;;  %s2251_s5 = int_to_ptr.vmem [resolvable:$true] %s2250_s5 }
  0x83   :  { %v295_v18 = vrot.slane %v3461_v17, %v3456_v16  ;;  %2536 = vmatpush3.bf16.msra.mxu1 %v3471_v40  ;;  %v3490_v47 = vld [vmem:[#allocation8 + $0x18] sm:$0xff]   ;;  %v3493_v48 = vld [vmem:[#allocation8 + $0x20] sm:$0xff]   ;;  %v3497_v50 = vld [vmem:[#allocation8 + $0x28] sm:$0xff]   ;;  %s3233_s30 = scalar_lea.vmem %s2251_s5, 128  ;;  %p3238_p1 = scmp.lt.s32.totalorder %s2251_s5, %s2251_s5 }
  0x84   :  { %2518 = vmatpush3.bf16.msra.mxu0 %v2939_v2  ;;  %2537 = vmatprep.subr.bf16.mxu1 %v3276_v0  ;;  %v3508_v56 = vld [vmem:[#allocation8 + $0x30] sm:$0xff]   ;;  %p3234_p0 = scmp.ne.s32.totalorder %s2251_s5, %s3233_s30  ;;  %p3239_p2 = scmp.lt.s32.totalorder %s3233_s30, %s3233_s30 }
  0x85   :  { %2519 = vmatprep.subr.bf16.mxu0 %v3276_v0 }
  0x86   :  { %p3240_p3 = por %p3239_p2, %p3238_p1 }
  0x87   :  { %2538 = vmatpush3.bf16.msra.mxu1 %v3482_v45 }
  0x88   :  { %2520 = vmatpush3.bf16.msra.mxu0 %v2940_v3  ;;  %2539 = vmatprep.subr.bf16.mxu1 %v3276_v0  ;;  %p3241_p4 = pnand %p3240_p3, %p3234_p0 }
  0x89   :  { %2521 = vmatprep.subr.bf16.mxu0 %v3276_v0 }
  0x8b   :  { %2540 = vmatpush3.bf16.msra.mxu1 %v3486_v46 }
  0x8c   :  { %2522 = vmatpush3.bf16.msra.mxu0 %v2941_v4  ;;  %2541 = vmatprep.subr.bf16.mxu1 %v3276_v0 }
  0x8d   :  { %2523 = vmatprep.subr.bf16.mxu0 %v3276_v0 }
  0x8f   :  { %2542 = vmatpush3.bf16.msra.mxu1 %v3490_v47 }
  0x90   :  { %2524 = vmatpush3.bf16.msra.mxu0 %v2942_v5  ;;  %2543 = vmatprep.subr.bf16.mxu1 %v3276_v0 }
  0x91   :  { %2525 = vmatprep.subr.bf16.mxu0 %v3276_v0 }
  0x93   :  { %2544 = vmatpush3.bf16.msra.mxu1 %v3493_v48 }
  0x94   :  { %2526 = vmatpush3.bf16.msra.mxu0 %v2943_v6  ;;  %2545 = vmatprep.subr.bf16.mxu1 %v3276_v0 }
  0x95   :  { %2527 = vmatprep.subr.bf16.mxu0 %v3276_v0 }
  0x97   :  { %2546 = vmatpush3.bf16.msra.mxu1 %v3497_v50 }
  0x98   :  { %2528 = vmatpush3.bf16.msra.mxu0 %v2944_v7  ;;  %2547 = vmatprep.subr.bf16.mxu1 %v3276_v0 }
  0x99   :  { %2529 = vmatprep.subr.bf16.mxu0 %v3276_v0 }
  0x9b   :  { %2548 = vmatpush3.bf16.msra.mxu1 %v3508_v56 }
  0x9c   :  { %2530 = vmatpush3.bf16.msra.mxu0 %v2945_v8  ;;  %2549 = vmatprep.subr.bf16.mxu1 %v3276_v0 }
  0x9d   :  { %2555 = vmatprep.subr.bf16.mxu0 %v2938_v1 }
  0x9f   :  { %2532 = vmatmul.mubr.bf16.vlgmr.msra.gmra.mrb[0].mxu0 %v267_v9 }
  0xa0   :  { %2556 = vmatpush3.bf16.msra.mxu0 %v2938_v1  ;;  %2571 = vmatprep.mubr.bf16.mxu0 %v2946_v10  ;;  %v3526_v1 = vld [vmem:[#allocation8 + $0x38] sm:$0xff]  }
  0xa1   :  { %2557 = vmatprep.subr.bf16.mxu0 %v2939_v2  ;;  %2550 = vmatpush3.bf16.msra.mxu1 %v3526_v1 }
  0xa2   :  { %2579 = vmatprep.subr.bf16.mxu1 %v3471_v40 }
  0xa4   :  { %2558 = vmatpush3.bf16.msra.mxu0 %v2939_v2 }
  0xa5   :  { %2559 = vmatprep.subr.bf16.mxu0 %v2940_v3 }
  0xa8   :  { %2560 = vmatpush3.bf16.msra.mxu0 %v2940_v3 }
  0xa9   :  { %2561 = vmatprep.subr.bf16.mxu0 %v2941_v4 }
  0xac   :  { %2562 = vmatpush3.bf16.msra.mxu0 %v2941_v4 }
  0xad   :  { %2563 = vmatprep.subr.bf16.mxu0 %v2942_v5 }
  0xb0   :  { %2564 = vmatpush3.bf16.msra.mxu0 %v2942_v5 }
  0xb1   :  { %2565 = vmatprep.subr.bf16.mxu0 %v2943_v6 }
  0xb4   :  { %2566 = vmatpush3.bf16.msra.mxu0 %v2943_v6 }
  0xb5   :  { %2567 = vmatprep.subr.bf16.mxu0 %v2944_v7 }
  0xb8   :  { %2568 = vmatpush3.bf16.msra.mxu0 %v2944_v7 }
  0xb9   :  { %2569 = vmatprep.subr.bf16.mxu0 %v2945_v8 }
  0xbc   :  { %2570 = vmatpush3.bf16.msra.mxu0 %v2945_v8 }
  0xbd   :  { %2603 = vmatprep.subr.bf16.mxu0 %v3276_v0 }
  0xbf   :  { %2572 = vmatmul.mubr.bf16.vlgmr.msra.gmra.mrb[4].mxu0 %v2947_v11 }
  0xc0   :  { %2575 = vmatprep.mubr.bf16.mxu0 %v2948_v12 }
  0xc7   :  { %2576 = vmatmul.mubr.bf16.gmra.mrb[8].mxu0 %v2949_v13 }
  0xc8   :  { %2619 = vmatprep.mubr.msk.bf16.mxu0 %vm3277_vm0, %v3276_v0 }
 0x172   :  { %v378_v19 = vpop.f32.mrb[0].mxu0 }
 0x173   :  { %v379_v20 = vadd.f32 %v378_v19, %v295_v18  ;;  %v2533_v21 = vpop.f32.mrb[1].mxu0 }
 0x174   :  { %v381_v22 = vpop.f32.mrb[2].mxu0 }
 0x175   :  { %v2534_v23 = vpop.f32.mrb[3].mxu0  ;;  %384 = vadd.xlane.f32.xlu0 %v379_v20 }
 0x192   :  { %v2573_v24 = vpop.f32.mrb[4].mxu0 }
 0x193   :  { %v560_v25 = vpop.f32.mrb[5].mxu0  ;;  %v569_v31 = vadd.f32 %v2573_v24, %v295_v18  ;;  %v2958_v24 = vld [vmem:[#allocation8 + $0x40] sm:$0xff]  }
 0x194   :  { %v561_v26 = vadd.f32 %v560_v25, %v295_v18  ;;  %v2574_v27 = vpop.f32.mrb[6].mxu0  ;;  %2604 = vmatpush3.bf16.msra.mxu0 %v2958_v24  ;;  %v2959_v25 = vld [vmem:[#allocation8 + $0x48] sm:$0xff]  }
 0x195   :  { %v563_v28 = vpop.f32.mrb[7].mxu0  ;;  %v572_v30 = vadd.f32 %v2574_v27, %v295_v18  ;;  %2605 = vmatprep.subr.bf16.mxu0 %v3276_v0  ;;  %v2961_v27 = vld [vmem:[#allocation8 + $0x58] sm:$0xff]  }
 0x196   :  { %v564_v29 = vadd.f32 %v563_v28, %v295_v18  ;;  %591 = vadd.xlane.f32.xlu0 %v561_v26  ;;  %v2962_v28 = vld [vmem:[#allocation8 + $0x60] sm:$0xff]  }
 0x198   :  { %593 = vadd.xlane.f32.xlu1 %v564_v29  ;;  %2606 = vmatpush3.bf16.msra.mxu0 %v2959_v25 }
 0x199   :  { %2607 = vmatprep.subr.bf16.mxu0 %v3276_v0 }
 0x19a   :  { %v2577_v32 = vpop.f32.mrb[8].mxu0  ;;  %597 = vadd.xlane.f32.xlu0 %v572_v30 }
 0x19b   :  { %v576_v33 = vpop.f32.mrb[9].mxu0  ;;  %v3465_v38 = vadd.f32 %v2577_v32, %v295_v18 }
 0x19c   :  { %v2578_v34 = vpop.f32.mrb[10].mxu0  ;;  %595 = vadd.xlane.f32.xlu1 %v569_v31  ;;  %v577_v36 = vadd.f32 %v576_v33, %v295_v18 }
 0x19d   :  { %v579_v35 = vpop.f32.mrb[11].mxu0  ;;  %v3467_v39 = vadd.f32 %v2578_v34, %v295_v18 }
 0x19e   :  { %v580_v37 = vadd.f32 %v579_v35, %v295_v18 }
 0x1a0   :  { %599 = vadd.xlane.f32.xlu1 %v577_v36  ;;  %601 = vadd.xlane.f32.xlu0 %v580_v37 }
 0x1a4   :  { %603 = vadd.xlane.f32.xlu1 %v3465_v38  ;;  %605 = vadd.xlane.f32.xlu0 %v3467_v39 }
 0x202   :  { %v385_v41 = vpop.xlane.xlu0 %384 }
 0x203   :  { %v3475_v42 = vmul.f32 0.03125, %v385_v41 }
 0x205   :  { %v3478_v43 = vsub.f32 %v379_v20, %v3475_v42 }
 0x207   :  { %v388_v44 = vmul.f32 %v3478_v43, %v3478_v43 }
 0x209   :  { %389 = vadd.xlane.f32.xlu1 %v388_v44 }
 0x223   :  { %v592_v49 = vpop.xlane.xlu0 %591 }
 0x224   :  { %v3499_v51 = vmul.f32 0.03125, %v592_v49 }
 0x225   :  { %v594_v52 = vpop.xlane.xlu1 %593 }
 0x226   :  { %v3502_v53 = vmul.f32 0.03125, %v594_v52  ;;  %v3505_v54 = vsub.f32 %v561_v26, %v3499_v51  ;;  %v2960_v26 = vld [vmem:[#allocation8 + $0x50] sm:$0xff]  }
 0x227   :  { %v598_v55 = vpop.xlane.xlu0 %597  ;;  %2608 = vmatpush3.bf16.msra.mxu0 %v2960_v26 }
 0x228   :  { %v3510_v57 = vmul.f32 0.03125, %v598_v55  ;;  %v623_v58 = vmul.f32 %v3505_v54, %v3505_v54  ;;  %v3515_v59 = vsub.f32 %v564_v29, %v3502_v53  ;;  %2609 = vmatprep.subr.bf16.mxu0 %v3276_v0  ;;  %v2963_v29 = vld [vmem:[#allocation8 + $0x68] sm:$0xff]  }
 0x229   :  { %v596_v60 = vpop.xlane.xlu1 %595 }
 0x22a   :  { %v3518_v61 = vmul.f32 0.03125, %v596_v60  ;;  %631 = vadd.xlane.f32.xlu0 %v623_v58  ;;  %v624_v62 = vmul.f32 %v3515_v59, %v3515_v59  ;;  %v3523_v63 = vsub.f32 %v572_v30, %v3510_v57  ;;  %v2964_v30 = vld [vmem:[#allocation8 + $0x70] sm:$0xff]   ;;  %v647_v60 = vmul.f32 96.0, %v3499_v51 }
 0x22b   :  { %2610 = vmatpush3.bf16.msra.mxu0 %v2961_v27 }
 0x22c   :  { %633 = vadd.xlane.f32.xlu1 %v624_v62  ;;  %v3529_v2 = vsub.f32 %v569_v31, %v3518_v61  ;;  %v626_v8 = vmul.f32 %v3523_v63, %v3523_v63  ;;  %2611 = vmatprep.subr.bf16.mxu0 %v3276_v0  ;;  %v391_v31 = vmul.f32 96.0, %v3475_v42  ;;  %v648_v62 = vmul.f32 96.0, %v3502_v53 }
 0x22d   :  { %v600_v3 = vpop.xlane.xlu1 %599  ;;  %v602_v4 = vpop.xlane.xlu0 %601 }
 0x22e   :  { %v3532_v5 = vmul.f32 0.03125, %v600_v3  ;;  %v3534_v6 = vmul.f32 0.03125, %v602_v4  ;;  %v625_v7 = vmul.f32 %v3529_v2, %v3529_v2  ;;  %v392_v32 = vmul.f32 %v391_v31, %v3475_v42 }
 0x22f   :  { %2612 = vmatpush3.bf16.msra.mxu0 %v2962_v28 }
 0x230   :  { %635 = vadd.xlane.f32.xlu0 %v625_v7  ;;  %637 = vadd.xlane.f32.xlu1 %v626_v8  ;;  %v3542_v9 = vsub.f32 %v577_v36, %v3532_v5  ;;  %v3545_v10 = vsub.f32 %v580_v37, %v3534_v6  ;;  %v400_v37 = vsub.s32 1, %v3453_v15  ;;  %v656_v7 = vmul.f32 %v648_v62, %v3502_v53 }
 0x231   :  { %v604_v11 = vpop.xlane.xlu1 %603  ;;  %v606_v12 = vpop.xlane.xlu0 %605  ;;  %2613 = vmatprep.subr.bf16.mxu0 %v3276_v0  ;;  %v650_v8 = vmul.f32 96.0, %v3510_v57 }
 0x232   :  { %v3548_v13 = vmul.f32 0.03125, %v604_v11  ;;  %v3550_v14 = vmul.f32 0.03125, %v606_v12  ;;  %v627_v18 = vmul.f32 %v3542_v9, %v3542_v9  ;;  %v628_v19 = vmul.f32 %v3545_v10, %v3545_v10 }
 0x233   :  { %2614 = vmatpush3.bf16.msra.mxu0 %v2963_v29  ;;  %v649_v11 = vmul.f32 96.0, %v3518_v61 }
 0x234   :  { %639 = vadd.xlane.f32.xlu0 %v627_v18  ;;  %641 = vadd.xlane.f32.xlu1 %v628_v19  ;;  %v3558_v20 = vsub.f32 %v3465_v38, %v3548_v13  ;;  %v3562_v21 = vsub.f32 %v3467_v39, %v3550_v14  ;;  %v405_v38 = vsub.s32 2, %v3453_v15  ;;  %v3582_v39 = vrot.slane %v3461_v17, %v400_v37 }
 0x235   :  { %2615 = vmatprep.subr.bf16.mxu0 %v3276_v0  ;;  %v652_v19 = vmul.f32 96.0, %v3534_v6  ;;  %v657_v53 = vmul.f32 %v649_v11, %v3518_v61  ;;  %v653_v61 = vmul.f32 96.0, %v3548_v13 }
 0x236   :  { %v629_v22 = vmul.f32 %v3558_v20, %v3558_v20  ;;  %v630_v23 = vmul.f32 %v3562_v21, %v3562_v21  ;;  %v3588_v42 = vrot.slane %v3461_v17, %v405_v38 }
 0x237   :  { %2616 = vmatpush3.bf16.msra.mxu0 %v2964_v30  ;;  %v660_v29 = vmul.f32 %v652_v19, %v3534_v6 }
 0x238   :  { %643 = vadd.xlane.f32.xlu0 %v629_v22  ;;  %645 = vadd.xlane.f32.xlu1 %v630_v23  ;;  %v651_v22 = vmul.f32 96.0, %v3532_v5  ;;  %v658_v23 = vmul.f32 %v650_v8, %v3510_v57 }
 0x239   :  { %2617 = vmatprep.subr.bf16.mxu0 %v3276_v0 }
 0x23a   :  { %v659_v30 = vmul.f32 %v651_v22, %v3532_v5 }
 0x296   :  { %v390_v33 = vpop.xlane.xlu1 %389 }
 0x297   :  { %v393_v34 = vsub.f32 %v390_v33, %v392_v32 }
 0x299   :  { %v394_v35 = vmul.f32 0.03125, %v393_v34 }
 0x29b   :  { %v395_v36 = vadd.f32 1e-05, %v394_v35 }
 0x29d   :  { %3022 = vrsqrt.f32 %v395_v36 }
 0x2a7   :  { %v3023_v41 = vpop.eup %3022 }
 0x2a8   :  { %v397_v44 = vmul.f32 %v3023_v41, %v3478_v43  ;;  %v655_v43 = vmul.f32 %v647_v60, %v3499_v51 }
 0x2aa   :  { %v402_v49 = vmul.f32 %v3582_v39, %v397_v44  ;;  %v661_v44 = vmul.f32 %v653_v61, %v3548_v13 }
 0x2ac   :  { %v407_v52 = vadd.f32 %v3588_v42, %v402_v49 }
 0x2ae   :  { %v408_v55 = vmax.f32 %v407_v52, 0.0 }
 0x2b0   :  { %v409_v58 = vpack.c.bf16 %v408_v55, %v408_v55 }
 0x2b2   :  { %2552 = vmatmul.mubr.bf16.vlgmr.msra.gmra.mrb[0].mxu1 %v409_v58 }
 0x2b3   :  { %2580 = vmatpush3.bf16.msra.mxu1 %v3471_v40 }
 0x2b4   :  { %2581 = vmatprep.subr.bf16.mxu1 %v3482_v45 }
 0x2b7   :  { %v632_v3 = vpop.xlane.xlu0 %631  ;;  %2582 = vmatpush3.bf16.msra.mxu1 %v3482_v45 }
 0x2b8   :  { %v663_v4 = vsub.f32 %v632_v3, %v655_v43  ;;  %2583 = vmatprep.subr.bf16.mxu1 %v3486_v46 }
 0x2b9   :  { %v634_v12 = vpop.xlane.xlu1 %633 }
 0x2ba   :  { %v671_v40 = vmul.f32 0.03125, %v663_v4  ;;  %v664_v18 = vsub.f32 %v634_v12, %v656_v7 }
 0x2bb   :  { %2584 = vmatpush3.bf16.msra.mxu1 %v3486_v46  ;;  %v654_v46 = vmul.f32 96.0, %v3550_v14 }
 0x2bc   :  { %v679_v51 = vadd.f32 1e-05, %v671_v40  ;;  %v672_v45 = vmul.f32 0.03125, %v664_v18  ;;  %2585 = vmatprep.subr.bf16.mxu1 %v3490_v47 }
 0x2bd   :  { %v638_v24 = vpop.xlane.xlu1 %637  ;;  %v636_v25 = vpop.xlane.xlu0 %635  ;;  %v662_v6 = vmul.f32 %v654_v46, %v3550_v14 }
 0x2be   :  { %3024 = vrsqrt.f32 %v679_v51  ;;  %v680_v26 = vadd.f32 1e-05, %v672_v45  ;;  %v666_v27 = vsub.f32 %v638_v24, %v658_v23  ;;  %v665_v28 = vsub.f32 %v636_v25, %v657_v53 }
 0x2bf   :  { %2586 = vmatpush3.bf16.msra.mxu1 %v3490_v47 }
 0x2c0   :  { %3026 = vrsqrt.f32 %v680_v26  ;;  %v674_v57 = vmul.f32 0.03125, %v666_v27  ;;  %v673_v31 = vmul.f32 0.03125, %v665_v28  ;;  %2587 = vmatprep.subr.bf16.mxu1 %v3493_v48 }
 0x2c1   :  { %v642_v32 = vpop.xlane.xlu1 %641  ;;  %v640_v33 = vpop.xlane.xlu0 %639 }
 0x2c2   :  { %v682_v34 = vadd.f32 1e-05, %v674_v57  ;;  %v681_v35 = vadd.f32 1e-05, %v673_v31  ;;  %v668_v36 = vsub.f32 %v642_v32, %v660_v29  ;;  %v667_v41 = vsub.f32 %v640_v33, %v659_v30 }
 0x2c3   :  { %2588 = vmatpush3.bf16.msra.mxu1 %v3493_v48 }
 0x2c4   :  { %3028 = vrsqrt.f32 %v682_v34  ;;  %v676_v5 = vmul.f32 0.03125, %v668_v36  ;;  %v675_v47 = vmul.f32 0.03125, %v667_v41  ;;  %2589 = vmatprep.subr.bf16.mxu1 %v3497_v50 }
 0x2c5   :  { %3030 = vrsqrt.f32 %v681_v35  ;;  %v646_v49 = vpop.xlane.xlu1 %645  ;;  %v644_v52 = vpop.xlane.xlu0 %643 }
 0x2c6   :  { %v684_v55 = vadd.f32 1e-05, %v676_v5  ;;  %v683_v58 = vadd.f32 1e-05, %v675_v47  ;;  %v670_v60 = vsub.f32 %v646_v49, %v662_v6  ;;  %v669_v62 = vsub.f32 %v644_v52, %v661_v44  ;;  %v2965_v44 = vld [vmem:[#allocation8 + $0x78] sm:$0xff]   ;;  %v2967_v49 = vld [vmem:[#allocation8 + $0xc0] sm:$0xff]  }
 0x2c7   :  { %2590 = vmatpush3.bf16.msra.mxu1 %v3497_v50  ;;  %2618 = vmatpush3.bf16.msra.mxu0 %v2965_v44  ;;  %v2968_v52 = vld [vmem:[#allocation8 + $0x88] sm:$0xff]  }
 0x2c8   :  { %v3025_v43 = vpop.eup %3024  ;;  %3032 = vrsqrt.f32 %v684_v55  ;;  %v678_v14 = vmul.f32 0.03125, %v670_v60  ;;  %v677_v48 = vmul.f32 0.03125, %v669_v62  ;;  %2591 = vmatprep.subr.bf16.mxu1 %v3508_v56  ;;  %2647 = vmatprep.subr.bf16.mxu0 %v2967_v49  ;;  %v2972_v55 = vld [vmem:[#allocation8 + $0x98] sm:$0xff]   ;;  %v2978_v60 = vld [vmem:[#allocation8 + $0xb0] sm:$0xff]   ;;  %v1234_v44 = vld [vmem:[#allocation11 + $0x48] sm:$0xff] }
 0x2c9   :  { %3034 = vrsqrt.f32 %v683_v58  ;;  %v695_v13 = vmul.f32 %v3025_v43, %v3505_v54  ;;  %v2976_v58 = vld [vmem:[#allocation8 + $0xa8] sm:$0xff]   ;;  %v2980_v62 = vld [vmem:[#allocation8 + $0xb8] sm:$0xff]   ;;  %v412_v43 = vsub.s32 3, %v3453_v15 }
 0x2ca   :  { %v3027_v3 = vpop.eup %3026  ;;  %v686_v4 = vadd.f32 1e-05, %v678_v14  ;;  %v685_v7 = vadd.f32 1e-05, %v677_v48 }
 0x2cb   :  { %2592 = vmatpush3.bf16.msra.mxu1 %v3508_v56  ;;  %v696_v8 = vmul.f32 %v3027_v3, %v3515_v59  ;;  %v703_v11 = vmul.f32 %v695_v13, %v3582_v39  ;;  %v413_v14 = vrot.slane %v3461_v17, %v412_v43 }
 0x2cc   :  { %3036 = vrsqrt.f32 %v686_v4  ;;  %2593 = vmatprep.subr.bf16.mxu1 %v3526_v1 }
 0x2cd   :  { %3038 = vrsqrt.f32 %v685_v7  ;;  %v704_v50 = vmul.f32 %v696_v8, %v3582_v39  ;;  %v711_v12 = vadd.f32 %v703_v11, %v3588_v42  ;;  %v2969_v11 = vld [vmem:[#allocation8 + $0xc8] sm:$0xff]  }
 0x2ce   :  { %v3029_v40 = vpop.eup %3028 }
 0x2cf   :  { %v3031_v18 = vpop.eup %3030  ;;  %v698_v54 = vmul.f32 %v3029_v40, %v3523_v63  ;;  %v712_v19 = vadd.f32 %v704_v50, %v3588_v42  ;;  %2594 = vmatpush3.bf16.msra.mxu1 %v3526_v1  ;;  %v719_v59 = vmax.f32 %v711_v12, 0.0  ;;  %v2971_v50 = vld [vmem:[#allocation8 + $0xd0] sm:$0xff]   ;;  %v2973_v12 = vld [vmem:[#allocation8 + $0xd8] sm:$0xff]   ;;  %v2975_v40 = vld [vmem:[#allocation8 + $0xe0] sm:$0xff]  }
 0x2d0   :  { %v697_v56 = vmul.f32 %v3031_v18, %v3529_v2  ;;  %v2977_v18 = vld [vmem:[#allocation8 + $0xe8] sm:$0xff]  }
 0x2d1   :  { %v720_v22 = vmax.f32 %v712_v19, 0.0  ;;  %v706_v51 = vmul.f32 %v698_v54, %v3582_v39  ;;  %v2979_v54 = vld [vmem:[#allocation8 + $0xf0] sm:$0xff]   ;;  %v2981_v19 = vld [vmem:[#allocation8 + $0xf8] sm:$0xff]  }
 0x2d2   :  { %v3033_v45 = vpop.eup %3032  ;;  %v705_v23 = vmul.f32 %v697_v56, %v3582_v39 }
 0x2d3   :  { %v3035_v53 = vpop.eup %3034  ;;  %v727_v24 = vpack.c.bf16 %v720_v22, %v719_v59  ;;  %v714_v25 = vadd.f32 %v706_v51, %v3588_v42  ;;  %v700_v26 = vmul.f32 %v3033_v45, %v3545_v10 }
 0x2d4   :  { %v713_v63 = vadd.f32 %v705_v23, %v3588_v42  ;;  %v699_v27 = vmul.f32 %v3035_v53, %v3542_v9 }
 0x2d5   :  { %2595 = vmatprep.mubr.bf16.mxu1 %v727_v24  ;;  %v722_v1 = vmax.f32 %v714_v25, 0.0  ;;  %v708_v2 = vmul.f32 %v700_v26, %v3582_v39 }
 0x2d6   :  { %v3037_v28 = vpop.eup %3036  ;;  %v721_v29 = vmax.f32 %v713_v63, 0.0  ;;  %v707_v30 = vmul.f32 %v699_v27, %v3582_v39 }
 0x2d7   :  { %v3039_v46 = vpop.eup %3038  ;;  %v716_v57 = vadd.f32 %v708_v2, %v3588_v42  ;;  %v702_v31 = vmul.f32 %v3037_v28, %v3562_v21 }
 0x2d8   :  { %v728_v61 = vpack.c.bf16 %v722_v1, %v721_v29  ;;  %v715_v10 = vadd.f32 %v707_v30, %v3588_v42  ;;  %v701_v32 = vmul.f32 %v3039_v46, %v3558_v20  ;;  %v2966_v20 = vld [vmem:[#allocation8 + $0x80] sm:$0xff]  }
 0x2d9   :  { %v724_v33 = vmax.f32 %v716_v57, 0.0  ;;  %v710_v9 = vmul.f32 %v702_v31, %v3582_v39  ;;  %2623 = vmatprep.subr.bf16.mxu1 %v2966_v20 }
 0x2da   :  { %2596 = vmatmul.mubr.bf16.vlgmr.msra.gmra.mrb[4].mxu1 %v728_v61  ;;  %v723_v34 = vmax.f32 %v715_v10, 0.0  ;;  %v709_v35 = vmul.f32 %v701_v32, %v3582_v39  ;;  %v2970_v39 = vld [vmem:[#allocation8 + $0x90] sm:$0xff]   ;;  %v1225_v61 = vld [vmem:[#allocation11] sm:$0xff]  ;;  %v1226_v10 = vld [vmem:[#allocation11 + $0x8] sm:$0xff] }
 0x2db   :  { %v718_v36 = vadd.f32 %v710_v9, %v3588_v42  ;;  %2624 = vmatpush3.bf16.msra.mxu1 %v2966_v20  ;;  %v1227_v32 = vld [vmem:[#allocation11 + $0x10] sm:$0xff]  ;;  %v1228_v9 = vld [vmem:[#allocation11 + $0x18] sm:$0xff] }
 0x2dc   :  { %v729_v41 = vpack.c.bf16 %v724_v33, %v723_v34  ;;  %v717_v6 = vadd.f32 %v709_v35, %v3588_v42  ;;  %2625 = vmatprep.subr.bf16.mxu1 %v2968_v52  ;;  %v2974_v42 = vld [vmem:[#allocation8 + $0xa0] sm:$0xff]   ;;  %v2859_v33 = vpack.c.bf16 %v1226_v10, %v1225_v61  ;;  %v2863_v34 = vpack.c.bf16 %v1228_v9, %v1227_v32 }
 0x2dd   :  { %v726_v5 = vmax.f32 %v718_v36, 0.0  ;;  %v1229_v35 = vld [vmem:[#allocation11 + $0x20] sm:$0xff]  ;;  %v1230_v36 = vld [vmem:[#allocation11 + $0x28] sm:$0xff] }
 0x2de   :  { %2599 = vmatprep.mubr.bf16.mxu1 %v729_v41  ;;  %v725_v21 = vmax.f32 %v717_v6, 0.0  ;;  %v2867_v41 = vpack.c.bf16 %v1230_v36, %v1229_v35  ;;  %v1231_v6 = vld [vmem:[#allocation11 + $0x30] sm:$0xff] }
 0x2df   :  { %2626 = vmatpush3.bf16.msra.mxu1 %v2968_v52  ;;  %v1236_v52 = vld [vmem:[#allocation11 + $0x58] sm:$0xff] }
 0x2e0   :  { %v730_v47 = vpack.c.bf16 %v726_v5, %v725_v21  ;;  %2627 = vmatprep.subr.bf16.mxu1 %v2970_v39  ;;  %v1232_v5 = vld [vmem:[#allocation11 + $0x38] sm:$0xff] }
 0x2e1   :  { %v2871_v21 = vpack.c.bf16 %v1232_v5, %v1231_v6 }
 0x2e2   :  { %2600 = vmatmul.mubr.bf16.gmra.mrb[8].mxu1 %v730_v47  ;;  %v1233_v47 = vld [vmem:[#allocation11 + $0x40] sm:$0xff] }
 0x2e3   :  { %2628 = vmatpush3.bf16.msra.mxu1 %v2970_v39  ;;  %v2875_v20 = vpack.c.bf16 %v1234_v44, %v1233_v47 }
 0x2e4   :  { %2629 = vmatprep.subr.bf16.mxu1 %v2972_v55 }
 0x2e7   :  { %2630 = vmatpush3.bf16.msra.mxu1 %v2972_v55  ;;  %v1237_v55 = vld [vmem:[#allocation11 + $0x60] sm:$0xff] }
 0x2e8   :  { %2631 = vmatprep.subr.bf16.mxu1 %v2974_v42 }
 0x2eb   :  { %2632 = vmatpush3.bf16.msra.mxu1 %v2974_v42  ;;  %v1238_v42 = vld [vmem:[#allocation11 + $0x68] sm:$0xff] }
 0x2ec   :  { %2633 = vmatprep.subr.bf16.mxu1 %v2976_v58 }
 0x2ef   :  { %2634 = vmatpush3.bf16.msra.mxu1 %v2976_v58  ;;  %v2883_v58 = vpack.c.bf16 %v1238_v42, %v1237_v55 }
 0x2f0   :  { %2635 = vmatprep.subr.bf16.mxu1 %v2978_v60 }
 0x2f3   :  { %2636 = vmatpush3.bf16.msra.mxu1 %v2978_v60  ;;  %v1239_v60 = vld [vmem:[#allocation11 + $0x70] sm:$0xff] }
 0x2f4   :  { %2637 = vmatprep.subr.bf16.mxu1 %v2980_v62 }
 0x2f7   :  { %2638 = vmatpush3.bf16.msra.mxu1 %v2980_v62  ;;  %v1240_v62 = vld [vmem:[#allocation11 + $0x78] sm:$0xff] }
 0x2f8   :  { %2860 = vmatprep.subr.bf16.mxu1 %v2859_v33 }
 0x385   :  { %v496_v48 = vpop.f32.mrb[0].mxu1 }
 0x386   :  { %v497_v13 = vadd.f32 %v496_v48, %v413_v14  ;;  %v2553_v3 = vpop.f32.mrb[1].mxu1 }
 0x387   :  { %v499_v4 = vpop.f32.mrb[2].mxu1 }
 0x388   :  { %v3651_v7 = vpack.c.bf16 %v497_v13, %v497_v13  ;;  %v2554_v8 = vpop.f32.mrb[3].mxu1 }
 0x389   :  { %v799_v8 = vsub.s32 4, %v3453_v15 }
 0x38a   :  { %2620 = vmatmul.mubr.bf16.vlgmr.msra.gmra.mrb[12].mxu0 %v3651_v7 }
 0x38b   :  { %2648 = vmatpush3.bf16.msra.mxu0 %v2967_v49  ;;  %v1235_v49 = vld [vmem:[#allocation11 + $0x50] sm:$0xff] }
 0x38c   :  { %2649 = vmatprep.subr.bf16.mxu0 %v2969_v11  ;;  %v2879_v39 = vpack.c.bf16 %v1236_v52, %v1235_v49 }
 0x38f   :  { %2650 = vmatpush3.bf16.msra.mxu0 %v2969_v11  ;;  %v3278_v11 = vmov 1966171168  }
 0x390   :  { %2651 = vmatprep.subr.bf16.mxu0 %v2971_v50 }
 0x393   :  { %2652 = vmatpush3.bf16.msra.mxu0 %v2971_v50  ;;  %v1130_v50 = vunpack.c.l.s4 %v3278_v11 }
 0x394   :  { %2653 = vmatprep.subr.bf16.mxu0 %v2973_v12 }
 0x397   :  { %2654 = vmatpush3.bf16.msra.mxu0 %v2973_v12  ;;  %v800_v12 = vrot.slane %v3461_v17, %v799_v8 }
 0x398   :  { %2655 = vmatprep.subr.bf16.mxu0 %v2975_v40 }
 0x39b   :  { %2656 = vmatpush3.bf16.msra.mxu0 %v2975_v40  ;;  %v1131_v40 = vunpack.c.0.s8 %v1130_v50 }
 0x39c   :  { %2657 = vmatprep.subr.bf16.mxu0 %v2977_v18 }
 0x39f   :  { %2658 = vmatpush3.bf16.msra.mxu0 %v2977_v18 }
 0x3a0   :  { %2659 = vmatprep.subr.bf16.mxu0 %v2979_v54 }
 0x3a3   :  { %2660 = vmatpush3.bf16.msra.mxu0 %v2979_v54  ;;  %v1134_v54 = vsub.s32 %v1131_v40, %v3453_v15 }
 0x3a4   :  { %2661 = vmatprep.subr.bf16.mxu0 %v2981_v19 }
 0x3a7   :  { %2662 = vmatpush3.bf16.msra.mxu0 %v2981_v19 }
 0x3ad   :  { %v2597_v56 = vpop.f32.mrb[4].mxu1 }
 0x3ae   :  { %v765_v59 = vpop.f32.mrb[5].mxu1  ;;  %v774_v51 = vadd.f32 %v2597_v56, %v413_v14 }
 0x3af   :  { %v2598_v22 = vpop.f32.mrb[6].mxu1  ;;  %v766_v53 = vadd.f32 %v765_v59, %v413_v14 }
 0x3b0   :  { %v777_v45 = vadd.f32 %v2598_v22, %v413_v14  ;;  %v768_v23 = vpop.f32.mrb[7].mxu1 }
 0x3b1   :  { %v769_v24 = vadd.f32 %v768_v23, %v413_v14 }
 0x3b2   :  { %v890_v25 = vpack.c.bf16 %v777_v45, %v774_v51  ;;  %v895_v51 = vsub.s32 5, %v3453_v15 }
 0x3b3   :  { %v889_v26 = vpack.c.bf16 %v769_v24, %v766_v53 }
 0x3b4   :  { %v896_v53 = vrot.slane %v3461_v17, %v895_v51 }
 0x3b5   :  { %v2601_v63 = vpop.f32.mrb[8].mxu1  ;;  %2639 = vmatprep.mubr.bf16.mxu1 %v889_v26  ;;  %2663 = vmatprep.mubr.bf16.mxu0 %v889_v26 }
 0x3b6   :  { %v781_v27 = vpop.f32.mrb[9].mxu1  ;;  %2640 = vmatmul.mubr.bf16.vlgmr.msra.gmra.mrb[12].mxu1 %v890_v25  ;;  %2664 = vmatmul.mubr.bf16.vlgmr.msra.gmra.mrb[16].mxu0 %v890_v25  ;;  %v790_v2 = vadd.f32 %v2601_v63, %v413_v14 }
 0x3b7   :  { %v2602_v1 = vpop.f32.mrb[10].mxu1  ;;  %v782_v30 = vadd.f32 %v781_v27, %v413_v14  ;;  %2862 = vmatpush3.bf16.msra.mxu1 %v2859_v33 }
 0x3b8   :  { %v793_v28 = vadd.f32 %v2602_v1, %v413_v14  ;;  %v784_v29 = vpop.f32.mrb[11].mxu1  ;;  %2864 = vmatprep.subr.bf16.mxu1 %v2863_v34 }
 0x3b9   :  { %v785_v46 = vadd.f32 %v784_v29, %v413_v14  ;;  %v2887_v14 = vpack.c.bf16 %v1240_v62, %v1239_v60 }
 0x3ba   :  { %v892_v57 = vpack.c.bf16 %v793_v28, %v790_v2 }
 0x3bb   :  { %v891_v31 = vpack.c.bf16 %v785_v46, %v782_v30  ;;  %2866 = vmatpush3.bf16.msra.mxu1 %v2863_v34 }
 0x3bc   :  { %2868 = vmatprep.subr.bf16.mxu1 %v2867_v41 }
 0x3bd   :  { %2643 = vmatprep.mubr.bf16.mxu1 %v891_v31  ;;  %2667 = vmatprep.mubr.bf16.mxu0 %v891_v31 }
 0x3be   :  { %2644 = vmatmul.mubr.bf16.gmra.mrb[16].mxu1 %v892_v57  ;;  %2668 = vmatmul.mubr.bf16.gmra.mrb[20].mxu0 %v892_v57 }
 0x3bf   :  { %2870 = vmatpush3.bf16.msra.mxu1 %v2867_v41 }
 0x3c0   :  { %2872 = vmatprep.subr.bf16.mxu1 %v2871_v21 }
 0x3c3   :  { %2874 = vmatpush3.bf16.msra.mxu1 %v2871_v21 }
 0x3c4   :  { %2876 = vmatprep.subr.bf16.mxu1 %v2875_v20 }
 0x3c7   :  { %2878 = vmatpush3.bf16.msra.mxu1 %v2875_v20 }
 0x3c8   :  { %2880 = vmatprep.subr.bf16.mxu1 %v2879_v39 }
 0x3cb   :  { %2882 = vmatpush3.bf16.msra.mxu1 %v2879_v39 }
 0x3cc   :  { %2884 = vmatprep.subr.bf16.mxu1 %v2883_v58 }
 0x3cf   :  { %2886 = vmatpush3.bf16.msra.mxu1 %v2883_v58 }
 0x3d0   :  { %2888 = vmatprep.subr.bf16.mxu1 %v2887_v14 }
 0x3d3   :  { %2890 = vmatpush3.bf16.msra.mxu1 %v2887_v14 }
 0x3d4   :  { %2759 = vmatprep.subr.bf16.mxu1 %v3276_v0 }
 0x45d   :  { %v883_v48 = vpop.f32.mrb[12].mxu0 }
 0x45e   :  { %v2621_v13 = vpop.f32.mrb[13].mxu0  ;;  %v884_v18 = vadd.f32 %v883_v48, %v800_v12 }
 0x45f   :  { %v886_v3 = vpop.f32.mrb[14].mxu0 }
 0x460   :  { %v2622_v4 = vpop.f32.mrb[15].mxu0  ;;  %v1135_v19 = vrot.slane %v884_v18, %v1134_v54  ;;  %v1128_v56 = vcombine.high %v884_v18, %v884_v18 }
 0x462   :  { %v1143_v59 = vcombine.high %v1135_v19, %v1135_v19  ;;  %v1151_v22 = vrot.slane %v1135_v19, %v1134_v54  ;;  %v1142_v45 = vrot.slane %v1128_v56, %v1134_v54  ;;  %v1492_v19 = vld [vmem:[#allocation13 + $0x8] sm:$0xff] }
 0x464   :  { %v1165_v23 = vrot.slane %v1143_v59, %v1134_v54  ;;  %v1173_v24 = vcombine.high %v1151_v22, %v1151_v22  ;;  %v1144_v25 = vcombine.high %v1142_v45, %v1142_v45  ;;  %v1158_v1 = vrot.slane %v1142_v45, %v1134_v54  ;;  %v1493_v59 = vld [vmem:[#allocation13 + $0x10] sm:$0xff] }
 0x465   :  { %v1180_v57 = vrot.slane %v1151_v22, %v3456_v16  ;;  %v1494_v22 = vld [vmem:[#allocation13 + $0x18] sm:$0xff] }
 0x466   :  { %v1175_v26 = vcombine.high %v1165_v23, %v1165_v23  ;;  %v1188_v28 = vrot.slane %v1173_v24, %v3456_v16  ;;  %v1172_v34 = vrot.slane %v1144_v25, %v1134_v54  ;;  %v1184_v41 = vrot.slane %v1165_v23, %v3456_v16  ;;  %v1491_v54 = vld [vmem:[#allocation13] sm:$0xff]  ;;  %v1497_v25 = vld [vmem:[#allocation13 + $0x30] sm:$0xff] }
 0x467   :  { %v1174_v5 = vcombine.high %v1158_v1, %v1158_v1  ;;  %v1196_v58 = vrot.slane %v1158_v1, %v3456_v16  ;;  %v2891_v56 = vpack.c.bf16 %v1492_v19, %v1491_v54  ;;  %v2895_v45 = vpack.c.bf16 %v1494_v22, %v1493_v59  ;;  %v1495_v23 = vld [vmem:[#allocation13 + $0x20] sm:$0xff] }
 0x468   :  { %v1192_v32 = vrot.slane %v1175_v26, %v3456_v16  ;;  %v1176_v47 = vcombine.high %v1172_v34, %v1172_v34  ;;  %v1200_v12 = vrot.slane %v1172_v34, %v3456_v16  ;;  %v1498_v26 = vld [vmem:[#allocation13 + $0x38] sm:$0xff] }
 0x469   :  { %v1204_v52 = vrot.slane %v1174_v5, %v3456_v16  ;;  %2892 = vmatprep.subr.bf16.mxu0 %v2891_v56  ;;  %v2903_v1 = vpack.c.bf16 %v1498_v26, %v1497_v25 }
 0x46a   :  { %v1208_v13 = vrot.slane %v1176_v47, %v3456_v16  ;;  %2894 = vmatpush3.bf16.msra.mxu0 %v2891_v56 }
 0x46b   :  { %2896 = vmatprep.subr.bf16.mxu0 %v2895_v45 }
 0x46e   :  { %2898 = vmatpush3.bf16.msra.mxu0 %v2895_v45 }
 0x489   :  { %v2641_v63 = vpop.f32.mrb[12].mxu1  ;;  %v3664_v27 = vpop.f32.mrb[16].mxu0 }
 0x48a   :  { %v988_v2 = vadd.f32 %v2641_v63, %v896_v53  ;;  %v979_v29 = vpop.f32.mrb[13].mxu1  ;;  %v3667_v30 = vpop.f32.mrb[17].mxu0  ;;  %v1499_v63 = vld [vmem:[#allocation13 + $0x40] sm:$0xff] }
 0x48b   :  { %v980_v46 = vadd.f32 %v979_v29, %v896_v53  ;;  %v2642_v31 = vpop.f32.mrb[14].mxu1  ;;  %v3670_v61 = vpop.f32.mrb[18].mxu0  ;;  %v1501_v29 = vld [vmem:[#allocation13 + $0x50] sm:$0xff] }
 0x48c   :  { %v1219_v17 = vmul.f32 %v1188_v28, %v988_v2  ;;  %v991_v10 = vadd.f32 %v2642_v31, %v896_v53  ;;  %v982_v33 = vpop.f32.mrb[15].mxu1  ;;  %v3673_v9 = vpop.f32.mrb[19].mxu0  ;;  %v1500_v2 = vld [vmem:[#allocation13 + $0x48] sm:$0xff]  ;;  %v1503_v31 = vld [vmem:[#allocation13 + $0x60] sm:$0xff] }
 0x48d   :  { %v1217_v35 = vmul.f32 %v1180_v57, %v980_v46  ;;  %v983_v36 = vadd.f32 %v982_v33, %v896_v53  ;;  %v2907_v28 = vpack.c.bf16 %v1500_v2, %v1499_v63  ;;  %v1502_v46 = vld [vmem:[#allocation13 + $0x58] sm:$0xff] }
 0x48e   :  { %v1220_v6 = vmul.f32 %v1192_v32, %v991_v10  ;;  %v2911_v57 = vpack.c.bf16 %v1502_v46, %v1501_v29  ;;  %v1505_v32 = vld [vmem:[#allocation13 + $0x70] sm:$0xff]  ;;  %v1506_v33 = vld [vmem:[#allocation13 + $0x78] sm:$0xff] }
 0x48f   :  { %v1218_v21 = vmul.f32 %v1184_v41, %v983_v36  ;;  %2703 = vmatprep.mubr.f32.mxu1 %v1217_v35  ;;  %v2919_v34 = vpack.c.bf16 %v1506_v33, %v1505_v32  ;;  %v1346_v35 = vld [vmem:[%s3830_s9] sm:$0xff] }
 0x491   :  { %v2645_v44 = vpop.f32.mrb[16].mxu1  ;;  %v3676_v20 = vpop.f32.mrb[20].mxu0  ;;  %2704 = vmatmul.mubr.f32.vlgmr.msra.gmra.mrb[20].mxu1 %v1218_v21 }
 0x492   :  { %v1004_v49 = vadd.f32 %v2645_v44, %v896_v53  ;;  %v995_v39 = vpop.f32.mrb[17].mxu1  ;;  %v3679_v55 = vpop.f32.mrb[21].mxu0  ;;  %2706 = vmatprep.mubr.f32.mxu1 %v1219_v17  ;;  %v1504_v17 = vld [vmem:[#allocation13 + $0x68] sm:$0xff] }
 0x493   :  { %v996_v42 = vadd.f32 %v995_v39, %v896_v53  ;;  %v2646_v60 = vpop.f32.mrb[18].mxu1  ;;  %v3682_v62 = vpop.f32.mrb[22].mxu0  ;;  %v2915_v10 = vpack.c.bf16 %v1504_v17, %v1503_v31 }
 0x494   :  { %v1223_v14 = vmul.f32 %v1204_v52, %v1004_v49  ;;  %v1007_v48 = vadd.f32 %v2646_v60, %v896_v53  ;;  %v998_v3 = vpop.f32.mrb[19].mxu1  ;;  %v3685_v4 = vpop.f32.mrb[23].mxu0 }
 0x495   :  { %v1221_v11 = vmul.f32 %v1196_v58, %v996_v42  ;;  %v999_v50 = vadd.f32 %v998_v3, %v896_v53  ;;  %2707 = vmatmul.mubr.f32.gmra.mrb[22].mxu1 %v1220_v6  ;;  %v1496_v53 = vld [vmem:[#allocation13 + $0x28] sm:$0xff] }
 0x496   :  { %v1224_v40 = vmul.f32 %v1208_v13, %v1007_v48  ;;  %v2899_v24 = vpack.c.bf16 %v1496_v53, %v1495_v23 }
 0x497   :  { %v1222_v18 = vmul.f32 %v1200_v12, %v999_v50  ;;  %2709 = vmatprep.mubr.f32.mxu1 %v1221_v11 }
 0x498   :  { %2900 = vmatprep.subr.bf16.mxu0 %v2899_v24 }
 0x499   :  { %2710 = vmatmul.mubr.f32.gmra.mrb[24].mxu1 %v1222_v18  ;;  %2902 = vmatpush3.bf16.msra.mxu0 %v2899_v24 }
 0x49a   :  { %2712 = vmatprep.mubr.f32.mxu1 %v1223_v14  ;;  %2904 = vmatprep.subr.bf16.mxu0 %v2903_v1 }
 0x49d   :  { %2713 = vmatmul.mubr.f32.gmra.mrb[26].mxu1 %v1224_v40  ;;  %2906 = vmatpush3.bf16.msra.mxu0 %v2903_v1 }
 0x49e   :  { %2775 = vmatprep.mubr.msk.bf16.mxu1 %vm3277_vm0, %v3276_v0  ;;  %2908 = vmatprep.subr.bf16.mxu0 %v2907_v28 }
 0x4a1   :  { %2910 = vmatpush3.bf16.msra.mxu0 %v2907_v28 }
 0x4a2   :  { %2912 = vmatprep.subr.bf16.mxu0 %v2911_v57 }
 0x4a5   :  { %2914 = vmatpush3.bf16.msra.mxu0 %v2911_v57 }
 0x4a6   :  { %2916 = vmatprep.subr.bf16.mxu0 %v2915_v10 }
 0x4a9   :  { %2918 = vmatpush3.bf16.msra.mxu0 %v2915_v10 }
 0x4aa   :  { %2920 = vmatprep.subr.bf16.mxu0 %v2919_v34 }
 0x4ad   :  { %2922 = vmatpush3.bf16.msra.mxu0 %v2919_v34 }
 0x4ae   :  { %2779 = vmatprep.subr.bf16.mxu0 %v3276_v0 }
 0x564   :  { %v2705_v36 = vpop.f32.mrb[20].mxu1 }
 0x565   :  { %v1348_v41 = vadd.f32 %v2705_v36, %v1346_v35  ;;  %v1307_v6 = vpop.f32.mrb[21].mxu1 }
 0x566   :  { %v1347_v5 = vadd.f32 %v1346_v35, %v1307_v6 }
 0x567   :  { %v1361_v21 = vrot.slane %v1348_v41, 4 }
 0x568   :  { %v1355_v47 = vrot.slane %v1347_v5, 4  ;;  %v2708_v44 = vpop.f32.mrb[22].mxu1 }
 0x569   :  { %v1362_v49 = vmax.f32 %v1348_v41, %v1361_v21  ;;  %v1350_v52 = vadd.f32 %v2708_v44, %v1346_v35  ;;  %v1317_v39 = vpop.f32.mrb[23].mxu1 }
 0x56a   :  { %v1356_v42 = vmax.f32 %v1347_v5, %v1355_v47  ;;  %v1349_v58 = vadd.f32 %v1346_v35, %v1317_v39 }
 0x56b   :  { %v1363_v60 = vrot.slane %v1362_v49, 2  ;;  %v1373_v14 = vrot.slane %v1350_v52, 4 }
 0x56c   :  { %v1357_v48 = vrot.slane %v1356_v42, 2  ;;  %v1367_v13 = vrot.slane %v1349_v58, 4  ;;  %v2711_v3 = vpop.f32.mrb[24].mxu1 }
 0x56d   :  { %v1364_v11 = vmax.f32 %v1362_v49, %v1363_v60  ;;  %v1374_v50 = vmax.f32 %v1350_v52, %v1373_v14  ;;  %v1352_v12 = vadd.f32 %v2711_v3, %v1346_v35  ;;  %v1327_v40 = vpop.f32.mrb[25].mxu1 }
 0x56e   :  { %v1358_v18 = vmax.f32 %v1356_v42, %v1357_v48  ;;  %v1368_v54 = vmax.f32 %v1349_v58, %v1367_v13  ;;  %v1351_v19 = vadd.f32 %v1346_v35, %v1327_v40 }
 0x56f   :  { %v1365_v56 = vrot.slane %v1364_v11, 1  ;;  %v1375_v59 = vrot.slane %v1374_v50, 2  ;;  %v1385_v22 = vrot.slane %v1352_v12, 4 }
 0x570   :  { %v1359_v45 = vrot.slane %v1358_v18, 1  ;;  %v1369_v23 = vrot.slane %v1368_v54, 2  ;;  %v1379_v53 = vrot.slane %v1351_v19, 4  ;;  %v2714_v24 = vpop.f32.mrb[26].mxu1 }
 0x571   :  { %v1366_v25 = vmax.f32 %v1364_v11, %v1365_v56  ;;  %v1376_v26 = vmax.f32 %v1374_v50, %v1375_v59  ;;  %v1386_v63 = vmax.f32 %v1352_v12, %v1385_v22  ;;  %v1354_v1 = vadd.f32 %v2714_v24, %v1346_v35  ;;  %v1337_v2 = vpop.f32.mrb[27].mxu1 }
 0x572   :  { %v1360_v28 = vmax.f32 %v1358_v18, %v1359_v45  ;;  %v1370_v29 = vmax.f32 %v1368_v54, %v1369_v23  ;;  %v1380_v46 = vmax.f32 %v1351_v19, %v1379_v53  ;;  %v1353_v57 = vadd.f32 %v1346_v35, %v1337_v2 }
 0x573   :  { %v1404_v31 = vsub.f32 %v1348_v41, %v1366_v25  ;;  %v1377_v17 = vrot.slane %v1376_v26, 1  ;;  %v1387_v10 = vrot.slane %v1386_v63, 2  ;;  %v1397_v32 = vrot.slane %v1354_v1, 4 }
 0x574   :  { %v1403_v33 = vsub.f32 %v1347_v5, %v1360_v28  ;;  %v1371_v34 = vrot.slane %v1370_v29, 1  ;;  %v1381_v36 = vrot.slane %v1380_v46, 2  ;;  %v1391_v6 = vrot.slane %v1353_v57, 4 }
 0x575   :  { %v1413_v21 = vmul.f32 1.442695, %v1404_v31  ;;  %v1378_v47 = vmax.f32 %v1376_v26, %v1377_v17  ;;  %v1388_v44 = vmax.f32 %v1386_v63, %v1387_v10  ;;  %v1398_v49 = vmax.f32 %v1354_v1, %v1397_v32 }
 0x576   :  { %v1411_v39 = vmul.f32 1.442695, %v1403_v33  ;;  %v1372_v42 = vmax.f32 %v1370_v29, %v1371_v34  ;;  %v1382_v60 = vmax.f32 %v1380_v46, %v1381_v36  ;;  %v1392_v14 = vmax.f32 %v1353_v57, %v1391_v6 }
 0x577   :  { %3040 = vpow2.f32 %v1413_v21  ;;  %v1406_v48 = vsub.f32 %v1350_v52, %v1378_v47  ;;  %v1389_v13 = vrot.slane %v1388_v44, 1  ;;  %v1399_v35 = vrot.slane %v1398_v49, 2 }
 0x578   :  { %3042 = vpow2.f32 %v1411_v39  ;;  %v1405_v41 = vsub.f32 %v1349_v58, %v1372_v42  ;;  %v1383_v3 = vrot.slane %v1382_v60, 1  ;;  %v1393_v11 = vrot.slane %v1392_v14, 2 }
 0x579   :  { %v1417_v5 = vmul.f32 1.442695, %v1406_v48  ;;  %v1390_v50 = vmax.f32 %v1388_v44, %v1389_v13  ;;  %v1400_v40 = vmax.f32 %v1398_v49, %v1399_v35 }
 0x57a   :  { %v1415_v18 = vmul.f32 1.442695, %v1405_v41  ;;  %v1384_v54 = vmax.f32 %v1382_v60, %v1383_v3  ;;  %v1394_v56 = vmax.f32 %v1392_v14, %v1393_v11 }
 0x57b   :  { %3044 = vpow2.f32 %v1417_v5  ;;  %v1408_v59 = vsub.f32 %v1352_v12, %v1390_v50  ;;  %v1401_v22 = vrot.slane %v1400_v40, 1 }
 0x57c   :  { %3046 = vpow2.f32 %v1415_v18  ;;  %v1407_v45 = vsub.f32 %v1351_v19, %v1384_v54  ;;  %v1395_v23 = vrot.slane %v1394_v56, 1 }
 0x57d   :  { %v1421_v53 = vmul.f32 1.442695, %v1408_v59  ;;  %v1402_v52 = vmax.f32 %v1400_v40, %v1401_v22 }
 0x57e   :  { %v1419_v24 = vmul.f32 1.442695, %v1407_v45  ;;  %v1396_v25 = vmax.f32 %v1394_v56, %v1395_v23 }
 0x57f   :  { %3048 = vpow2.f32 %v1421_v53  ;;  %v1410_v58 = vsub.f32 %v1354_v1, %v1402_v52 }
 0x580   :  { %3050 = vpow2.f32 %v1419_v24  ;;  %v1409_v26 = vsub.f32 %v1353_v57, %v1396_v25 }
 0x581   :  { %v3694_v63 = vpop.eup %3040  ;;  %v1425_v2 = vmul.f32 1.442695, %v1410_v58 }
 0x582   :  { %v3696_v28 = vpop.eup %3042  ;;  %v1423_v29 = vmul.f32 1.442695, %v1409_v26  ;;  %v1433_v12 = vrot.slane %v3694_v63, 4 }
 0x583   :  { %3052 = vpow2.f32 %v1425_v2  ;;  %v1427_v19 = vrot.slane %v3696_v28, 4 }
 0x584   :  { %3054 = vpow2.f32 %v1423_v29  ;;  %v1434_v46 = vadd.f32 %v3694_v63, %v1433_v12 }
 0x585   :  { %v3701_v31 = vpop.eup %3044  ;;  %v1428_v1 = vadd.f32 %v3696_v28, %v1427_v19 }
 0x586   :  { %v3704_v17 = vpop.eup %3046  ;;  %v1435_v57 = vrot.slane %v1434_v46, 2  ;;  %v1445_v10 = vrot.slane %v3701_v31, 4 }
 0x587   :  { %v1429_v32 = vrot.slane %v1428_v1, 2  ;;  %v1439_v33 = vrot.slane %v3704_v17, 4 }
 0x588   :  { %v1436_v34 = vadd.f32 %v1435_v57, %v1434_v46  ;;  %v1446_v36 = vadd.f32 %v3701_v31, %v1445_v10 }
 0x589   :  { %v3709_v6 = vpop.eup %3048  ;;  %v1430_v21 = vadd.f32 %v1429_v32, %v1428_v1  ;;  %v1440_v47 = vadd.f32 %v3704_v17, %v1439_v33 }
 0x58a   :  { %v3051_v44 = vpop.eup %3050  ;;  %v1437_v49 = vrot.slane %v1436_v34, 1  ;;  %v1447_v39 = vrot.slane %v1446_v36, 2  ;;  %v1457_v42 = vrot.slane %v3709_v6, 4 }
 0x58b   :  { %v1431_v60 = vrot.slane %v1430_v21, 1  ;;  %v1441_v14 = vrot.slane %v1440_v47, 2  ;;  %v1451_v48 = vrot.slane %v3051_v44, 4 }
 0x58c   :  { %v1438_v13 = vadd.f32 %v1437_v49, %v1436_v34  ;;  %v1448_v35 = vadd.f32 %v1447_v39, %v1446_v36  ;;  %v1458_v41 = vadd.f32 %v3709_v6, %v1457_v42 }
 0x58d   :  { %v3053_v3 = vpop.eup %3052  ;;  %v1432_v11 = vadd.f32 %v1431_v60, %v1430_v21  ;;  %v1442_v5 = vadd.f32 %v1441_v14, %v1440_v47  ;;  %v1452_v50 = vadd.f32 %v3051_v44, %v1451_v48 }
 0x58e   :  { %v3055_v40 = vpop.eup %3054  ;;  %3056 = vrcp.f32 %v1438_v13  ;;  %v1449_v18 = vrot.slane %v1448_v35, 1  ;;  %v1459_v54 = vrot.slane %v1458_v41, 2  ;;  %v1469_v56 = vrot.slane %v3053_v3, 4 }
 0x58f   :  { %3058 = vrcp.f32 %v1432_v11  ;;  %v1443_v59 = vrot.slane %v1442_v5, 1  ;;  %v1453_v22 = vrot.slane %v1452_v50, 2  ;;  %v1463_v45 = vrot.slane %v3055_v40, 4 }
 0x590   :  { %v1450_v23 = vadd.f32 %v1449_v18, %v1448_v35  ;;  %v1460_v53 = vadd.f32 %v1459_v54, %v1458_v41  ;;  %v1470_v52 = vadd.f32 %v3053_v3, %v1469_v56  ;;  %v2989_v18 = vld [vmem:[#allocation8 + $0x138] sm:$0xff]   ;;  %v2998_v54 = vld [vmem:[#allocation8 + $0x180] sm:$0xff]   ;;  %v2999_v56 = vld [vmem:[#allocation8 + $0x188] sm:$0xff]  }
 0x591   :  { %v1444_v24 = vadd.f32 %v1443_v59, %v1442_v5  ;;  %v1454_v25 = vadd.f32 %v1453_v22, %v1452_v50  ;;  %v1464_v58 = vadd.f32 %v3055_v40, %v1463_v45  ;;  %v2987_v50 = vld [vmem:[#allocation8 + $0x128] sm:$0xff]   ;;  %v3000_v59 = vld [vmem:[#allocation8 + $0x190] sm:$0xff]   ;;  %v3001_v22 = vld [vmem:[#allocation8 + $0x198] sm:$0xff]  }
 0x592   :  { %3060 = vrcp.f32 %v1450_v23  ;;  %v1461_v26 = vrot.slane %v1460_v53, 1  ;;  %v1471_v2 = vrot.slane %v1470_v52, 2  ;;  %v3002_v45 = vld [vmem:[#allocation8 + $0x1a0] sm:$0xff]   ;;  %v3003_v23 = vld [vmem:[#allocation8 + $0x1a8] sm:$0xff]  }
 0x593   :  { %3062 = vrcp.f32 %v1444_v24  ;;  %v1455_v29 = vrot.slane %v1454_v25, 1  ;;  %v1465_v12 = vrot.slane %v1464_v58, 2  ;;  %v3740_v24 = vld [vmem:[%s3828_s7] sm:$0xff] }
 0x594   :  { %v1462_v19 = vadd.f32 %v1461_v26, %v1460_v53  ;;  %v1472_v46 = vadd.f32 %v1471_v2, %v1470_v52  ;;  %v3004_v53 = vld [vmem:[#allocation8 + $0x1b0] sm:$0xff]   ;;  %v1012_v52 = vsub.s32 6, %v3453_v15 }
 0x595   :  { %v1456_v1 = vadd.f32 %v1455_v29, %v1454_v25  ;;  %v1466_v57 = vadd.f32 %v1465_v12, %v1464_v58 }
 0x596   :  { %3064 = vrcp.f32 %v1462_v19  ;;  %v1473_v10 = vrot.slane %v1472_v46, 1  ;;  %v1013_v25 = vrot.slane %v3740_v24, %v1012_v52 }
 0x597   :  { %3066 = vrcp.f32 %v1456_v1  ;;  %v1467_v32 = vrot.slane %v1466_v57, 1 }
 0x598   :  { %v3057_v33 = vpop.eup %3056  ;;  %v1474_v34 = vadd.f32 %v1473_v10, %v1472_v46  ;;  %v1100_v58 = vadd.f32 %v3673_v9, %v1013_v25  ;;  %v1097_v26 = vadd.f32 %v3667_v30, %v1013_v25  ;;  %v1108_v46 = vadd.f32 %v3670_v61, %v1013_v25 }
 0x599   :  { %v3059_v36 = vpop.eup %3058  ;;  %v1468_v21 = vadd.f32 %v1467_v32, %v1466_v57  ;;  %v1484_v49 = vmul.f32 %v3057_v33, %v3694_v63  ;;  %v1105_v57 = vadd.f32 %v3664_v27, %v1013_v25  ;;  %v1116_v9 = vadd.f32 %v3685_v4, %v1013_v25 }
 0x59a   :  { %v1483_v47 = vmul.f32 %v3059_v36, %v3696_v28  ;;  %3068 = vrcp.f32 %v1474_v34 }
 0x59b   :  { %3070 = vrcp.f32 %v1468_v21 }
 0x59c   :  { %v3061_v39 = vpop.eup %3060  ;;  %2747 = vmatprep.mubr.f32.mxu0 %v1483_v47 }
 0x59d   :  { %v3063_v42 = vpop.eup %3062  ;;  %2748 = vmatmul.mubr.f32.vlgmr.msra.gmra.mrb[24].mxu0 %v1484_v49  ;;  %v1486_v14 = vmul.f32 %v3061_v39, %v3701_v31  ;;  %v2983_v31 = vld [vmem:[#allocation8 + $0x108] sm:$0xff]   ;;  %v1113_v39 = vadd.f32 %v3679_v55, %v1013_v25 }
 0x59e   :  { %v1485_v60 = vmul.f32 %v3063_v42, %v3704_v17  ;;  %v2982_v17 = vld [vmem:[#allocation8 + $0x100] sm:$0xff]   ;;  %2780 = vmatpush3.bf16.msra.mxu0 %v2998_v54 }
 0x59f   :  { %2760 = vmatpush3.bf16.msra.mxu1 %v2982_v17  ;;  %2781 = vmatprep.subr.bf16.mxu0 %v3276_v0 }
 0x5a0   :  { %v3065_v48 = vpop.eup %3064  ;;  %2750 = vmatprep.mubr.f32.mxu0 %v1485_v60  ;;  %2761 = vmatprep.subr.bf16.mxu1 %v3276_v0 }
 0x5a1   :  { %v3067_v13 = vpop.eup %3066  ;;  %2751 = vmatmul.mubr.f32.gmra.mrb[26].mxu0 %v1486_v14  ;;  %v1488_v41 = vmul.f32 %v3065_v48, %v3709_v6  ;;  %v2984_v6 = vld [vmem:[#allocation8 + $0x110] sm:$0xff]  }
 0x5a2   :  { %v1487_v35 = vmul.f32 %v3067_v13, %v3051_v44  ;;  %v2985_v44 = vld [vmem:[#allocation8 + $0x118] sm:$0xff]   ;;  %2782 = vmatpush3.bf16.msra.mxu0 %v2999_v56 }
 0x5a3   :  { %2762 = vmatpush3.bf16.msra.mxu1 %v2983_v31  ;;  %2783 = vmatprep.subr.bf16.mxu0 %v3276_v0 }
 0x5a4   :  { %v3069_v28 = vpop.eup %3068  ;;  %2753 = vmatprep.mubr.f32.mxu0 %v1487_v35  ;;  %2763 = vmatprep.subr.bf16.mxu1 %v3276_v0  ;;  %v1121_v35 = vadd.f32 %v3676_v20, %v1013_v25 }
 0x5a5   :  { %v3071_v11 = vpop.eup %3070  ;;  %2754 = vmatmul.mubr.f32.gmra.mrb[28].mxu0 %v1488_v41  ;;  %v1490_v5 = vmul.f32 %v3069_v28, %v3053_v3  ;;  %v2986_v3 = vld [vmem:[#allocation8 + $0x120] sm:$0xff]  }
 0x5a6   :  { %v1489_v63 = vmul.f32 %v3071_v11, %v3055_v40  ;;  %v2988_v40 = vld [vmem:[#allocation8 + $0x130] sm:$0xff]   ;;  %2784 = vmatpush3.bf16.msra.mxu0 %v3000_v59 }
 0x5a7   :  { %2764 = vmatpush3.bf16.msra.mxu1 %v2984_v6  ;;  %2785 = vmatprep.subr.bf16.mxu0 %v3276_v0 }
 0x5a8   :  { %2756 = vmatprep.mubr.f32.mxu0 %v1489_v63  ;;  %2765 = vmatprep.subr.bf16.mxu1 %v3276_v0  ;;  %v1124_v63 = vadd.f32 %v3682_v62, %v1013_v25 }
 0x5a9   :  { %2757 = vmatmul.mubr.f32.gmra.mrb[30].mxu0 %v1490_v5 }
 0x5aa   :  { %2795 = vmatprep.mubr.msk.bf16.mxu0 %vm3277_vm0, %v3276_v0  ;;  %2786 = vmatpush3.bf16.msra.mxu0 %v3001_v22 }
 0x5ab   :  { %2766 = vmatpush3.bf16.msra.mxu1 %v2985_v44  ;;  %2787 = vmatprep.subr.bf16.mxu0 %v3276_v0 }
 0x5ac   :  { %2767 = vmatprep.subr.bf16.mxu1 %v3276_v0 }
 0x5ae   :  { %2788 = vmatpush3.bf16.msra.mxu0 %v3002_v45 }
 0x5af   :  { %2768 = vmatpush3.bf16.msra.mxu1 %v2986_v3  ;;  %2789 = vmatprep.subr.bf16.mxu0 %v3276_v0 }
 0x5b0   :  { %2769 = vmatprep.subr.bf16.mxu1 %v3276_v0 }
 0x5b2   :  { %2790 = vmatpush3.bf16.msra.mxu0 %v3003_v23 }
 0x5b3   :  { %2770 = vmatpush3.bf16.msra.mxu1 %v2987_v50  ;;  %2791 = vmatprep.subr.bf16.mxu0 %v3276_v0 }
 0x5b4   :  { %2771 = vmatprep.subr.bf16.mxu1 %v3276_v0 }
 0x5b6   :  { %2792 = vmatpush3.bf16.msra.mxu0 %v3004_v53 }
 0x5b7   :  { %2772 = vmatpush3.bf16.msra.mxu1 %v2988_v40  ;;  %2793 = vmatprep.subr.bf16.mxu0 %v3276_v0 }
 0x5b8   :  { %2773 = vmatprep.subr.bf16.mxu1 %v3276_v0 }
 0x5bb   :  { %2774 = vmatpush3.bf16.msra.mxu1 %v2989_v18 }
 0x5bc   :  { %2799 = vmatprep.subr.bf16.mxu1 %v3276_v0 }
 0x670   :  { %v2749_v2 = vpop.f32.mrb[24].mxu0 }
 0x671   :  { %v1613_v29 = vmul.f32 %v2749_v2, %v1100_v58  ;;  %v1573_v12 = vpop.f32.mrb[25].mxu0 }
 0x672   :  { %v1612_v19 = vmul.f32 %v1573_v12, %v1097_v26 }
 0x673   :  { %v1626_v1 = vrot.slane %v1613_v29, 4 }
 0x674   :  { %v1620_v10 = vrot.slane %v1612_v19, 4  ;;  %v2752_v32 = vpop.f32.mrb[26].mxu0 }
 0x675   :  { %v1627_v33 = vadd.f32 %v1626_v1, %v1613_v29  ;;  %v1615_v34 = vmul.f32 %v2752_v32, %v1108_v46  ;;  %v1583_v36 = vpop.f32.mrb[27].mxu0 }
 0x676   :  { %v1621_v21 = vadd.f32 %v1620_v10, %v1612_v19  ;;  %v1614_v47 = vmul.f32 %v1583_v36, %v1105_v57 }
 0x677   :  { %v1628_v49 = vrot.slane %v1627_v33, 2  ;;  %v1638_v30 = vrot.slane %v1615_v34, 4 }
 0x678   :  { %v1622_v42 = vrot.slane %v1621_v21, 2  ;;  %v1632_v60 = vrot.slane %v1614_v47, 4  ;;  %v2755_v14 = vpop.f32.mrb[28].mxu0 }
 0x679   :  { %v1629_v61 = vadd.f32 %v1628_v49, %v1627_v33  ;;  %v1639_v48 = vadd.f32 %v1638_v30, %v1615_v34  ;;  %v1617_v13 = vmul.f32 %v2755_v14, %v1116_v9  ;;  %v1593_v27 = vpop.f32.mrb[29].mxu0 }
 0x67a   :  { %v1623_v41 = vadd.f32 %v1622_v42, %v1621_v21  ;;  %v1633_v28 = vadd.f32 %v1632_v60, %v1614_v47  ;;  %v1616_v11 = vmul.f32 %v1593_v27, %v1113_v39 }
 0x67b   :  { %v1630_v5 = vrot.slane %v1629_v61, 1  ;;  %v1640_v4 = vrot.slane %v1639_v48, 2  ;;  %v1650_v17 = vrot.slane %v1617_v13, 4 }
 0x67c   :  { %v1624_v31 = vrot.slane %v1623_v41, 1  ;;  %v1634_v55 = vrot.slane %v1633_v28, 2  ;;  %v1644_v6 = vrot.slane %v1616_v11, 4  ;;  %v2758_v44 = vpop.f32.mrb[30].mxu0 }
 0x67d   :  { %v1631_v3 = vadd.f32 %v1630_v5, %v1629_v61  ;;  %v1641_v50 = vadd.f32 %v1640_v4, %v1639_v48  ;;  %v1651_v40 = vadd.f32 %v1650_v17, %v1617_v13  ;;  %v1619_v18 = vmul.f32 %v2758_v44, %v1124_v63  ;;  %v1603_v54 = vpop.f32.mrb[31].mxu0 }
 0x67e   :  { %v1625_v56 = vadd.f32 %v1624_v31, %v1623_v41  ;;  %v1635_v20 = vadd.f32 %v1634_v55, %v1633_v28  ;;  %v1645_v59 = vadd.f32 %v1644_v6, %v1616_v11  ;;  %v1618_v22 = vmul.f32 %v1603_v54, %v1121_v35  ;;  %v2991_v54 = vld [vmem:[#allocation8 + $0x148] sm:$0xff]  }
 0x67f   :  { %v1669_v45 = vpack.c.bf16 %v1631_v3, %v1631_v3  ;;  %v1642_v23 = vrot.slane %v1641_v50, 1  ;;  %v1652_v62 = vrot.slane %v1651_v40, 2  ;;  %v1662_v53 = vrot.slane %v1619_v18, 4 }
 0x680   :  { %v1668_v52 = vpack.c.bf16 %v1625_v56, %v1625_v56  ;;  %v1636_v25 = vrot.slane %v1635_v20, 1  ;;  %v1646_v58 = vrot.slane %v1645_v59, 2  ;;  %v1656_v26 = vrot.slane %v1618_v22, 4  ;;  %v2992_v56 = vld [vmem:[#allocation8 + $0x150] sm:$0xff]  }
 0x681   :  { %v1689_v2 = vunpack.c.l.b16 %v1669_v45  ;;  %v1643_v29 = vadd.f32 %v1642_v23, %v1641_v50  ;;  %v1653_v12 = vadd.f32 %v1652_v62, %v1651_v40  ;;  %v1663_v19 = vadd.f32 %v1662_v53, %v1619_v18  ;;  %v2990_v40 = vld [vmem:[#allocation8 + $0x140] sm:$0xff]   ;;  %v2996_v45 = vld [vmem:[#allocation8 + $0x170] sm:$0xff]   ;;  %v2997_v23 = vld [vmem:[#allocation8 + $0x178] sm:$0xff]  }
 0x682   :  { %v1688_v46 = vunpack.c.l.b16 %v1668_v52  ;;  %v1637_v1 = vadd.f32 %v1636_v25, %v1635_v20  ;;  %v1647_v57 = vadd.f32 %v1646_v58, %v1645_v59  ;;  %v1657_v10 = vadd.f32 %v1656_v26, %v1618_v22  ;;  %v2993_v20 = vld [vmem:[#allocation8 + $0x158] sm:$0xff]   ;;  %v2994_v59 = vld [vmem:[#allocation8 + $0x160] sm:$0xff]   ;;  %v2995_v22 = vld [vmem:[#allocation8 + $0x168] sm:$0xff]  }
 0x683   :  { %v1671_v32 = vpack.c.bf16 %v1643_v29, %v1643_v29  ;;  %v1654_v33 = vrot.slane %v1653_v12, 1  ;;  %v1664_v34 = vrot.slane %v1663_v19, 2  ;;  %v3005_v62 = vld [vmem:[#allocation8 + $0x1b8] sm:$0xff]   ;;  %v1678_v53 = vsub.s32 7, %v3453_v15 }
 0x684   :  { %v1697_v36 = vsel %vm1696_vm1, %v1689_v2, %v1688_v46  ;;  %v1670_v21 = vpack.c.bf16 %v1637_v1, %v1637_v1  ;;  %v1648_v47 = vrot.slane %v1647_v57, 1  ;;  %v1658_v9 = vrot.slane %v1657_v10, 2  ;;  %2794 = vmatpush3.bf16.msra.mxu0 %v3005_v62  ;;  %v3017_v62 = vld [vmem:[#allocation10 + $0x18] sm:$0xff]  }
 0x685   :  { %v1655_v49 = vadd.f32 %v1654_v33, %v1653_v12  ;;  %v1665_v30 = vadd.f32 %v1664_v34, %v1663_v19  ;;  %v1691_v14 = vunpack.c.l.b16 %v1671_v32  ;;  %2819 = vmatprep.subr.bf16.mxu0 %v3276_v0  ;;  %v1679_v52 = vrot.slane %v3740_v24, %v1678_v53  ;;  %v3018_v53 = vld [vmem:[#allocation10 + $0x20] sm:$0xff]  }
 0x686   :  { %v1690_v39 = vunpack.c.l.b16 %v1670_v21  ;;  %v1649_v42 = vadd.f32 %v1648_v47, %v1647_v57  ;;  %v1659_v60 = vadd.f32 %v1658_v9, %v1657_v10  ;;  %v3773_v57 = vld [vmem:[%s3828_s7 + $0x8] sm:$0xff]  ;;  %v3006_v47 = vld [vmem:[#allocation8 + $0x1c0] sm:$0xff]  }
 0x687   :  { %v1673_v61 = vpack.c.bf16 %v1655_v49, %v1655_v49  ;;  %v1666_v48 = vrot.slane %v1665_v30, 1  ;;  %v1980_v24 = vrot.slane %v3773_v57, %v3456_v16  ;;  %v3008_v16 = vld [vmem:[#allocation8 + $0x1d0] sm:$0xff]  }
 0x688   :  { %v1699_v13 = vsel %vm1698_vm2, %v1690_v39, %v1697_v36  ;;  %v1672_v27 = vpack.c.bf16 %v1649_v42, %v1649_v42  ;;  %v1660_v35 = vrot.slane %v1659_v60, 1  ;;  %v3007_v42 = vld [vmem:[#allocation8 + $0x1c8] sm:$0xff]  }
 0x689   :  { %v1701_v41 = vsel %vm1700_vm3, %v1691_v14, %v1699_v13  ;;  %v1667_v28 = vadd.f32 %v1666_v48, %v1665_v30  ;;  %v1693_v5 = vunpack.c.l.b16 %v1673_v61  ;;  %v3010_v14 = vld [vmem:[#allocation8 + $0x1e0] sm:$0xff]   ;;  %v3011_v61 = vld [vmem:[#allocation8 + $0x1e8] sm:$0xff]   ;;  %v3012_v48 = vld [vmem:[#allocation8 + $0x1f0] sm:$0xff]  }
 0x68a   :  { %v1692_v11 = vunpack.c.l.b16 %v1672_v27  ;;  %v1661_v63 = vadd.f32 %v1660_v35, %v1659_v60  ;;  %v3009_v60 = vld [vmem:[#allocation8 + $0x1d8] sm:$0xff]  }
 0x68b   :  { %v1675_v4 = vpack.c.bf16 %v1667_v28, %v1667_v28  ;;  %v3013_v13 = vld [vmem:[#allocation8 + $0x1f8] sm:$0xff]  }
 0x68c   :  { %v1703_v17 = vsel %vm1702_vm4, %v1692_v11, %v1701_v41  ;;  %v1674_v31 = vpack.c.bf16 %v1661_v63, %v1661_v63 }
 0x68d   :  { %v1705_v55 = vsel %vm1704_vm5, %v1693_v5, %v1703_v17  ;;  %v1695_v44 = vunpack.c.l.b16 %v1675_v4  ;;  %v1999_v5 = vrot.slane %v3773_v57, %v400_v37 }
 0x68e   :  { %v1694_v6 = vunpack.c.l.b16 %v1674_v31  ;;  %v2004_v31 = vrot.slane %v3773_v57, %v405_v38 }
 0x690   :  { %v1707_v3 = vsel %vm1706_vm6, %v1694_v6, %v1705_v55 }
 0x691   :  { %v1709_v50 = vsel %vm1708_vm7, %v1695_v44, %v1707_v3 }
 0x692   :  { %v1710_v18 = vpack.c.b16 %v1709_v50, %v1709_v50  ;;  %v2011_v50 = vrot.slane %v3773_v57, %v412_v43  ;;  %v3016_v43 = vld [vmem:[#allocation10 + $0x10] sm:$0xff]  }
 0x694   :  { %2776 = vmatmul.mubr.bf16.vlgmr.msra.gmra.mrb[28].mxu1 %v1710_v18 }
 0x695   :  { %2800 = vmatpush3.bf16.msra.mxu1 %v2990_v40  ;;  %2815 = vmatprep.mubr.msk.bf16.mxu1 %vm3277_vm0, %v3276_v0 }
 0x696   :  { %2801 = vmatprep.subr.bf16.mxu1 %v3276_v0 }
 0x699   :  { %2802 = vmatpush3.bf16.msra.mxu1 %v2991_v54 }
 0x69a   :  { %2803 = vmatprep.subr.bf16.mxu1 %v3276_v0 }
 0x69d   :  { %2804 = vmatpush3.bf16.msra.mxu1 %v2992_v56 }
 0x69e   :  { %2805 = vmatprep.subr.bf16.mxu1 %v3276_v0 }
 0x6a1   :  { %2806 = vmatpush3.bf16.msra.mxu1 %v2993_v20  ;;  %v3014_v20 = vld [vmem:[#allocation10] sm:$0xff]  }
 0x6a2   :  { %2807 = vmatprep.subr.bf16.mxu1 %v3276_v0 }
 0x6a5   :  { %2808 = vmatpush3.bf16.msra.mxu1 %v2994_v59 }
 0x6a6   :  { %2809 = vmatprep.subr.bf16.mxu1 %v3276_v0 }
 0x6a9   :  { %2810 = vmatpush3.bf16.msra.mxu1 %v2995_v22 }
 0x6aa   :  { %2811 = vmatprep.subr.bf16.mxu1 %v3276_v0 }
 0x6ad   :  { %2812 = vmatpush3.bf16.msra.mxu1 %v2996_v45 }
 0x6ae   :  { %2813 = vmatprep.subr.bf16.mxu1 %v3276_v0 }
 0x6b1   :  { %2814 = vmatpush3.bf16.msra.mxu1 %v2997_v23  ;;  %v3015_v23 = vld [vmem:[#allocation10 + $0x8] sm:$0xff]  }
 0x6b2   :  { %2839 = vmatprep.subr.bf16.mxu1 %v3276_v0 }
 0x6b4   :  { %2816 = vmatmul.mubr.bf16.vlgmr.msra.gmra.mrb[32].mxu1 %v3651_v7 }
 0x6b5   :  { %2855 = vmatprep.mubr.msk.bf16.mxu1 %vm3277_vm0, %v3276_v0  ;;  %2840 = vmatpush3.bf16.msra.mxu1 %v3014_v20 }
 0x6b6   :  { %2841 = vmatprep.subr.bf16.mxu1 %v3276_v0 }
 0x6b9   :  { %2842 = vmatpush3.bf16.msra.mxu1 %v3015_v23 }
 0x6ba   :  { %2843 = vmatprep.subr.bf16.mxu1 %v3276_v0 }
 0x6bd   :  { %2844 = vmatpush3.bf16.msra.mxu1 %v3016_v43 }
 0x6be   :  { %2845 = vmatprep.subr.bf16.mxu1 %v3276_v0 }
 0x6c1   :  { %2846 = vmatpush3.bf16.msra.mxu1 %v3017_v62 }
 0x6c2   :  { %2847 = vmatprep.subr.bf16.mxu1 %v3276_v0 }
 0x6c5   :  { %2848 = vmatpush3.bf16.msra.mxu1 %v3018_v53 }
 0x6c6   :  { %2849 = vmatprep.subr.bf16.mxu1 %v3276_v0 }
 0x767   :  { %v1794_v25 = vpop.f32.mrb[28].mxu1 }
 0x768   :  { %v1795_v58 = vadd.f32 %v1794_v25, %v1679_v52  ;;  %v2777_v26 = vpop.f32.mrb[29].mxu1  ;;  %v3019_v52 = vld [vmem:[#allocation10 + $0x28] sm:$0xff]   ;;  %v3020_v25 = vld [vmem:[#allocation10 + $0x30] sm:$0xff]  }
 0x769   :  { %v1797_v2 = vpop.f32.mrb[30].mxu1  ;;  %2850 = vmatpush3.bf16.msra.mxu1 %v3019_v52 }
 0x76a   :  { %v1800_v29 = vpack.c.bf16 %v1795_v58, %v1795_v58  ;;  %v2778_v12 = vpop.f32.mrb[31].mxu1  ;;  %2851 = vmatprep.subr.bf16.mxu1 %v3276_v0  ;;  %v3021_v58 = vld [vmem:[#allocation10 + $0x38] sm:$0xff]  }
 0x76c   :  { %2796 = vmatmul.mubr.bf16.vlgmr.msra.gmra.mrb[32].mxu0 %v1800_v29 }
 0x76d   :  { %2835 = vmatprep.mubr.msk.bf16.mxu0 %vm3277_vm0, %v3276_v0  ;;  %2820 = vmatpush3.bf16.msra.mxu0 %v3006_v47 }
 0x76e   :  { %2821 = vmatprep.subr.bf16.mxu0 %v3276_v0  ;;  %2852 = vmatpush3.bf16.msra.mxu1 %v3020_v25 }
 0x76f   :  { %2853 = vmatprep.subr.bf16.mxu1 %v3276_v0 }
 0x771   :  { %2822 = vmatpush3.bf16.msra.mxu0 %v3007_v42 }
 0x772   :  { %2823 = vmatprep.subr.bf16.mxu0 %v3276_v0  ;;  %2854 = vmatpush3.bf16.msra.mxu1 %v3021_v58 }
 0x775   :  { %2824 = vmatpush3.bf16.msra.mxu0 %v3008_v16 }
 0x776   :  { %2825 = vmatprep.subr.bf16.mxu0 %v3276_v0 }
 0x779   :  { %2826 = vmatpush3.bf16.msra.mxu0 %v3009_v60 }
 0x77a   :  { %2827 = vmatprep.subr.bf16.mxu0 %v3276_v0 }
 0x77d   :  { %2828 = vmatpush3.bf16.msra.mxu0 %v3010_v14 }
 0x77e   :  { %2829 = vmatprep.subr.bf16.mxu0 %v3276_v0 }
 0x781   :  { %2830 = vmatpush3.bf16.msra.mxu0 %v3011_v61 }
 0x782   :  { %2831 = vmatprep.subr.bf16.mxu0 %v3276_v0 }
 0x785   :  { %2832 = vmatpush3.bf16.msra.mxu0 %v3012_v48 }
 0x786   :  { %2833 = vmatprep.subr.bf16.mxu0 %v3276_v0 }
 0x787   :  { %v1971_v7 = vpop.f32.mrb[32].mxu1 }
 0x788   :  { %v2817_v19 = vpop.f32.mrb[33].mxu1 }
 0x789   :  { %v1974_v46 = vpop.f32.mrb[34].mxu1  ;;  %2834 = vmatpush3.bf16.msra.mxu0 %v3013_v13 }
 0x78a   :  { %v2818_v1 = vpop.f32.mrb[35].mxu1  ;;  %v2117_v46 = vrot.slane %v3773_v57, %v799_v8 }
 0x83f   :  { %v1883_v10 = vpop.f32.mrb[32].mxu0 }
 0x840   :  { %v1972_v32 = vadd.f32 %v1971_v7, %v1883_v10  ;;  %v2797_v33 = vpop.f32.mrb[33].mxu0  ;;  %v2122_v10 = vrot.slane %v3773_v57, %v895_v51 }
 0x841   :  { %v1886_v34 = vpop.f32.mrb[34].mxu0 }
 0x842   :  { %v2798_v36 = vpop.f32.mrb[35].mxu0  ;;  %v1981_v21 = vadd.f32 %v1980_v24, %v1972_v32 }
 0x843   :  { %v2338_v36 = vld [vmem:[%s3829_s8] ss:$0 sm:$0xff] }
 0x844   :  { %1982 = vadd.xlane.f32.xlu0 %v1981_v21 }
 0x8d1   :  { %v1983_v9 = vpop.xlane.xlu0 %1982 }
 0x8d2   :  { %v1984_v49 = vmul.f32 0.03125, %v1983_v9 }
 0x8d4   :  { %v1985_v30 = vsub.f32 %v1981_v21, %v1984_v49  ;;  %v1989_v27 = vmul.f32 96.0, %v1984_v49 }
 0x8d6   :  { %v1986_v39 = vmul.f32 %v1985_v30, %v1985_v30  ;;  %v1990_v35 = vmul.f32 %v1989_v27, %v1984_v49 }
 0x8d8   :  { %1987 = vadd.xlane.f32.xlu1 %v1986_v39 }
 0x965   :  { %v1988_v41 = vpop.xlane.xlu1 %1987 }
 0x966   :  { %v1991_v28 = vsub.f32 %v1988_v41, %v1990_v35 }
 0x968   :  { %v1992_v11 = vmul.f32 0.03125, %v1991_v28 }
 0x96a   :  { %v1993_v63 = vadd.f32 1e-05, %v1992_v11 }
 0x96c   :  { %3072 = vrsqrt.f32 %v1993_v63 }
 0x976   :  { %v3073_v4 = vpop.eup %3072 }
 0x977   :  { %v1995_v17 = vmul.f32 %v3073_v4, %v1985_v30 }
 0x979   :  { %v2000_v55 = vmul.f32 %v1999_v5, %v1995_v17 }
 0x97b   :  { %v2005_v6 = vadd.f32 %v2004_v31, %v2000_v55 }
 0x97d   :  { %v2006_v44 = vmax.f32 %v2005_v6, 0.0 }
 0x97f   :  { %v2007_v3 = vpack.c.bf16 %v2006_v44, %v2006_v44 }
 0x981   :  { %2836 = vmatmul.mubr.bf16.vlgmr.msra.gmra.mrb[36].mxu0 %v2007_v3 }
 0xa54   :  { %v2094_v40 = vpop.f32.mrb[36].mxu0 }
 0xa55   :  { %v2095_v18 = vadd.f32 %v2094_v40, %v2011_v50  ;;  %v2837_v54 = vpop.f32.mrb[37].mxu0 }
 0xa56   :  { %v2097_v56 = vpop.f32.mrb[38].mxu0 }
 0xa57   :  { %2100 = vadd.xlane.f32.xlu0 %v2095_v18  ;;  %v2838_v37 = vpop.f32.mrb[39].mxu0 }
 0xae4   :  { %v2101_v38 = vpop.xlane.xlu0 %2100 }
 0xae5   :  { %v2102_v59 = vmul.f32 0.03125, %v2101_v38 }
 0xae7   :  { %v2103_v22 = vsub.f32 %v2095_v18, %v2102_v59  ;;  %v2107_v26 = vmul.f32 96.0, %v2102_v59 }
 0xae9   :  { %v2104_v45 = vmul.f32 %v2103_v22, %v2103_v22  ;;  %v2108_v2 = vmul.f32 %v2107_v26, %v2102_v59 }
 0xaeb   :  { %2105 = vadd.xlane.f32.xlu1 %v2104_v45 }
 0xb78   :  { %v2106_v29 = vpop.xlane.xlu1 %2105 }
 0xb79   :  { %v2109_v12 = vsub.f32 %v2106_v29, %v2108_v2 }
 0xb7b   :  { %v2110_v7 = vmul.f32 0.03125, %v2109_v12 }
 0xb7d   :  { %v2111_v19 = vadd.f32 1e-05, %v2110_v7 }
 0xb7f   :  { %3074 = vrsqrt.f32 %v2111_v19 }
 0xb89   :  { %v3075_v1 = vpop.eup %3074 }
 0xb8a   :  { %v2113_v24 = vmul.f32 %v3075_v1, %v2103_v22 }
 0xb8c   :  { %v2118_v32 = vmul.f32 %v2117_v46, %v2113_v24 }
 0xb8e   :  { %v2123_v0 = vadd.f32 %v2122_v10, %v2118_v32 }
 0xb90   :  { %v2124_v33 = vmax.f32 %v2123_v0, 0.0 }
 0xb92   :  { %v2141_v34 = vpack.c.bf16 %v2124_v33, %v2124_v33 }
 0xb94   :  { %2856 = vmatmul.mubr.bf16.vlgmr.msra.gmra.mrb[36].mxu1 %v2141_v34 }
 0xc67   :  { %v2231_v21 = vpop.f32.mrb[36].mxu1 }
 0xc68   :  { %v2232_v47 = vadd.f32 %v2338_v36, %v2231_v21  ;;  %v2857_v9 = vpop.f32.mrb[37].mxu1 }
 0xc69   :  { %v2234_v49 = vpop.f32.mrb[38].mxu1 }
 0xc6a   :  { %v2858_v8 = vpop.f32.mrb[39].mxu1  ;;  %v2237_v30 = vmul.f32 %v2232_v47, %v2232_v47 }
 0xc6c   :  { %2238 = vadd.xlane.f32.xlu0 %v2237_v30 }
 0xcf9   :  { %v2239_v39 = vpop.xlane.xlu0 %2238 }
 0xcfa   :  { %v2240_v15 = vadd.f32 1e-12, %v2239_v39 }
 0xcfc   :  { %3076 = vrsqrt.f32 %v2240_v15 }
 0xd06   :  { %v3077_v51 = vpop.eup %3076 }
 0xd07   :  { %v2242_v57 = vmul.f32 %v3077_v51, %v2232_v47 }
 0xd09   :  { %2243 = vst [vmem:[#allocation14] sm:$0xff] %v2242_v57 }
 0xd0a   :  { %3244 = shalt.err (!%p3241_p4)
}
 0xd0b   :  { %s3245_s27 = scalar_lea.hbm %s3831_s10, 128 }
 0xd0c   :  { %p3246_p5 = scmp.ne.s32.totalorder %s3831_s10, %s3245_s27  ;;  %p3249_p6 = scmp.lt.u32.totalorder %s3245_s27, %s3831_s10 }
 0xd0e   :  { %p3251_p7 = pnand %p3249_p6, %p3246_p5 }
 0xd10   :  { %3254 = shalt.err (!%p3251_p7)
}
 0xd11   :  { %2253 = dma.vmem_to_hbm [thread:$0]  %s2251_s5, 128, %s3831_s10, [#allocation4]  }
 0xd12   :  { %3263 = dma.done.wait [#allocation4], 128  }
 0xd13   :  { %3264 = vsyncadd [#allocation4], 4294967168 }
 0xd14   :  { %2257 = vsyncpa [#allocation3], 1 }
 0xd15   :  { %2258 = vsyncpa [#allocation6], 1 }
 0xd16   :  { %2259 = vsyncpa [#allocation9], 1 }
 0xd17   :  { %2260 = vsyncpa [#allocation12], 1 }
 0xd18   :  { %2261 = vsyncpa [#allocation4], 1 }

</bundles_post_ra>
